<compile_context>
chip_gen: v7x
topology: tpu7x:2x2x1
jax: 0.10.0
libtpu: 0.0.40
codegen_flags: <defaults>
</compile_context>

<pallas_src>
import functools

import jax
import jax.numpy as jnp
from jax import lax
from jax.experimental import pallas as pl
from jax.experimental.pallas import tpu as pltpu

INPUT_SIZE = 3
HIDDEN = 128
NUM_ACTIONS = 2
H4 = 4 * HIDDEN


def _lstm_fc_kernel(x_ref,      # (T*TILE_B, INPUT_SIZE)  f32, time-major rows
                    wih0_ref,   # (INPUT_SIZE, 4H)        f32
                    whh0_ref,   # (HIDDEN, 4H)            bf16
                    b0_ref,     # (1, 4H)                 f32
                    wih1_ref,   # (HIDDEN, 4H)            bf16
                    whh1_ref,   # (HIDDEN, 4H)            bf16
                    b1_ref,     # (1, 4H)                 f32
                    wfc_ref,    # (HIDDEN, NUM_ACTIONS)   f32
                    bfc_ref,    # (1, NUM_ACTIONS)        f32
                    out_ref,    # (TILE_B, NUM_ACTIONS)   f32
                    gx_ref,     # (T*TILE_B, 4H) f32      VMEM scratch
                    *, T, TILE_B):
    H = HIDDEN
    f32 = jnp.float32
    bf16 = jnp.bfloat16

    # R2: all-timestep input projection (one dense K=3 matmul, layer-0 bias
    # folded in) stored to VMEM scratch so it does not pin ~32 vregs across the
    # unrolled recurrence.  Off the recurrent critical path, so kept in f32.
    gx_ref[...] = (jnp.dot(x_ref[...], wih0_ref[...],
                           preferred_element_type=f32) + b0_ref[...])

    # Hoist weight loads and the layer-1 bias broadcast out of the loop
    # (JAX does not CSE broadcast_in_dim).
    whh0 = whh0_ref[...]
    wih1 = wih1_ref[...]
    whh1 = whh1_ref[...]
    b1 = jnp.broadcast_to(b1_ref[...], (TILE_B, H4))

    def cell_nonlin(g, c):
        # PyTorch gate order i, f, g, o.  i and f are contiguous -> one sigmoid
        # over 2H lanes (R5).
        sif = jax.nn.sigmoid(g[:, :2 * H])
        i, f = sif[:, :H], sif[:, H:]
        gg = jnp.tanh(g[:, 2 * H:3 * H])
        o = jax.nn.sigmoid(g[:, 3 * H:])
        c_new = f * c + i * gg
        return o * jnp.tanh(c_new), c_new

    def step(carry, gx_t):
        h0, c0, h1, c1 = carry
        # R1 + R3: layer-1 recurrent dot depends only on the previous step's
        # h1, so it is issued first and overlaps the layer-0 recurrent matmul.
        g1 = jnp.dot(h1.astype(bf16), whh1, preferred_element_type=f32) + b1
        # layer 0 (input projection already in gx_t)
        g0 = gx_t + jnp.dot(h0.astype(bf16), whh0, preferred_element_type=f32)
        h0, c0 = cell_nonlin(g0, c0)
        # layer 1: second K=128 dot with the fresh h0 (no lane concat).
        g1 = g1 + jnp.dot(h0.astype(bf16), wih1, preferred_element_type=f32)
        h1, c1 = cell_nonlin(g1, c1)
        return (h0, c0, h1, c1)

    zeros = jnp.zeros((TILE_B, H), f32)
    carry = (zeros, zeros, zeros, zeros)

    if T <= 16:
        # Full static unroll: static gx slices, LLO scheduler sees across steps.
        for t in range(T):
            carry = step(carry, gx_ref[t * TILE_B:(t + 1) * TILE_B, :])
    else:
        # R6: bound vreg pressure / code size for long sequences.
        def body(t, carry):
            off = pl.multiple_of(t * TILE_B, TILE_B)
            return step(carry, gx_ref[pl.ds(off, TILE_B), :])
        carry = lax.fori_loop(0, T, body, carry, unroll=4)

    h1 = carry[2]
    # TODO(synk): if run with large batch-tile grids, pad the fc lane dim
    # (2 -> 128) to avoid a masked vst per tile; negligible at current sizes.
    out_ref[...] = (jnp.dot(h1, wfc_ref[...], preferred_element_type=f32)
                    + bfc_ref[...]).astype(out_ref.dtype)


@jax.jit
def dqn_lstm_forward(x, params):
    """x: (B, T, INPUT_SIZE) float32, batch_first (PyTorch convention)."""
    B, T, F = x.shape
    assert F == INPUT_SIZE

    # R4: batch tiling.  Small batches: one tile padded to the f32 sublane
    # multiple (8).  Large batches: 256-row tiles fill the MXU M dim and the
    # "parallel" grid axis shards tiles across both v7x TensorCores.
    if B <= 256:
        tile_b = max(8, ((B + 7) // 8) * 8)
    else:
        tile_b = 256
    b_pad = ((B + tile_b - 1) // tile_b) * tile_b
    n_tiles = b_pad // tile_b

    # Wrapper-side layout plumbing (XLA): time-major, pad batch, group rows so
    # tile g holds rows [t*tile_b + j] for its batch slice.
    x_tm = jnp.transpose(x, (1, 0, 2))                        # (T, B, F)
    if b_pad != B:
        x_tm = jnp.pad(x_tm, ((0, 0), (0, b_pad - B), (0, 0)))
    x_tiles = (x_tm.reshape(T, n_tiles, tile_b, F)
               .transpose(1, 0, 2, 3)
               .reshape(n_tiles, T * tile_b, F))

    # R4 (v7x): explicit VMEM budget -- never assume a v6e-tuned tile fits the
    # 64 MiB physical / 32 MiB default-scoped v7x VMEM.
    weight_bytes = (INPUT_SIZE * H4 * 4 + 3 * HIDDEN * H4 * 2 + 2 * H4 * 4
                    + HIDDEN * NUM_ACTIONS * 4 + NUM_ACTIONS * 4)
    tile_bytes = (T * tile_b * H4 * 4            # gates scratch (f32)
                  + 2 * T * tile_b * F * 4       # double-buffered x tile
                  + 2 * tile_b * NUM_ACTIONS * 4
                  + 2 * weight_bytes)
    vmem_limit = int(min(max(4 * tile_bytes, 32 << 20), 64 << 20))

    def full_spec(shape):
        return pl.BlockSpec(shape, lambda b: (0,) * len(shape))

    kernel = functools.partial(_lstm_fc_kernel, T=T, TILE_B=tile_b)
    out = pl.pallas_call(
        kernel,
        out_shape=jax.ShapeDtypeStruct((b_pad, NUM_ACTIONS), jnp.float32),
        grid=(n_tiles,),
        in_specs=[
            pl.BlockSpec((None, T * tile_b, INPUT_SIZE), lambda b: (b, 0, 0)),
            full_spec((INPUT_SIZE, H4)),
            full_spec((HIDDEN, H4)),
            full_spec((1, H4)),
            full_spec((HIDDEN, H4)),
            full_spec((HIDDEN, H4)),
            full_spec((1, H4)),
            full_spec((HIDDEN, NUM_ACTIONS)),
            full_spec((1, NUM_ACTIONS)),
        ],
        out_specs=pl.BlockSpec((tile_b, NUM_ACTIONS), lambda b: (b, 0)),
        scratch_shapes=[pltpu.VMEM((T * tile_b, H4), jnp.float32)],
        compiler_params=pltpu.CompilerParams(
            dimension_semantics=("parallel",),
            vmem_limit_bytes=vmem_limit),
    )(x_tiles,
      params["wih0"], params["whh0"], params["b0"],
      params["wih1"], params["whh1"], params["b1"],
      params["wfc"], params["bfc"])
    return out[:B]


def init_params(key):
    """Deterministic init mimicking PyTorch's uniform(-1/sqrt(H), 1/sqrt(H))."""
    bound = 1.0 / jnp.sqrt(jnp.float32(HIDDEN))
    ks = jax.random.split(key, 10)

    def u(k, shape):
        return jax.random.uniform(k, shape, jnp.float32, -bound, bound)

    # PyTorch-native shapes
    w_ih_l0 = u(ks[0], (H4, INPUT_SIZE))
    w_hh_l0 = u(ks[1], (H4, HIDDEN))
    b_ih_l0 = u(ks[2], (H4,))
    b_hh_l0 = u(ks[3], (H4,))
    w_ih_l1 = u(ks[4], (H4, HIDDEN))
    w_hh_l1 = u(ks[5], (H4, HIDDEN))
    b_ih_l1 = u(ks[6], (H4,))
    b_hh_l1 = u(ks[7], (H4,))
    w_fc = u(ks[8], (NUM_ACTIONS, HIDDEN))
    b_fc = u(ks[9], (NUM_ACTIONS,))

    return {
        # kernel weights: pre-transposed; recurrent-path MXU operands bf16 (R3)
        "wih0": w_ih_l0.T,                                  # (3, 512)   f32
        "whh0": w_hh_l0.T.astype(jnp.bfloat16),             # (128, 512) bf16
        "wih1": w_ih_l1.T.astype(jnp.bfloat16),             # (128, 512) bf16
        "whh1": w_hh_l1.T.astype(jnp.bfloat16),             # (128, 512) bf16
        "b0": (b_ih_l0 + b_hh_l0).reshape(1, H4),           # (1, 512)
        "b1": (b_ih_l1 + b_hh_l1).reshape(1, H4),           # (1, 512)
        "wfc": w_fc.T,                                      # (128, 2)
        "bfc": b_fc.reshape(1, NUM_ACTIONS),                # (1, 2)
        # f32 masters used only by the pure-JAX reference
        "whh0_f32": w_hh_l0.T,
        "wih1_f32": w_ih_l1.T,
        "whh1_f32": w_hh_l1.T,
    }


def reference_forward(x, p):
    """Pure-JAX f32 reference (lax.scan) for validation."""
    B = x.shape[0]
    H = HIDDEN

    def cell(x_in, h, c, wih, whh, b):
        g = x_in @ wih + h @ whh + b
        i = jax.nn.sigmoid(g[:, 0 * H:1 * H])
        f = jax.nn.sigmoid(g[:, 1 * H:2 * H])
        gg = jnp.tanh(g[:, 2 * H:3 * H])
        o = jax.nn.sigmoid(g[:, 3 * H:4 * H])
        c_new = f * c + i * gg
        return o * jnp.tanh(c_new), c_new

    def step(carry, x_t):
        h0, c0, h1, c1 = carry
        h0, c0 = cell(x_t, h0, c0, p["wih0"], p["whh0_f32"], p["b0"])
        h1, c1 = cell(h0, h1, c1, p["wih1_f32"], p["whh1_f32"], p["b1"])
        return (h0, c0, h1, c1), None

    z = jnp.zeros((B, H), jnp.float32)
    (h0, c0, h1, c1), _ = lax.scan(step, (z, z, z, z),
                                   jnp.transpose(x, (1, 0, 2)))
    return h1 @ p["wfc"] + p["bfc"]


if __name__ == "__main__":
    key = jax.random.PRNGKey(0)
    k_param, k_x = jax.random.split(key)

    B, T = 2, 8  # small shapes: batch=2, seq=8, feature=3 (module input size)
    x = jax.random.normal(k_x, (B, T, INPUT_SIZE), jnp.float32)
    params = init_params(k_param)

    out = dqn_lstm_forward(x, params)
    out = jax.block_until_ready(out)

    ref = reference_forward(x, params)
    assert out.shape == (B, NUM_ACTIONS)
    # bf16 recurrent matmul operands -> relaxed tolerance vs the f32 reference.
    assert jnp.allclose(out, ref, atol=2e-2, rtol=2e-2), (out, ref)

    print("KERNEL_OK")
</pallas_src>

<mosaic_0001>
module attributes {stable_mosaic.version = 11 : i64} {
  func.func @_lstm_fc_kernel(%arg0: i32, %arg1: memref<1x64x3xf32, #tpu.memory_space<vmem>>, %arg2: memref<3x512xf32, #tpu.memory_space<vmem>>, %arg3: memref<128x512xbf16, #tpu.memory_space<vmem>>, %arg4: memref<1x512xf32, #tpu.memory_space<vmem>>, %arg5: memref<128x512xbf16, #tpu.memory_space<vmem>>, %arg6: memref<128x512xbf16, #tpu.memory_space<vmem>>, %arg7: memref<1x512xf32, #tpu.memory_space<vmem>>, %arg8: memref<128x2xf32, #tpu.memory_space<vmem>>, %arg9: memref<1x2xf32, #tpu.memory_space<vmem>>, %arg10: memref<8x2xf32, #tpu.memory_space<vmem>>, %arg11: memref<64x512xf32, #tpu.memory_space<vmem>>) attributes {dimension_semantics = [#tpu.dimension_semantics<parallel>], iteration_bounds = array<i64: 1>, scalar_prefetch = 0 : i64, scratch_operands = 1 : i64, tpu.core_type = #tpu.core_type<tc>, window_params = [{transform_indices = @transform_0, window_bounds = array<i64: 1, 64, 3>}, {pipeline_mode = #tpu.pipeline_mode<synchronous>, transform_indices = @transform_1, window_bounds = array<i64: 3, 512>}, {pipeline_mode = #tpu.pipeline_mode<synchronous>, transform_indices = @transform_2, window_bounds = array<i64: 128, 512>}, {pipeline_mode = #tpu.pipeline_mode<synchronous>, transform_indices = @transform_3, window_bounds = array<i64: 1, 512>}, {pipeline_mode = #tpu.pipeline_mode<synchronous>, transform_indices = @transform_4, window_bounds = array<i64: 128, 512>}, {pipeline_mode = #tpu.pipeline_mode<synchronous>, transform_indices = @transform_5, window_bounds = array<i64: 128, 512>}, {pipeline_mode = #tpu.pipeline_mode<synchronous>, transform_indices = @transform_6, window_bounds = array<i64: 1, 512>}, {pipeline_mode = #tpu.pipeline_mode<synchronous>, transform_indices = @transform_7, window_bounds = array<i64: 128, 2>}, {pipeline_mode = #tpu.pipeline_mode<synchronous>, transform_indices = @transform_8, window_bounds = array<i64: 1, 2>}, {transform_indices = @transform_9, window_bounds = array<i64: 8, 2>}]} {
    %c0 = arith.constant 0 : index
    %c0_0 = arith.constant 0 : index
    %c0_1 = arith.constant 0 : index
    %0 = vector.load %arg1[%c0, %c0_0, %c0_1] : memref<1x64x3xf32, #tpu.memory_space<vmem>>, vector<1x64x3xf32>
    %1 = vector.shape_cast %0 : vector<1x64x3xf32> to vector<64x3xf32>
    %c0_2 = arith.constant 0 : index
    %c0_3 = arith.constant 0 : index
    %2 = vector.load %arg2[%c0_2, %c0_3] : memref<3x512xf32, #tpu.memory_space<vmem>>, vector<3x512xf32>
    %cst = arith.constant dense<0.000000e+00> : vector<64x512xf32>
    %3 = tpu.matmul %1, %2, %cst {dimension_numbers = #tpu.dot_dimension_numbers<[1], [0], [0], [1], [0, 0, 1, 1], [], []>} : vector<64x3xf32>, vector<3x512xf32>, vector<64x512xf32> -> vector<64x512xf32>
    %c0_4 = arith.constant 0 : index
    %c0_5 = arith.constant 0 : index
    %4 = vector.load %arg4[%c0_4, %c0_5] : memref<1x512xf32, #tpu.memory_space<vmem>>, vector<1x512xf32>
    %5 = vector.broadcast %4 : vector<1x512xf32> to vector<64x512xf32>
    %6 = arith.addf %3, %5 : vector<64x512xf32>
    %c0_6 = arith.constant 0 : index
    %c0_7 = arith.constant 0 : index
    %7 = vector.load %arg11[%c0_6, %c0_7] : memref<64x512xf32, #tpu.memory_space<vmem>>, vector<64x512xf32>
    tpu.vector_store %arg11[%c0_6, %c0_7], %6 {strides = array<i32>} : memref<64x512xf32, #tpu.memory_space<vmem>>, vector<64x512xf32>,
    %c0_8 = arith.constant 0 : index
    %c0_9 = arith.constant 0 : index
    %8 = vector.load %arg3[%c0_8, %c0_9] : memref<128x512xbf16, #tpu.memory_space<vmem>>, vector<128x512xbf16>
    %c0_10 = arith.constant 0 : index
    %c0_11 = arith.constant 0 : index
    %9 = vector.load %arg5[%c0_10, %c0_11] : memref<128x512xbf16, #tpu.memory_space<vmem>>, vector<128x512xbf16>
    %c0_12 = arith.constant 0 : index
    %c0_13 = arith.constant 0 : index
    %10 = vector.load %arg6[%c0_12, %c0_13] : memref<128x512xbf16, #tpu.memory_space<vmem>>, vector<128x512xbf16>
    %c0_14 = arith.constant 0 : index
    %c0_15 = arith.constant 0 : index
    %11 = vector.load %arg7[%c0_14, %c0_15] : memref<1x512xf32, #tpu.memory_space<vmem>>, vector<1x512xf32>
    %12 = vector.shape_cast %11 : vector<1x512xf32> to vector<1x512xf32>
    %13 = vector.broadcast %12 : vector<1x512xf32> to vector<8x512xf32>
    %cst_16 = arith.constant 0.000000e+00 : f32
    %14 = vector.broadcast %cst_16 : f32 to vector<8x128xf32>
    %c0_17 = arith.constant 0 : index
    %c0_18 = arith.constant 0 : index
    %15 = vector.load %arg11[%c0_17, %c0_18] : memref<64x512xf32, #tpu.memory_space<vmem>>, vector<8x512xf32>
    %16 = arith.truncf %14 : vector<8x128xf32> to vector<8x128xbf16>
    %cst_19 = arith.constant dense<0.000000e+00> : vector<8x512xf32>
    %17 = tpu.matmul %16, %10, %cst_19 {dimension_numbers = #tpu.dot_dimension_numbers<[1], [0], [0], [1], [0, 0, 1, 1], [], []>} : vector<8x128xbf16>, vector<128x512xbf16>, vector<8x512xf32> -> vector<8x512xf32>
    %18 = arith.addf %17, %13 : vector<8x512xf32>
    %19 = arith.truncf %14 : vector<8x128xf32> to vector<8x128xbf16>
    %cst_20 = arith.constant dense<0.000000e+00> : vector<8x512xf32>
    %20 = tpu.matmul %19, %8, %cst_20 {dimension_numbers = #tpu.dot_dimension_numbers<[1], [0], [0], [1], [0, 0, 1, 1], [], []>} : vector<8x128xbf16>, vector<128x512xbf16>, vector<8x512xf32> -> vector<8x512xf32>
    %21 = arith.addf %15, %20 : vector<8x512xf32>
    %22 = vector.extract_strided_slice %21 {offsets = [0, 0], sizes = [8, 256], strides = [1, 1]} : vector<8x512xf32> to vector<8x256xf32>
    %23 = arith.negf %22 : vector<8x256xf32>
    %24 = math.exp %23 : vector<8x256xf32>
    %cst_21 = arith.constant 1.000000e+00 : f32
    %25 = vector.broadcast %cst_21 : f32 to vector<8x256xf32>
    %26 = arith.addf %25, %24 : vector<8x256xf32>
    %27 = arith.divf %25, %26 : vector<8x256xf32>
    %28 = vector.extract_strided_slice %27 {offsets = [0, 0], sizes = [8, 128], strides = [1, 1]} : vector<8x256xf32> to vector<8x128xf32>
    %29 = vector.extract_strided_slice %27 {offsets = [0, 128], sizes = [8, 128], strides = [1, 1]} : vector<8x256xf32> to vector<8x128xf32>
    %30 = vector.extract_strided_slice %21 {offsets = [0, 256], sizes = [8, 128], strides = [1, 1]} : vector<8x512xf32> to vector<8x128xf32>
    %31 = math.tanh %30 : vector<8x128xf32>
    %32 = vector.extract_strided_slice %21 {offsets = [0, 384], sizes = [8, 128], strides = [1, 1]} : vector<8x512xf32> to vector<8x128xf32>
    %33 = arith.negf %32 : vector<8x128xf32>
    %34 = math.exp %33 : vector<8x128xf32>
    %cst_22 = arith.constant 1.000000e+00 : f32
    %35 = vector.broadcast %cst_22 : f32 to vector<8x128xf32>
    %36 = arith.addf %35, %34 : vector<8x128xf32>
    %37 = arith.divf %35, %36 : vector<8x128xf32>
    %38 = arith.mulf %29, %14 : vector<8x128xf32>
    %39 = arith.mulf %28, %31 : vector<8x128xf32>
    %40 = arith.addf %38, %39 : vector<8x128xf32>
    %41 = math.tanh %40 : vector<8x128xf32>
    %42 = arith.mulf %37, %41 : vector<8x128xf32>
    %43 = arith.truncf %42 : vector<8x128xf32> to vector<8x128xbf16>
    %cst_23 = arith.constant dense<0.000000e+00> : vector<8x512xf32>
    %44 = tpu.matmul %43, %9, %cst_23 {dimension_numbers = #tpu.dot_dimension_numbers<[1], [0], [0], [1], [0, 0, 1, 1], [], []>} : vector<8x128xbf16>, vector<128x512xbf16>, vector<8x512xf32> -> vector<8x512xf32>
    %45 = arith.addf %18, %44 : vector<8x512xf32>
    %46 = vector.extract_strided_slice %45 {offsets = [0, 0], sizes = [8, 256], strides = [1, 1]} : vector<8x512xf32> to vector<8x256xf32>
    %47 = arith.negf %46 : vector<8x256xf32>
    %48 = math.exp %47 : vector<8x256xf32>
    %cst_24 = arith.constant 1.000000e+00 : f32
    %49 = vector.broadcast %cst_24 : f32 to vector<8x256xf32>
    %50 = arith.addf %49, %48 : vector<8x256xf32>
    %51 = arith.divf %49, %50 : vector<8x256xf32>
    %52 = vector.extract_strided_slice %51 {offsets = [0, 0], sizes = [8, 128], strides = [1, 1]} : vector<8x256xf32> to vector<8x128xf32>
    %53 = vector.extract_strided_slice %51 {offsets = [0, 128], sizes = [8, 128], strides = [1, 1]} : vector<8x256xf32> to vector<8x128xf32>
    %54 = vector.extract_strided_slice %45 {offsets = [0, 256], sizes = [8, 128], strides = [1, 1]} : vector<8x512xf32> to vector<8x128xf32>
    %55 = math.tanh %54 : vector<8x128xf32>
    %56 = vector.extract_strided_slice %45 {offsets = [0, 384], sizes = [8, 128], strides = [1, 1]} : vector<8x512xf32> to vector<8x128xf32>
    %57 = arith.negf %56 : vector<8x128xf32>
    %58 = math.exp %57 : vector<8x128xf32>
    %cst_25 = arith.constant 1.000000e+00 : f32
    %59 = vector.broadcast %cst_25 : f32 to vector<8x128xf32>
    %60 = arith.addf %59, %58 : vector<8x128xf32>
    %61 = arith.divf %59, %60 : vector<8x128xf32>
    %62 = arith.mulf %53, %14 : vector<8x128xf32>
    %63 = arith.mulf %52, %55 : vector<8x128xf32>
    %64 = arith.addf %62, %63 : vector<8x128xf32>
    %65 = math.tanh %64 : vector<8x128xf32>
    %66 = arith.mulf %61, %65 : vector<8x128xf32>
    %c8 = arith.constant 8 : index
    %c0_26 = arith.constant 0 : index
    %67 = vector.load %arg11[%c8, %c0_26] : memref<64x512xf32, #tpu.memory_space<vmem>>, vector<8x512xf32>
    %68 = arith.truncf %66 : vector<8x128xf32> to vector<8x128xbf16>
    %cst_27 = arith.constant dense<0.000000e+00> : vector<8x512xf32>
    %69 = tpu.matmul %68, %10, %cst_27 {dimension_numbers = #tpu.dot_dimension_numbers<[1], [0], [0], [1], [0, 0, 1, 1], [], []>} : vector<8x128xbf16>, vector<128x512xbf16>, vector<8x512xf32> -> vector<8x512xf32>
    %70 = arith.addf %69, %13 : vector<8x512xf32>
    %71 = arith.truncf %42 : vector<8x128xf32> to vector<8x128xbf16>
    %cst_28 = arith.constant dense<0.000000e+00> : vector<8x512xf32>
    %72 = tpu.matmul %71, %8, %cst_28 {dimension_numbers = #tpu.dot_dimension_numbers<[1], [0], [0], [1], [0, 0, 1, 1], [], []>} : vector<8x128xbf16>, vector<128x512xbf16>, vector<8x512xf32> -> vector<8x512xf32>
    %73 = arith.addf %67, %72 : vector<8x512xf32>
    %74 = vector.extract_strided_slice %73 {offsets = [0, 0], sizes = [8, 256], strides = [1, 1]} : vector<8x512xf32> to vector<8x256xf32>
    %75 = arith.negf %74 : vector<8x256xf32>
    %76 = math.exp %75 : vector<8x256xf32>
    %cst_29 = arith.constant 1.000000e+00 : f32
    %77 = vector.broadcast %cst_29 : f32 to vector<8x256xf32>
    %78 = arith.addf %77, %76 : vector<8x256xf32>
    %79 = arith.divf %77, %78 : vector<8x256xf32>
    %80 = vector.extract_strided_slice %79 {offsets = [0, 0], sizes = [8, 128], strides = [1, 1]} : vector<8x256xf32> to vector<8x128xf32>
    %81 = vector.extract_strided_slice %79 {offsets = [0, 128], sizes = [8, 128], strides = [1, 1]} : vector<8x256xf32> to vector<8x128xf32>
    %82 = vector.extract_strided_slice %73 {offsets = [0, 256], sizes = [8, 128], strides = [1, 1]} : vector<8x512xf32> to vector<8x128xf32>
    %83 = math.tanh %82 : vector<8x128xf32>
    %84 = vector.extract_strided_slice %73 {offsets = [0, 384], sizes = [8, 128], strides = [1, 1]} : vector<8x512xf32> to vector<8x128xf32>
    %85 = arith.negf %84 : vector<8x128xf32>
    %86 = math.exp %85 : vector<8x128xf32>
    %cst_30 = arith.constant 1.000000e+00 : f32
    %87 = vector.broadcast %cst_30 : f32 to vector<8x128xf32>
    %88 = arith.addf %87, %86 : vector<8x128xf32>
    %89 = arith.divf %87, %88 : vector<8x128xf32>
    %90 = arith.mulf %81, %40 : vector<8x128xf32>
    %91 = arith.mulf %80, %83 : vector<8x128xf32>
    %92 = arith.addf %90, %91 : vector<8x128xf32>
    %93 = math.tanh %92 : vector<8x128xf32>
    %94 = arith.mulf %89, %93 : vector<8x128xf32>
    %95 = arith.truncf %94 : vector<8x128xf32> to vector<8x128xbf16>
    %cst_31 = arith.constant dense<0.000000e+00> : vector<8x512xf32>
    %96 = tpu.matmul %95, %9, %cst_31 {dimension_numbers = #tpu.dot_dimension_numbers<[1], [0], [0], [1], [0, 0, 1, 1], [], []>} : vector<8x128xbf16>, vector<128x512xbf16>, vector<8x512xf32> -> vector<8x512xf32>
    %97 = arith.addf %70, %96 : vector<8x512xf32>
    %98 = vector.extract_strided_slice %97 {offsets = [0, 0], sizes = [8, 256], strides = [1, 1]} : vector<8x512xf32> to vector<8x256xf32>
    %99 = arith.negf %98 : vector<8x256xf32>
    %100 = math.exp %99 : vector<8x256xf32>
    %cst_32 = arith.constant 1.000000e+00 : f32
    %101 = vector.broadcast %cst_32 : f32 to vector<8x256xf32>
    %102 = arith.addf %101, %100 : vector<8x256xf32>
    %103 = arith.divf %101, %102 : vector<8x256xf32>
    %104 = vector.extract_strided_slice %103 {offsets = [0, 0], sizes = [8, 128], strides = [1, 1]} : vector<8x256xf32> to vector<8x128xf32>
    %105 = vector.extract_strided_slice %103 {offsets = [0, 128], sizes = [8, 128], strides = [1, 1]} : vector<8x256xf32> to vector<8x128xf32>
    %106 = vector.extract_strided_slice %97 {offsets = [0, 256], sizes = [8, 128], strides = [1, 1]} : vector<8x512xf32> to vector<8x128xf32>
    %107 = math.tanh %106 : vector<8x128xf32>
    %108 = vector.extract_strided_slice %97 {offsets = [0, 384], sizes = [8, 128], strides = [1, 1]} : vector<8x512xf32> to vector<8x128xf32>
    %109 = arith.negf %108 : vector<8x128xf32>
    %110 = math.exp %109 : vector<8x128xf32>
    %cst_33 = arith.constant 1.000000e+00 : f32
    %111 = vector.broadcast %cst_33 : f32 to vector<8x128xf32>
    %112 = arith.addf %111, %110 : vector<8x128xf32>
    %113 = arith.divf %111, %112 : vector<8x128xf32>
    %114 = arith.mulf %105, %64 : vector<8x128xf32>
    %115 = arith.mulf %104, %107 : vector<8x128xf32>
    %116 = arith.addf %114, %115 : vector<8x128xf32>
    %117 = math.tanh %116 : vector<8x128xf32>
    %118 = arith.mulf %113, %117 : vector<8x128xf32>
    %c16 = arith.constant 16 : index
    %c0_34 = arith.constant 0 : index
    %119 = vector.load %arg11[%c16, %c0_34] : memref<64x512xf32, #tpu.memory_space<vmem>>, vector<8x512xf32>
    %120 = arith.truncf %118 : vector<8x128xf32> to vector<8x128xbf16>
    %cst_35 = arith.constant dense<0.000000e+00> : vector<8x512xf32>
    %121 = tpu.matmul %120, %10, %cst_35 {dimension_numbers = #tpu.dot_dimension_numbers<[1], [0], [0], [1], [0, 0, 1, 1], [], []>} : vector<8x128xbf16>, vector<128x512xbf16>, vector<8x512xf32> -> vector<8x512xf32>
    %122 = arith.addf %121, %13 : vector<8x512xf32>
    %123 = arith.truncf %94 : vector<8x128xf32> to vector<8x128xbf16>
    %cst_36 = arith.constant dense<0.000000e+00> : vector<8x512xf32>
    %124 = tpu.matmul %123, %8, %cst_36 {dimension_numbers = #tpu.dot_dimension_numbers<[1], [0], [0], [1], [0, 0, 1, 1], [], []>} : vector<8x128xbf16>, vector<128x512xbf16>, vector<8x512xf32> -> vector<8x512xf32>
    %125 = arith.addf %119, %124 : vector<8x512xf32>
    %126 = vector.extract_strided_slice %125 {offsets = [0, 0], sizes = [8, 256], strides = [1, 1]} : vector<8x512xf32> to vector<8x256xf32>
    %127 = arith.negf %126 : vector<8x256xf32>
    %128 = math.exp %127 : vector<8x256xf32>
    %cst_37 = arith.constant 1.000000e+00 : f32
    %129 = vector.broadcast %cst_37 : f32 to vector<8x256xf32>
    %130 = arith.addf %129, %128 : vector<8x256xf32>
    %131 = arith.divf %129, %130 : vector<8x256xf32>
    %132 = vector.extract_strided_slice %131 {offsets = [0, 0], sizes = [8, 128], strides = [1, 1]} : vector<8x256xf32> to vector<8x128xf32>
    %133 = vector.extract_strided_slice %131 {offsets = [0, 128], sizes = [8, 128], strides = [1, 1]} : vector<8x256xf32> to vector<8x128xf32>
    %134 = vector.extract_strided_slice %125 {offsets = [0, 256], sizes = [8, 128], strides = [1, 1]} : vector<8x512xf32> to vector<8x128xf32>
    %135 = math.tanh %134 : vector<8x128xf32>
    %136 = vector.extract_strided_slice %125 {offsets = [0, 384], sizes = [8, 128], strides = [1, 1]} : vector<8x512xf32> to vector<8x128xf32>
    %137 = arith.negf %136 : vector<8x128xf32>
    %138 = math.exp %137 : vector<8x128xf32>
    %cst_38 = arith.constant 1.000000e+00 : f32
    %139 = vector.broadcast %cst_38 : f32 to vector<8x128xf32>
    %140 = arith.addf %139, %138 : vector<8x128xf32>
    %141 = arith.divf %139, %140 : vector<8x128xf32>
    %142 = arith.mulf %133, %92 : vector<8x128xf32>
    %143 = arith.mulf %132, %135 : vector<8x128xf32>
    %144 = arith.addf %142, %143 : vector<8x128xf32>
    %145 = math.tanh %144 : vector<8x128xf32>
    %146 = arith.mulf %141, %145 : vector<8x128xf32>
    %147 = arith.truncf %146 : vector<8x128xf32> to vector<8x128xbf16>
    %cst_39 = arith.constant dense<0.000000e+00> : vector<8x512xf32>
    %148 = tpu.matmul %147, %9, %cst_39 {dimension_numbers = #tpu.dot_dimension_numbers<[1], [0], [0], [1], [0, 0, 1, 1], [], []>} : vector<8x128xbf16>, vector<128x512xbf16>, vector<8x512xf32> -> vector<8x512xf32>
    %149 = arith.addf %122, %148 : vector<8x512xf32>
    %150 = vector.extract_strided_slice %149 {offsets = [0, 0], sizes = [8, 256], strides = [1, 1]} : vector<8x512xf32> to vector<8x256xf32>
    %151 = arith.negf %150 : vector<8x256xf32>
    %152 = math.exp %151 : vector<8x256xf32>
    %cst_40 = arith.constant 1.000000e+00 : f32
    %153 = vector.broadcast %cst_40 : f32 to vector<8x256xf32>
    %154 = arith.addf %153, %152 : vector<8x256xf32>
    %155 = arith.divf %153, %154 : vector<8x256xf32>
    %156 = vector.extract_strided_slice %155 {offsets = [0, 0], sizes = [8, 128], strides = [1, 1]} : vector<8x256xf32> to vector<8x128xf32>
    %157 = vector.extract_strided_slice %155 {offsets = [0, 128], sizes = [8, 128], strides = [1, 1]} : vector<8x256xf32> to vector<8x128xf32>
    %158 = vector.extract_strided_slice %149 {offsets = [0, 256], sizes = [8, 128], strides = [1, 1]} : vector<8x512xf32> to vector<8x128xf32>
    %159 = math.tanh %158 : vector<8x128xf32>
    %160 = vector.extract_strided_slice %149 {offsets = [0, 384], sizes = [8, 128], strides = [1, 1]} : vector<8x512xf32> to vector<8x128xf32>
    %161 = arith.negf %160 : vector<8x128xf32>
    %162 = math.exp %161 : vector<8x128xf32>
    %cst_41 = arith.constant 1.000000e+00 : f32
    %163 = vector.broadcast %cst_41 : f32 to vector<8x128xf32>
    %164 = arith.addf %163, %162 : vector<8x128xf32>
    %165 = arith.divf %163, %164 : vector<8x128xf32>
    %166 = arith.mulf %157, %116 : vector<8x128xf32>
    %167 = arith.mulf %156, %159 : vector<8x128xf32>
    %168 = arith.addf %166, %167 : vector<8x128xf32>
    %169 = math.tanh %168 : vector<8x128xf32>
    %170 = arith.mulf %165, %169 : vector<8x128xf32>
    %c24 = arith.constant 24 : index
    %c0_42 = arith.constant 0 : index
    %171 = vector.load %arg11[%c24, %c0_42] : memref<64x512xf32, #tpu.memory_space<vmem>>, vector<8x512xf32>
    %172 = arith.truncf %170 : vector<8x128xf32> to vector<8x128xbf16>
    %cst_43 = arith.constant dense<0.000000e+00> : vector<8x512xf32>
    %173 = tpu.matmul %172, %10, %cst_43 {dimension_numbers = #tpu.dot_dimension_numbers<[1], [0], [0], [1], [0, 0, 1, 1], [], []>} : vector<8x128xbf16>, vector<128x512xbf16>, vector<8x512xf32> -> vector<8x512xf32>
    %174 = arith.addf %173, %13 : vector<8x512xf32>
    %175 = arith.truncf %146 : vector<8x128xf32> to vector<8x128xbf16>
    %cst_44 = arith.constant dense<0.000000e+00> : vector<8x512xf32>
    %176 = tpu.matmul %175, %8, %cst_44 {dimension_numbers = #tpu.dot_dimension_numbers<[1], [0], [0], [1], [0, 0, 1, 1], [], []>} : vector<8x128xbf16>, vector<128x512xbf16>, vector<8x512xf32> -> vector<8x512xf32>
    %177 = arith.addf %171, %176 : vector<8x512xf32>
    %178 = vector.extract_strided_slice %177 {offsets = [0, 0], sizes = [8, 256], strides = [1, 1]} : vector<8x512xf32> to vector<8x256xf32>
    %179 = arith.negf %178 : vector<8x256xf32>
    %180 = math.exp %179 : vector<8x256xf32>
    %cst_45 = arith.constant 1.000000e+00 : f32
    %181 = vector.broadcast %cst_45 : f32 to vector<8x256xf32>
    %182 = arith.addf %181, %180 : vector<8x256xf32>
    %183 = arith.divf %181, %182 : vector<8x256xf32>
    %184 = vector.extract_strided_slice %183 {offsets = [0, 0], sizes = [8, 128], strides = [1, 1]} : vector<8x256xf32> to vector<8x128xf32>
    %185 = vector.extract_strided_slice %183 {offsets = [0, 128], sizes = [8, 128], strides = [1, 1]} : vector<8x256xf32> to vector<8x128xf32>
    %186 = vector.extract_strided_slice %177 {offsets = [0, 256], sizes = [8, 128], strides = [1, 1]} : vector<8x512xf32> to vector<8x128xf32>
    %187 = math.tanh %186 : vector<8x128xf32>
    %188 = vector.extract_strided_slice %177 {offsets = [0, 384], sizes = [8, 128], strides = [1, 1]} : vector<8x512xf32> to vector<8x128xf32>
    %189 = arith.negf %188 : vector<8x128xf32>
    %190 = math.exp %189 : vector<8x128xf32>
    %cst_46 = arith.constant 1.000000e+00 : f32
    %191 = vector.broadcast %cst_46 : f32 to vector<8x128xf32>
    %192 = arith.addf %191, %190 : vector<8x128xf32>
    %193 = arith.divf %191, %192 : vector<8x128xf32>
    %194 = arith.mulf %185, %144 : vector<8x128xf32>
    %195 = arith.mulf %184, %187 : vector<8x128xf32>
    %196 = arith.addf %194, %195 : vector<8x128xf32>
    %197 = math.tanh %196 : vector<8x128xf32>
    %198 = arith.mulf %193, %197 : vector<8x128xf32>
    %199 = arith.truncf %198 : vector<8x128xf32> to vector<8x128xbf16>
    %cst_47 = arith.constant dense<0.000000e+00> : vector<8x512xf32>
    %200 = tpu.matmul %199, %9, %cst_47 {dimension_numbers = #tpu.dot_dimension_numbers<[1], [0], [0], [1], [0, 0, 1, 1], [], []>} : vector<8x128xbf16>, vector<128x512xbf16>, vector<8x512xf32> -> vector<8x512xf32>
    %201 = arith.addf %174, %200 : vector<8x512xf32>
    %202 = vector.extract_strided_slice %201 {offsets = [0, 0], sizes = [8, 256], strides = [1, 1]} : vector<8x512xf32> to vector<8x256xf32>
    %203 = arith.negf %202 : vector<8x256xf32>
    %204 = math.exp %203 : vector<8x256xf32>
    %cst_48 = arith.constant 1.000000e+00 : f32
    %205 = vector.broadcast %cst_48 : f32 to vector<8x256xf32>
    %206 = arith.addf %205, %204 : vector<8x256xf32>
    %207 = arith.divf %205, %206 : vector<8x256xf32>
    %208 = vector.extract_strided_slice %207 {offsets = [0, 0], sizes = [8, 128], strides = [1, 1]} : vector<8x256xf32> to vector<8x128xf32>
    %209 = vector.extract_strided_slice %207 {offsets = [0, 128], sizes = [8, 128], strides = [1, 1]} : vector<8x256xf32> to vector<8x128xf32>
    %210 = vector.extract_strided_slice %201 {offsets = [0, 256], sizes = [8, 128], strides = [1, 1]} : vector<8x512xf32> to vector<8x128xf32>
    %211 = math.tanh %210 : vector<8x128xf32>
    %212 = vector.extract_strided_slice %201 {offsets = [0, 384], sizes = [8, 128], strides = [1, 1]} : vector<8x512xf32> to vector<8x128xf32>
    %213 = arith.negf %212 : vector<8x128xf32>
    %214 = math.exp %213 : vector<8x128xf32>
    %cst_49 = arith.constant 1.000000e+00 : f32
    %215 = vector.broadcast %cst_49 : f32 to vector<8x128xf32>
    %216 = arith.addf %215, %214 : vector<8x128xf32>
    %217 = arith.divf %215, %216 : vector<8x128xf32>
    %218 = arith.mulf %209, %168 : vector<8x128xf32>
    %219 = arith.mulf %208, %211 : vector<8x128xf32>
    %220 = arith.addf %218, %219 : vector<8x128xf32>
    %221 = math.tanh %220 : vector<8x128xf32>
    %222 = arith.mulf %217, %221 : vector<8x128xf32>
    %c32 = arith.constant 32 : index
    %c0_50 = arith.constant 0 : index
    %223 = vector.load %arg11[%c32, %c0_50] : memref<64x512xf32, #tpu.memory_space<vmem>>, vector<8x512xf32>
    %224 = arith.truncf %222 : vector<8x128xf32> to vector<8x128xbf16>
    %cst_51 = arith.constant dense<0.000000e+00> : vector<8x512xf32>
    %225 = tpu.matmul %224, %10, %cst_51 {dimension_numbers = #tpu.dot_dimension_numbers<[1], [0], [0], [1], [0, 0, 1, 1], [], []>} : vector<8x128xbf16>, vector<128x512xbf16>, vector<8x512xf32> -> vector<8x512xf32>
    %226 = arith.addf %225, %13 : vector<8x512xf32>
    %227 = arith.truncf %198 : vector<8x128xf32> to vector<8x128xbf16>
    %cst_52 = arith.constant dense<0.000000e+00> : vector<8x512xf32>
    %228 = tpu.matmul %227, %8, %cst_52 {dimension_numbers = #tpu.dot_dimension_numbers<[1], [0], [0], [1], [0, 0, 1, 1], [], []>} : vector<8x128xbf16>, vector<128x512xbf16>, vector<8x512xf32> -> vector<8x512xf32>
    %229 = arith.addf %223, %228 : vector<8x512xf32>
    %230 = vector.extract_strided_slice %229 {offsets = [0, 0], sizes = [8, 256], strides = [1, 1]} : vector<8x512xf32> to vector<8x256xf32>
    %231 = arith.negf %230 : vector<8x256xf32>
    %232 = math.exp %231 : vector<8x256xf32>
    %cst_53 = arith.constant 1.000000e+00 : f32
    %233 = vector.broadcast %cst_53 : f32 to vector<8x256xf32>
    %234 = arith.addf %233, %232 : vector<8x256xf32>
    %235 = arith.divf %233, %234 : vector<8x256xf32>
    %236 = vector.extract_strided_slice %235 {offsets = [0, 0], sizes = [8, 128], strides = [1, 1]} : vector<8x256xf32> to vector<8x128xf32>
    %237 = vector.extract_strided_slice %235 {offsets = [0, 128], sizes = [8, 128], strides = [1, 1]} : vector<8x256xf32> to vector<8x128xf32>
    %238 = vector.extract_strided_slice %229 {offsets = [0, 256], sizes = [8, 128], strides = [1, 1]} : vector<8x512xf32> to vector<8x128xf32>
    %239 = math.tanh %238 : vector<8x128xf32>
    %240 = vector.extract_strided_slice %229 {offsets = [0, 384], sizes = [8, 128], strides = [1, 1]} : vector<8x512xf32> to vector<8x128xf32>
    %241 = arith.negf %240 : vector<8x128xf32>
    %242 = math.exp %241 : vector<8x128xf32>
    %cst_54 = arith.constant 1.000000e+00 : f32
    %243 = vector.broadcast %cst_54 : f32 to vector<8x128xf32>
    %244 = arith.addf %243, %242 : vector<8x128xf32>
    %245 = arith.divf %243, %244 : vector<8x128xf32>
    %246 = arith.mulf %237, %196 : vector<8x128xf32>
    %247 = arith.mulf %236, %239 : vector<8x128xf32>
    %248 = arith.addf %246, %247 : vector<8x128xf32>
    %249 = math.tanh %248 : vector<8x128xf32>
    %250 = arith.mulf %245, %249 : vector<8x128xf32>
    %251 = arith.truncf %250 : vector<8x128xf32> to vector<8x128xbf16>
    %cst_55 = arith.constant dense<0.000000e+00> : vector<8x512xf32>
    %252 = tpu.matmul %251, %9, %cst_55 {dimension_numbers = #tpu.dot_dimension_numbers<[1], [0], [0], [1], [0, 0, 1, 1], [], []>} : vector<8x128xbf16>, vector<128x512xbf16>, vector<8x512xf32> -> vector<8x512xf32>
    %253 = arith.addf %226, %252 : vector<8x512xf32>
    %254 = vector.extract_strided_slice %253 {offsets = [0, 0], sizes = [8, 256], strides = [1, 1]} : vector<8x512xf32> to vector<8x256xf32>
    %255 = arith.negf %254 : vector<8x256xf32>
    %256 = math.exp %255 : vector<8x256xf32>
    %cst_56 = arith.constant 1.000000e+00 : f32
    %257 = vector.broadcast %cst_56 : f32 to vector<8x256xf32>
    %258 = arith.addf %257, %256 : vector<8x256xf32>
    %259 = arith.divf %257, %258 : vector<8x256xf32>
    %260 = vector.extract_strided_slice %259 {offsets = [0, 0], sizes = [8, 128], strides = [1, 1]} : vector<8x256xf32> to vector<8x128xf32>
    %261 = vector.extract_strided_slice %259 {offsets = [0, 128], sizes = [8, 128], strides = [1, 1]} : vector<8x256xf32> to vector<8x128xf32>
    %262 = vector.extract_strided_slice %253 {offsets = [0, 256], sizes = [8, 128], strides = [1, 1]} : vector<8x512xf32> to vector<8x128xf32>
    %263 = math.tanh %262 : vector<8x128xf32>
    %264 = vector.extract_strided_slice %253 {offsets = [0, 384], sizes = [8, 128], strides = [1, 1]} : vector<8x512xf32> to vector<8x128xf32>
    %265 = arith.negf %264 : vector<8x128xf32>
    %266 = math.exp %265 : vector<8x128xf32>
    %cst_57 = arith.constant 1.000000e+00 : f32
    %267 = vector.broadcast %cst_57 : f32 to vector<8x128xf32>
    %268 = arith.addf %267, %266 : vector<8x128xf32>
    %269 = arith.divf %267, %268 : vector<8x128xf32>
    %270 = arith.mulf %261, %220 : vector<8x128xf32>
    %271 = arith.mulf %260, %263 : vector<8x128xf32>
    %272 = arith.addf %270, %271 : vector<8x128xf32>
    %273 = math.tanh %272 : vector<8x128xf32>
    %274 = arith.mulf %269, %273 : vector<8x128xf32>
    %c40 = arith.constant 40 : index
    %c0_58 = arith.constant 0 : index
    %275 = vector.load %arg11[%c40, %c0_58] : memref<64x512xf32, #tpu.memory_space<vmem>>, vector<8x512xf32>
    %276 = arith.truncf %274 : vector<8x128xf32> to vector<8x128xbf16>
    %cst_59 = arith.constant dense<0.000000e+00> : vector<8x512xf32>
    %277 = tpu.matmul %276, %10, %cst_59 {dimension_numbers = #tpu.dot_dimension_numbers<[1], [0], [0], [1], [0, 0, 1, 1], [], []>} : vector<8x128xbf16>, vector<128x512xbf16>, vector<8x512xf32> -> vector<8x512xf32>
    %278 = arith.addf %277, %13 : vector<8x512xf32>
    %279 = arith.truncf %250 : vector<8x128xf32> to vector<8x128xbf16>
    %cst_60 = arith.constant dense<0.000000e+00> : vector<8x512xf32>
    %280 = tpu.matmul %279, %8, %cst_60 {dimension_numbers = #tpu.dot_dimension_numbers<[1], [0], [0], [1], [0, 0, 1, 1], [], []>} : vector<8x128xbf16>, vector<128x512xbf16>, vector<8x512xf32> -> vector<8x512xf32>
    %281 = arith.addf %275, %280 : vector<8x512xf32>
    %282 = vector.extract_strided_slice %281 {offsets = [0, 0], sizes = [8, 256], strides = [1, 1]} : vector<8x512xf32> to vector<8x256xf32>
    %283 = arith.negf %282 : vector<8x256xf32>
    %284 = math.exp %283 : vector<8x256xf32>
    %cst_61 = arith.constant 1.000000e+00 : f32
    %285 = vector.broadcast %cst_61 : f32 to vector<8x256xf32>
    %286 = arith.addf %285, %284 : vector<8x256xf32>
    %287 = arith.divf %285, %286 : vector<8x256xf32>
    %288 = vector.extract_strided_slice %287 {offsets = [0, 0], sizes = [8, 128], strides = [1, 1]} : vector<8x256xf32> to vector<8x128xf32>
    %289 = vector.extract_strided_slice %287 {offsets = [0, 128], sizes = [8, 128], strides = [1, 1]} : vector<8x256xf32> to vector<8x128xf32>
    %290 = vector.extract_strided_slice %281 {offsets = [0, 256], sizes = [8, 128], strides = [1, 1]} : vector<8x512xf32> to vector<8x128xf32>
    %291 = math.tanh %290 : vector<8x128xf32>
    %292 = vector.extract_strided_slice %281 {offsets = [0, 384], sizes = [8, 128], strides = [1, 1]} : vector<8x512xf32> to vector<8x128xf32>
    %293 = arith.negf %292 : vector<8x128xf32>
    %294 = math.exp %293 : vector<8x128xf32>
    %cst_62 = arith.constant 1.000000e+00 : f32
    %295 = vector.broadcast %cst_62 : f32 to vector<8x128xf32>
    %296 = arith.addf %295, %294 : vector<8x128xf32>
    %297 = arith.divf %295, %296 : vector<8x128xf32>
    %298 = arith.mulf %289, %248 : vector<8x128xf32>
    %299 = arith.mulf %288, %291 : vector<8x128xf32>
    %300 = arith.addf %298, %299 : vector<8x128xf32>
    %301 = math.tanh %300 : vector<8x128xf32>
    %302 = arith.mulf %297, %301 : vector<8x128xf32>
    %303 = arith.truncf %302 : vector<8x128xf32> to vector<8x128xbf16>
    %cst_63 = arith.constant dense<0.000000e+00> : vector<8x512xf32>
    %304 = tpu.matmul %303, %9, %cst_63 {dimension_numbers = #tpu.dot_dimension_numbers<[1], [0], [0], [1], [0, 0, 1, 1], [], []>} : vector<8x128xbf16>, vector<128x512xbf16>, vector<8x512xf32> -> vector<8x512xf32>
    %305 = arith.addf %278, %304 : vector<8x512xf32>
    %306 = vector.extract_strided_slice %305 {offsets = [0, 0], sizes = [8, 256], strides = [1, 1]} : vector<8x512xf32> to vector<8x256xf32>
    %307 = arith.negf %306 : vector<8x256xf32>
    %308 = math.exp %307 : vector<8x256xf32>
    %cst_64 = arith.constant 1.000000e+00 : f32
    %309 = vector.broadcast %cst_64 : f32 to vector<8x256xf32>
    %310 = arith.addf %309, %308 : vector<8x256xf32>
    %311 = arith.divf %309, %310 : vector<8x256xf32>
    %312 = vector.extract_strided_slice %311 {offsets = [0, 0], sizes = [8, 128], strides = [1, 1]} : vector<8x256xf32> to vector<8x128xf32>
    %313 = vector.extract_strided_slice %311 {offsets = [0, 128], sizes = [8, 128], strides = [1, 1]} : vector<8x256xf32> to vector<8x128xf32>
    %314 = vector.extract_strided_slice %305 {offsets = [0, 256], sizes = [8, 128], strides = [1, 1]} : vector<8x512xf32> to vector<8x128xf32>
    %315 = math.tanh %314 : vector<8x128xf32>
    %316 = vector.extract_strided_slice %305 {offsets = [0, 384], sizes = [8, 128], strides = [1, 1]} : vector<8x512xf32> to vector<8x128xf32>
    %317 = arith.negf %316 : vector<8x128xf32>
    %318 = math.exp %317 : vector<8x128xf32>
    %cst_65 = arith.constant 1.000000e+00 : f32
    %319 = vector.broadcast %cst_65 : f32 to vector<8x128xf32>
    %320 = arith.addf %319, %318 : vector<8x128xf32>
    %321 = arith.divf %319, %320 : vector<8x128xf32>
    %322 = arith.mulf %313, %272 : vector<8x128xf32>
    %323 = arith.mulf %312, %315 : vector<8x128xf32>
    %324 = arith.addf %322, %323 : vector<8x128xf32>
    %325 = math.tanh %324 : vector<8x128xf32>
    %326 = arith.mulf %321, %325 : vector<8x128xf32>
    %c48 = arith.constant 48 : index
    %c0_66 = arith.constant 0 : index
    %327 = vector.load %arg11[%c48, %c0_66] : memref<64x512xf32, #tpu.memory_space<vmem>>, vector<8x512xf32>
    %328 = arith.truncf %326 : vector<8x128xf32> to vector<8x128xbf16>
    %cst_67 = arith.constant dense<0.000000e+00> : vector<8x512xf32>
    %329 = tpu.matmul %328, %10, %cst_67 {dimension_numbers = #tpu.dot_dimension_numbers<[1], [0], [0], [1], [0, 0, 1, 1], [], []>} : vector<8x128xbf16>, vector<128x512xbf16>, vector<8x512xf32> -> vector<8x512xf32>
    %330 = arith.addf %329, %13 : vector<8x512xf32>
    %331 = arith.truncf %302 : vector<8x128xf32> to vector<8x128xbf16>
    %cst_68 = arith.constant dense<0.000000e+00> : vector<8x512xf32>
    %332 = tpu.matmul %331, %8, %cst_68 {dimension_numbers = #tpu.dot_dimension_numbers<[1], [0], [0], [1], [0, 0, 1, 1], [], []>} : vector<8x128xbf16>, vector<128x512xbf16>, vector<8x512xf32> -> vector<8x512xf32>
    %333 = arith.addf %327, %332 : vector<8x512xf32>
    %334 = vector.extract_strided_slice %333 {offsets = [0, 0], sizes = [8, 256], strides = [1, 1]} : vector<8x512xf32> to vector<8x256xf32>
    %335 = arith.negf %334 : vector<8x256xf32>
    %336 = math.exp %335 : vector<8x256xf32>
    %cst_69 = arith.constant 1.000000e+00 : f32
    %337 = vector.broadcast %cst_69 : f32 to vector<8x256xf32>
    %338 = arith.addf %337, %336 : vector<8x256xf32>
    %339 = arith.divf %337, %338 : vector<8x256xf32>
    %340 = vector.extract_strided_slice %339 {offsets = [0, 0], sizes = [8, 128], strides = [1, 1]} : vector<8x256xf32> to vector<8x128xf32>
    %341 = vector.extract_strided_slice %339 {offsets = [0, 128], sizes = [8, 128], strides = [1, 1]} : vector<8x256xf32> to vector<8x128xf32>
    %342 = vector.extract_strided_slice %333 {offsets = [0, 256], sizes = [8, 128], strides = [1, 1]} : vector<8x512xf32> to vector<8x128xf32>
    %343 = math.tanh %342 : vector<8x128xf32>
    %344 = vector.extract_strided_slice %333 {offsets = [0, 384], sizes = [8, 128], strides = [1, 1]} : vector<8x512xf32> to vector<8x128xf32>
    %345 = arith.negf %344 : vector<8x128xf32>
    %346 = math.exp %345 : vector<8x128xf32>
    %cst_70 = arith.constant 1.000000e+00 : f32
    %347 = vector.broadcast %cst_70 : f32 to vector<8x128xf32>
    %348 = arith.addf %347, %346 : vector<8x128xf32>
    %349 = arith.divf %347, %348 : vector<8x128xf32>
    %350 = arith.mulf %341, %300 : vector<8x128xf32>
    %351 = arith.mulf %340, %343 : vector<8x128xf32>
    %352 = arith.addf %350, %351 : vector<8x128xf32>
    %353 = math.tanh %352 : vector<8x128xf32>
    %354 = arith.mulf %349, %353 : vector<8x128xf32>
    %355 = arith.truncf %354 : vector<8x128xf32> to vector<8x128xbf16>
    %cst_71 = arith.constant dense<0.000000e+00> : vector<8x512xf32>
    %356 = tpu.matmul %355, %9, %cst_71 {dimension_numbers = #tpu.dot_dimension_numbers<[1], [0], [0], [1], [0, 0, 1, 1], [], []>} : vector<8x128xbf16>, vector<128x512xbf16>, vector<8x512xf32> -> vector<8x512xf32>
    %357 = arith.addf %330, %356 : vector<8x512xf32>
    %358 = vector.extract_strided_slice %357 {offsets = [0, 0], sizes = [8, 256], strides = [1, 1]} : vector<8x512xf32> to vector<8x256xf32>
    %359 = arith.negf %358 : vector<8x256xf32>
    %360 = math.exp %359 : vector<8x256xf32>
    %cst_72 = arith.constant 1.000000e+00 : f32
    %361 = vector.broadcast %cst_72 : f32 to vector<8x256xf32>
    %362 = arith.addf %361, %360 : vector<8x256xf32>
    %363 = arith.divf %361, %362 : vector<8x256xf32>
    %364 = vector.extract_strided_slice %363 {offsets = [0, 0], sizes = [8, 128], strides = [1, 1]} : vector<8x256xf32> to vector<8x128xf32>
    %365 = vector.extract_strided_slice %363 {offsets = [0, 128], sizes = [8, 128], strides = [1, 1]} : vector<8x256xf32> to vector<8x128xf32>
    %366 = vector.extract_strided_slice %357 {offsets = [0, 256], sizes = [8, 128], strides = [1, 1]} : vector<8x512xf32> to vector<8x128xf32>
    %367 = math.tanh %366 : vector<8x128xf32>
    %368 = vector.extract_strided_slice %357 {offsets = [0, 384], sizes = [8, 128], strides = [1, 1]} : vector<8x512xf32> to vector<8x128xf32>
    %369 = arith.negf %368 : vector<8x128xf32>
    %370 = math.exp %369 : vector<8x128xf32>
    %cst_73 = arith.constant 1.000000e+00 : f32
    %371 = vector.broadcast %cst_73 : f32 to vector<8x128xf32>
    %372 = arith.addf %371, %370 : vector<8x128xf32>
    %373 = arith.divf %371, %372 : vector<8x128xf32>
    %374 = arith.mulf %365, %324 : vector<8x128xf32>
    %375 = arith.mulf %364, %367 : vector<8x128xf32>
    %376 = arith.addf %374, %375 : vector<8x128xf32>
    %377 = math.tanh %376 : vector<8x128xf32>
    %378 = arith.mulf %373, %377 : vector<8x128xf32>
    %c56 = arith.constant 56 : index
    %c0_74 = arith.constant 0 : index
    %379 = vector.load %arg11[%c56, %c0_74] : memref<64x512xf32, #tpu.memory_space<vmem>>, vector<8x512xf32>
    %380 = arith.truncf %378 : vector<8x128xf32> to vector<8x128xbf16>
    %cst_75 = arith.constant dense<0.000000e+00> : vector<8x512xf32>
    %381 = tpu.matmul %380, %10, %cst_75 {dimension_numbers = #tpu.dot_dimension_numbers<[1], [0], [0], [1], [0, 0, 1, 1], [], []>} : vector<8x128xbf16>, vector<128x512xbf16>, vector<8x512xf32> -> vector<8x512xf32>
    %382 = arith.addf %381, %13 : vector<8x512xf32>
    %383 = arith.truncf %354 : vector<8x128xf32> to vector<8x128xbf16>
    %cst_76 = arith.constant dense<0.000000e+00> : vector<8x512xf32>
    %384 = tpu.matmul %383, %8, %cst_76 {dimension_numbers = #tpu.dot_dimension_numbers<[1], [0], [0], [1], [0, 0, 1, 1], [], []>} : vector<8x128xbf16>, vector<128x512xbf16>, vector<8x512xf32> -> vector<8x512xf32>
    %385 = arith.addf %379, %384 : vector<8x512xf32>
    %386 = vector.extract_strided_slice %385 {offsets = [0, 0], sizes = [8, 256], strides = [1, 1]} : vector<8x512xf32> to vector<8x256xf32>
    %387 = arith.negf %386 : vector<8x256xf32>
    %388 = math.exp %387 : vector<8x256xf32>
    %cst_77 = arith.constant 1.000000e+00 : f32
    %389 = vector.broadcast %cst_77 : f32 to vector<8x256xf32>
    %390 = arith.addf %389, %388 : vector<8x256xf32>
    %391 = arith.divf %389, %390 : vector<8x256xf32>
    %392 = vector.extract_strided_slice %391 {offsets = [0, 0], sizes = [8, 128], strides = [1, 1]} : vector<8x256xf32> to vector<8x128xf32>
    %393 = vector.extract_strided_slice %391 {offsets = [0, 128], sizes = [8, 128], strides = [1, 1]} : vector<8x256xf32> to vector<8x128xf32>
    %394 = vector.extract_strided_slice %385 {offsets = [0, 256], sizes = [8, 128], strides = [1, 1]} : vector<8x512xf32> to vector<8x128xf32>
    %395 = math.tanh %394 : vector<8x128xf32>
    %396 = vector.extract_strided_slice %385 {offsets = [0, 384], sizes = [8, 128], strides = [1, 1]} : vector<8x512xf32> to vector<8x128xf32>
    %397 = arith.negf %396 : vector<8x128xf32>
    %398 = math.exp %397 : vector<8x128xf32>
    %cst_78 = arith.constant 1.000000e+00 : f32
    %399 = vector.broadcast %cst_78 : f32 to vector<8x128xf32>
    %400 = arith.addf %399, %398 : vector<8x128xf32>
    %401 = arith.divf %399, %400 : vector<8x128xf32>
    %402 = arith.mulf %393, %352 : vector<8x128xf32>
    %403 = arith.mulf %392, %395 : vector<8x128xf32>
    %404 = arith.addf %402, %403 : vector<8x128xf32>
    %405 = math.tanh %404 : vector<8x128xf32>
    %406 = arith.mulf %401, %405 : vector<8x128xf32>
    %407 = arith.truncf %406 : vector<8x128xf32> to vector<8x128xbf16>
    %cst_79 = arith.constant dense<0.000000e+00> : vector<8x512xf32>
    %408 = tpu.matmul %407, %9, %cst_79 {dimension_numbers = #tpu.dot_dimension_numbers<[1], [0], [0], [1], [0, 0, 1, 1], [], []>} : vector<8x128xbf16>, vector<128x512xbf16>, vector<8x512xf32> -> vector<8x512xf32>
    %409 = arith.addf %382, %408 : vector<8x512xf32>
    %410 = vector.extract_strided_slice %409 {offsets = [0, 0], sizes = [8, 256], strides = [1, 1]} : vector<8x512xf32> to vector<8x256xf32>
    %411 = arith.negf %410 : vector<8x256xf32>
    %412 = math.exp %411 : vector<8x256xf32>
    %cst_80 = arith.constant 1.000000e+00 : f32
    %413 = vector.broadcast %cst_80 : f32 to vector<8x256xf32>
    %414 = arith.addf %413, %412 : vector<8x256xf32>
    %415 = arith.divf %413, %414 : vector<8x256xf32>
    %416 = vector.extract_strided_slice %415 {offsets = [0, 0], sizes = [8, 128], strides = [1, 1]} : vector<8x256xf32> to vector<8x128xf32>
    %417 = vector.extract_strided_slice %415 {offsets = [0, 128], sizes = [8, 128], strides = [1, 1]} : vector<8x256xf32> to vector<8x128xf32>
    %418 = vector.extract_strided_slice %409 {offsets = [0, 256], sizes = [8, 128], strides = [1, 1]} : vector<8x512xf32> to vector<8x128xf32>
    %419 = math.tanh %418 : vector<8x128xf32>
    %420 = vector.extract_strided_slice %409 {offsets = [0, 384], sizes = [8, 128], strides = [1, 1]} : vector<8x512xf32> to vector<8x128xf32>
    %421 = arith.negf %420 : vector<8x128xf32>
    %422 = math.exp %421 : vector<8x128xf32>
    %cst_81 = arith.constant 1.000000e+00 : f32
    %423 = vector.broadcast %cst_81 : f32 to vector<8x128xf32>
    %424 = arith.addf %423, %422 : vector<8x128xf32>
    %425 = arith.divf %423, %424 : vector<8x128xf32>
    %426 = arith.mulf %417, %376 : vector<8x128xf32>
    %427 = arith.mulf %416, %419 : vector<8x128xf32>
    %428 = arith.addf %426, %427 : vector<8x128xf32>
    %429 = math.tanh %428 : vector<8x128xf32>
    %430 = arith.mulf %425, %429 : vector<8x128xf32>
    %c0_82 = arith.constant 0 : index
    %c0_83 = arith.constant 0 : index
    %431 = vector.load %arg8[%c0_82, %c0_83] : memref<128x2xf32, #tpu.memory_space<vmem>>, vector<128x2xf32>
    %cst_84 = arith.constant dense<0.000000e+00> : vector<8x2xf32>
    %432 = tpu.matmul %430, %431, %cst_84 {dimension_numbers = #tpu.dot_dimension_numbers<[1], [0], [0], [1], [0, 0, 1, 1], [], []>} : vector<8x128xf32>, vector<128x2xf32>, vector<8x2xf32> -> vector<8x2xf32>
    %c0_85 = arith.constant 0 : index
    %c0_86 = arith.constant 0 : index
    %433 = vector.load %arg9[%c0_85, %c0_86] : memref<1x2xf32, #tpu.memory_space<vmem>>, vector<1x2xf32>
    %434 = vector.broadcast %433 : vector<1x2xf32> to vector<8x2xf32>
    %435 = arith.addf %432, %434 : vector<8x2xf32>
    %c0_87 = arith.constant 0 : index
    %c0_88 = arith.constant 0 : index
    %436 = vector.load %arg10[%c0_87, %c0_88] : memref<8x2xf32, #tpu.memory_space<vmem>>, vector<8x2xf32>
    tpu.vector_store %arg10[%c0_87, %c0_88], %435 {strides = array<i32>} : memref<8x2xf32, #tpu.memory_space<vmem>>, vector<8x2xf32>,
    return
  }
  func.func @transform_0(%arg0: i32) -> (i32, i32, i32) {
    %c0_i32 = arith.constant 0 : i32
    %c0_i32_0 = arith.constant 0 : i32
    %c0_i32_1 = arith.constant 0 : i32
    return %arg0, %c0_i32, %c0_i32_0 : i32, i32, i32
  }
  func.func @transform_1(%arg0: i32) -> (i32, i32) {
    %c0_i32 = arith.constant 0 : i32
    %c0_i32_0 = arith.constant 0 : i32
    %c0_i32_1 = arith.constant 0 : i32
    return %c0_i32, %c0_i32_0 : i32, i32
  }
  func.func @transform_2(%arg0: i32) -> (i32, i32) {
    %c0_i32 = arith.constant 0 : i32
    %c0_i32_0 = arith.constant 0 : i32
    %c0_i32_1 = arith.constant 0 : i32
    return %c0_i32, %c0_i32_0 : i32, i32
  }
  func.func @transform_3(%arg0: i32) -> (i32, i32) {
    %c0_i32 = arith.constant 0 : i32
    %c0_i32_0 = arith.constant 0 : i32
    %c0_i32_1 = arith.constant 0 : i32
    return %c0_i32, %c0_i32_0 : i32, i32
  }
  func.func @transform_4(%arg0: i32) -> (i32, i32) {
    %c0_i32 = arith.constant 0 : i32
    %c0_i32_0 = arith.constant 0 : i32
    %c0_i32_1 = arith.constant 0 : i32
    return %c0_i32, %c0_i32_0 : i32, i32
  }
  func.func @transform_5(%arg0: i32) -> (i32, i32) {
    %c0_i32 = arith.constant 0 : i32
    %c0_i32_0 = arith.constant 0 : i32
    %c0_i32_1 = arith.constant 0 : i32
    return %c0_i32, %c0_i32_0 : i32, i32
  }
  func.func @transform_6(%arg0: i32) -> (i32, i32) {
    %c0_i32 = arith.constant 0 : i32
    %c0_i32_0 = arith.constant 0 : i32
    %c0_i32_1 = arith.constant 0 : i32
    return %c0_i32, %c0_i32_0 : i32, i32
  }
  func.func @transform_7(%arg0: i32) -> (i32, i32) {
    %c0_i32 = arith.constant 0 : i32
    %c0_i32_0 = arith.constant 0 : i32
    %c0_i32_1 = arith.constant 0 : i32
    return %c0_i32, %c0_i32_0 : i32, i32
  }
  func.func @transform_8(%arg0: i32) -> (i32, i32) {
    %c0_i32 = arith.constant 0 : i32
    %c0_i32_0 = arith.constant 0 : i32
    %c0_i32_1 = arith.constant 0 : i32
    return %c0_i32, %c0_i32_0 : i32, i32
  }
  func.func @transform_9(%arg0: i32) -> (i32, i32) {
    %c0_i32 = arith.constant 0 : i32
    %c0_i32_0 = arith.constant 0 : i32
    return %arg0, %c0_i32 : i32, i32
  }
}

</mosaic_0001>

<bundles_post_ra>
// kernel: dqn_lstm_forward.1
= control target key start
LH: loop header
LB: loop body
LE: loop exit
PB: predicated region body
PF: predicated region fallthrough
CT: control target
= control target key end

     0   :  { %14 = vsyncpa [#allocation4], 0  ;;  %s6730_s0 = inlined_call_operand.vmem [shape: f32[1,64,3], index: 0, kind: input, shape index: {}]   ;;  %s6731_s1 = inlined_call_operand.hbm [shape: f32[3,512], index: 1, kind: input, shape index: {}]   ;;  %s6732_s2 = inlined_call_operand.hbm [shape: bf16[128,512], index: 2, kind: input, shape index: {}]   ;;  %s6733_s3 = inlined_call_operand.vmem [shape: f32[1,512], index: 3, kind: input, shape index: {}]   ;;  %s6734_s4 = inlined_call_operand.vmem [shape: bf16[128,512], index: 4, kind: input, shape index: {}]   ;;  %s6735_s5 = inlined_call_operand.hbm [shape: bf16[128,512], index: 5, kind: input, shape index: {}]   ;;  %s6736_s6 = inlined_call_operand.vmem [shape: f32[1,512], index: 6, kind: input, shape index: {}]   ;;  %s6737_s7 = inlined_call_operand.vmem [shape: f32[128,2], index: 7, kind: input, shape index: {}]   ;;  %s6738_s8 = inlined_call_operand.vmem [shape: f32[1,2], index: 8, kind: input, shape index: {}]   ;;  %s6739_s9 = inlined_call_operand.vmem [shape: f32[8,2], index: 9, kind: output, shape index: {}]  }
   0x1   :  { %15 = vsyncpa [#allocation6], 0  ;;  %s4572_s30 = smov [#allocation5]   ;;  %s4502_s13 = scalar_lea.hbm %s6732_s2, 4096 }
   0x2   :  { %s33_s10 = sshll.u32 %s4572_s30, 4  ;;  %p4503_p0 = scmp.ne.s32.totalorder %s6732_s2, %s4502_s13  ;;  %s34_s10 = int_to_ptr.vmem [resolvable:$true] %s33_s10 }
   0x3   :  { %p4506_p1 = scmp.lt.u32.totalorder %s4502_s13, %s6732_s2 }
   0x5   :  { %p4508_p2 = pnand %p4506_p1, %p4503_p0 }
   0x7   :  { %4511 = shalt.err (!%p4508_p2)
}
   0x8   :  { %s4512_s18 = scalar_lea.vmem %s34_s10, 4096  ;;  %p4517_p4 = scmp.lt.s32.totalorder %s34_s10, %s34_s10 }
   0x9   :  { %p4513_p3 = scmp.ne.s32.totalorder %s34_s10, %s4512_s18  ;;  %p4518_p5 = scmp.lt.s32.totalorder %s4512_s18, %s4512_s18 }
   0xb   :  { %p4519_p6 = por %p4518_p5, %p4517_p4 }
   0xd   :  { %p4520_p7 = pnand %p4519_p6, %p4513_p3 }
   0xf   :  { %4523 = shalt.err (!%p4520_p7)
}
  0x10   :  { %s4573_s19 = smov 256   ;;  %s4574_s20 = smov 16  }
  0x11   :  { %39 = dma.hbm_to_vmem [thread:$0]  %s6732_s2, 4096, %s34_s10, [#allocation6], %s4573_s19, %s4573_s19, %s4574_s20  }
  0x12   :  { %s4575_s23 = smov [#allocation3]   ;;  %s4576_s25 = smov [#allocation7]  }
  0x13   :  { %s24_s24 = sshll.u32 %s4575_s23, 4  ;;  %s49_s26 = sshll.u32 %s4576_s25, 4  ;;  %s25_s24 = int_to_ptr.vmem [resolvable:$true] %s24_s24  ;;  %s50_s26 = int_to_ptr.vmem [resolvable:$true] %s49_s26 }
  0x14   :  { %s4524_s29 = scalar_lea.hbm %s6731_s1, 256 }
  0x15   :  { %p4525_p8 = scmp.ne.s32.totalorder %s6731_s1, %s4524_s29  ;;  %p4528_p9 = scmp.lt.u32.totalorder %s4524_s29, %s6731_s1 }
  0x17   :  { %p4530_p10 = pnand %p4528_p9, %p4525_p8 }
  0x19   :  { %4533 = shalt.err (!%p4530_p10)
}
  0x1a   :  { %s4534_s2 = scalar_lea.vmem %s25_s24, 256  ;;  %p4539_p12 = scmp.lt.s32.totalorder %s25_s24, %s25_s24 }
  0x1b   :  { %p4535_p11 = scmp.ne.s32.totalorder %s25_s24, %s4534_s2  ;;  %p4540_p13 = scmp.lt.s32.totalorder %s4534_s2, %s4534_s2 }
  0x1d   :  { %p4541_p0 = por %p4540_p13, %p4539_p12 }
  0x1f   :  { %p4542_p1 = pnand %p4541_p0, %p4535_p11 }
  0x21   :  { %4545 = shalt.err (!%p4542_p1)
}
  0x22   :  { %27 = dma.hbm_to_vmem [thread:$0]  %s6731_s1, 256, %s25_s24, [#allocation4]  }
  0x23   :  { %s4546_s17 = scalar_lea.hbm %s6735_s5, 4096 }
  0x24   :  { %p4547_p2 = scmp.ne.s32.totalorder %s6735_s5, %s4546_s17  ;;  %p4550_p3 = scmp.lt.u32.totalorder %s4546_s17, %s6735_s5 }
  0x26   :  { %p4552_p4 = pnand %p4550_p3, %p4547_p2 }
  0x28   :  { %4555 = shalt.err (!%p4552_p4)
}
  0x29   :  { %s4556_s25 = scalar_lea.vmem %s50_s26, 4096  ;;  %p4561_p6 = scmp.lt.s32.totalorder %s50_s26, %s50_s26 }
  0x2a   :  { %p4557_p5 = scmp.ne.s32.totalorder %s50_s26, %s4556_s25  ;;  %p4562_p7 = scmp.lt.s32.totalorder %s4556_s25, %s4556_s25 }
  0x2c   :  { %p4563_p8 = por %p4562_p7, %p4561_p6 }
  0x2e   :  { %p4564_p9 = pnand %p4563_p8, %p4557_p5 }
  0x30   :  { %4567 = shalt.err (!%p4564_p9)
}
  0x31   :  { %55 = dma.hbm_to_vmem [thread:$0]  %s6735_s5, 4096, %s50_s26, [#allocation6], %s4573_s19, %s4573_s19, %s4574_s20  }
  0x32   :  { %4568 = dma.done.wait [#allocation4], 256  }
  0x33   :  { %4569 = vsyncadd [#allocation4], 4294967040 }
  0x34   :  { %4570 = dma.done.wait [#allocation6], 8192  }
  0x35   :  { %4571 = vsyncadd [#allocation6], 4294959104  ;;  %v6740_v0 = vmov 0.0   ;;  %v80_v1 = vld [vmem:[#allocation3] sm:$0x77]  ;;  %vm133_vm0 = vcmask 1042432  }
  0x36   :  { %206 = vmatprep.mubr.f32.mxu0 %v6740_v0  ;;  %319 = vmatprep.mubr.f32.mxu1 %v6740_v0  ;;  %v81_v2 = vld [vmem:[#allocation3 + $0x8] sm:$0x77]  ;;  %v72_v3 = vld [vmem:[%s6730_s0] sm:$0xff]  ;;  %v106_v4 = vcombine.high %v80_v1, %v80_v1  ;;  %vm108_vm1 = vcmask 23552   ;;  %v74_v15 = vld [vmem:[%s6730_s0 + $0x10] sm:$0xff]  ;;  %v6741_v50 = vmov 0  }
  0x37   :  { %v107_v5 = vcombine.high %v81_v2, %v81_v2  ;;  %v4678_v6 = vld [vmem:[#allocation7 + $0x4] ss:$16 sps:$4 sm:$0xff]   ;;  %v4680_v7 = vld [vmem:[#allocation7 + $0xc] ss:$16 sps:$4 sm:$0xff]   ;;  %v4682_v8 = vld [vmem:[#allocation7] ss:$16 sps:$4 sm:$0xff]  }
  0x38   :  { %3562 = vmatprep.subr.msk.mxu0 %vm133_vm0, %v106_v4  ;;  %v4684_v9 = vld [vmem:[#allocation7 + $0x8] ss:$16 sps:$4 sm:$0xff]   ;;  %v4688_v10 = vld [vmem:[#allocation7 + $0x24] ss:$16 sps:$4 sm:$0xff]   ;;  %v4695_v12 = vld [vmem:[#allocation7 + $0x2c] ss:$16 sps:$4 sm:$0xff]  }
  0x39   :  { %3572 = vmatprep.subr.msk.mxu1 %vm133_vm0, %v107_v5  ;;  %3563 = vmatpush1.msk.msra.mxu0 %vm133_vm0, %v80_v1  ;;  %v73_v11 = vld [vmem:[%s6730_s0 + $0x8] sm:$0xff]  ;;  %v4697_v13 = vld [vmem:[#allocation7 + $0x20] ss:$16 sps:$4 sm:$0xff]   ;;  %v4710_v16 = vld [vmem:[#allocation7 + $0x44] ss:$16 sps:$4 sm:$0xff]   ;;  %vm4580_vm2 = vmmov 0  }
  0x3a   :  { %3573 = vmatpush1.msk.msra.mxu1 %vm133_vm0, %v81_v2  ;;  %3564 = vmatmul.mubr.msk.f32.vlgmr.msra.gmra.mrb[0].mxu0 %vm108_vm1, %v72_v3  ;;  %v4701_v14 = vld [vmem:[#allocation7 + $0x28] ss:$16 sps:$4 sm:$0xff]   ;;  %v4712_v17 = vld [vmem:[#allocation7 + $0x4c] ss:$16 sps:$4 sm:$0xff]   ;;  %v4716_v18 = vld [vmem:[#allocation7 + $0x40] ss:$16 sps:$4 sm:$0xff]  }
  0x3b   :  { %682 = vmatprep.subr.bf16.mxu0 %v4678_v6  ;;  %723 = vmatprep.subr.bf16.mxu1 %v4680_v7  ;;  %v4720_v19 = vld [vmem:[#allocation7 + $0x48] ss:$16 sps:$4 sm:$0xff]   ;;  %v4729_v21 = vld [vmem:[#allocation7 + $0x64] ss:$16 sps:$4 sm:$0xff]   ;;  %v4733_v22 = vld [vmem:[#allocation7 + $0x6c] ss:$16 sps:$4 sm:$0xff]  }
  0x3c   :  { %3574 = vmatmul.mubr.msk.f32.vlgmr.msra.gmra.mrb[0].mxu1 %vm108_vm1, %v72_v3  ;;  %683 = vmatpush1.bf16.msra.mxu0 %v4682_v8  ;;  %v75_v20 = vld [vmem:[%s6730_s0 + $0x18] sm:$0xff]  ;;  %v4737_v23 = vld [vmem:[#allocation7 + $0x60] ss:$16 sps:$4 sm:$0xff]   ;;  %v4745_v25 = vld [vmem:[#allocation7 + $0x84] ss:$16 sps:$4 sm:$0xff]   ;;  %vm3554_vm3 = vcmask 15360  }
  0x3d   :  { %724 = vmatpush1.bf16.msra.mxu1 %v4684_v9  ;;  %212 = vmatprep.mubr.f32.mxu0 %v6740_v0  ;;  %v4739_v24 = vld [vmem:[#allocation7 + $0x68] ss:$16 sps:$4 sm:$0xff]   ;;  %v76_v26 = vld [vmem:[%s6730_s0 + $0x20] sm:$0xff]  ;;  %v4752_v27 = vld [vmem:[#allocation7 + $0x8c] ss:$16 sps:$4 sm:$0xff]  }
  0x3e   :  { %325 = vmatprep.mubr.f32.mxu1 %v6740_v0  ;;  %3565 = vmatmul.mubr.msk.f32.gmra.mrb[2].mxu0 %vm108_vm1, %v73_v11  ;;  %v4754_v28 = vld [vmem:[#allocation7 + $0x80] ss:$16 sps:$4 sm:$0xff]   ;;  %v4758_v29 = vld [vmem:[#allocation7 + $0x88] ss:$16 sps:$4 sm:$0xff]   ;;  %v4767_v31 = vld [vmem:[#allocation7 + $0xa4] ss:$16 sps:$4 sm:$0xff]  }
  0x3f   :  { %684 = vmatprep.subr.bf16.mxu0 %v4688_v10  ;;  %725 = vmatprep.subr.bf16.mxu1 %v4695_v12  ;;  %v77_v30 = vld [vmem:[%s6730_s0 + $0x28] sm:$0xff]  ;;  %v4773_v33 = vld [vmem:[#allocation7 + $0xa0] ss:$16 sps:$4 sm:$0xff]   ;;  %v4786_v36 = vld [vmem:[#allocation7 + $0xc4] ss:$16 sps:$4 sm:$0xff]  }
  0x40   :  { %3575 = vmatmul.mubr.msk.f32.gmra.mrb[2].mxu1 %vm108_vm1, %v73_v11  ;;  %685 = vmatpush1.bf16.msra.mxu0 %v4697_v13  ;;  %v4769_v32 = vld [vmem:[#allocation7 + $0xac] ss:$16 sps:$4 sm:$0xff]   ;;  %v4777_v34 = vld [vmem:[#allocation7 + $0xa8] ss:$16 sps:$4 sm:$0xff]   ;;  %v78_v35 = vld [vmem:[%s6730_s0 + $0x30] sm:$0xff] }
  0x41   :  { %726 = vmatpush1.bf16.msra.mxu1 %v4701_v14  ;;  %218 = vmatprep.mubr.f32.mxu0 %v6740_v0  ;;  %v4790_v37 = vld [vmem:[#allocation7 + $0xcc] ss:$16 sps:$4 sm:$0xff]   ;;  %v4792_v38 = vld [vmem:[#allocation7 + $0xc0] ss:$16 sps:$4 sm:$0xff]   ;;  %v4796_v39 = vld [vmem:[#allocation7 + $0xc8] ss:$16 sps:$4 sm:$0xff]  }
  0x42   :  { %331 = vmatprep.mubr.f32.mxu1 %v6740_v0  ;;  %3566 = vmatmul.mubr.msk.f32.gmra.mrb[4].mxu0 %vm108_vm1, %v74_v15  ;;  %v79_v40 = vld [vmem:[%s6730_s0 + $0x38] sm:$0xff]  ;;  %v4805_v41 = vld [vmem:[#allocation7 + $0xe4] ss:$16 sps:$4 sm:$0xff]   ;;  %v4811_v43 = vld [vmem:[#allocation7 + $0xe0] ss:$16 sps:$4 sm:$0xff]  }
  0x43   :  { %686 = vmatprep.subr.bf16.mxu0 %v4710_v16  ;;  %727 = vmatprep.subr.bf16.mxu1 %v4712_v17  ;;  %v4807_v42 = vld [vmem:[#allocation7 + $0xec] ss:$16 sps:$4 sm:$0xff]   ;;  %v4815_v44 = vld [vmem:[#allocation7 + $0xe8] ss:$16 sps:$4 sm:$0xff]   ;;  %v4819_v45 = vld [vmem:[#allocation5 + $0x4] ss:$16 sps:$4 sm:$0xff]  }
  0x44   :  { %3576 = vmatmul.mubr.msk.f32.gmra.mrb[4].mxu1 %vm108_vm1, %v74_v15  ;;  %687 = vmatpush1.bf16.msra.mxu0 %v4716_v18  ;;  %v4823_v46 = vld [vmem:[#allocation5 + $0xc] ss:$16 sps:$4 sm:$0xff]   ;;  %v4827_v47 = vld [vmem:[#allocation5] ss:$16 sps:$4 sm:$0xff]   ;;  %v4829_v48 = vld [vmem:[#allocation5 + $0x8] ss:$16 sps:$4 sm:$0xff]  }
  0x45   :  { %728 = vmatpush1.bf16.msra.mxu1 %v4720_v19  ;;  %224 = vmatprep.mubr.f32.mxu0 %v6740_v0  ;;  %v4833_v49 = vld [vmem:[#allocation5 + $0x24] ss:$16 sps:$4 sm:$0xff]   ;;  %v4837_v51 = vld [vmem:[#allocation5 + $0x2c] ss:$16 sps:$4 sm:$0xff]   ;;  %v4843_v52 = vld [vmem:[#allocation5 + $0x20] ss:$16 sps:$4 sm:$0xff]  }
  0x46   :  { %337 = vmatprep.mubr.f32.mxu1 %v6740_v0  ;;  %3567 = vmatmul.mubr.msk.f32.gmra.mrb[6].mxu0 %vm108_vm1, %v75_v20  ;;  %v4847_v53 = vld [vmem:[#allocation5 + $0x28] ss:$16 sps:$4 sm:$0xff]   ;;  %v4851_v54 = vld [vmem:[#allocation5 + $0x44] ss:$16 sps:$4 sm:$0xff]   ;;  %v4853_v55 = vld [vmem:[#allocation5 + $0x4c] ss:$16 sps:$4 sm:$0xff]  }
  0x47   :  { %688 = vmatprep.subr.bf16.mxu0 %v4729_v21  ;;  %729 = vmatprep.subr.bf16.mxu1 %v4733_v22  ;;  %7111 = vst [vmem:[#allocation10_spill] sm:$0xff] %v4847_v53  ;;  %7112 = vst [vmem:[#allocation11_spill] sm:$0xff] %v4851_v54  ;;  %v4857_v56 = vld [vmem:[#allocation5 + $0x40] ss:$16 sps:$4 sm:$0xff]   ;;  %v4859_v57 = vld [vmem:[#allocation5 + $0x48] ss:$16 sps:$4 sm:$0xff]  }
  0x48   :  { %3577 = vmatmul.mubr.msk.f32.gmra.mrb[6].mxu1 %vm108_vm1, %v75_v20  ;;  %689 = vmatpush1.bf16.msra.mxu0 %v4737_v23  ;;  %7113 = vst [vmem:[#allocation12_spill] sm:$0xff] %v4853_v55  ;;  %7114 = vst [vmem:[#allocation13_spill] sm:$0xff] %v4857_v56  ;;  %v4863_v58 = vld [vmem:[#allocation5 + $0x64] ss:$16 sps:$4 sm:$0xff]   ;;  %v4867_v59 = vld [vmem:[#allocation5 + $0x6c] ss:$16 sps:$4 sm:$0xff]  }
  0x49   :  { %730 = vmatpush1.bf16.msra.mxu1 %v4739_v24  ;;  %230 = vmatprep.mubr.f32.mxu0 %v6740_v0  ;;  %7115 = vst [vmem:[#allocation14_spill] sm:$0xff] %v4859_v57  ;;  %7116 = vst [vmem:[#allocation15_spill] sm:$0xff] %v4863_v58  ;;  %v4869_v60 = vld [vmem:[#allocation5 + $0x60] ss:$16 sps:$4 sm:$0xff]   ;;  %v4871_v61 = vld [vmem:[#allocation5 + $0x68] ss:$16 sps:$4 sm:$0xff]  }
  0x4a   :  { %343 = vmatprep.mubr.f32.mxu1 %v6740_v0  ;;  %3568 = vmatmul.mubr.msk.f32.gmra.mrb[8].mxu0 %vm108_vm1, %v76_v26  ;;  %7117 = vst [vmem:[#allocation16_spill] sm:$0xff] %v4867_v59  ;;  %7118 = vst [vmem:[#allocation17_spill] sm:$0xff] %v4869_v60  ;;  %v4873_v62 = vld [vmem:[#allocation5 + $0x84] ss:$16 sps:$4 sm:$0xff]   ;;  %v4875_v63 = vld [vmem:[#allocation5 + $0x8c] ss:$16 sps:$4 sm:$0xff]  }
  0x4b   :  { %690 = vmatprep.subr.bf16.mxu0 %v4745_v25  ;;  %731 = vmatprep.subr.bf16.mxu1 %v4752_v27  ;;  %7119 = vst [vmem:[#allocation18_spill] sm:$0xff] %v4871_v61  ;;  %7120 = vst [vmem:[#allocation19_spill] sm:$0xff] %v4873_v62  ;;  %v4881_v1 = vld [vmem:[#allocation5 + $0x80] ss:$16 sps:$4 sm:$0xff]   ;;  %v4883_v2 = vld [vmem:[#allocation5 + $0x88] ss:$16 sps:$4 sm:$0xff]  }
  0x4c   :  { %3578 = vmatmul.mubr.msk.f32.gmra.mrb[8].mxu1 %vm108_vm1, %v76_v26  ;;  %691 = vmatpush1.bf16.msra.mxu0 %v4754_v28  ;;  %7121 = vst [vmem:[#allocation20_spill] sm:$0xff] %v4875_v63  ;;  %7122 = vst [vmem:[#allocation21_spill] sm:$0xff] %v4881_v1  ;;  %v4885_v3 = vld [vmem:[#allocation5 + $0xa4] ss:$16 sps:$4 sm:$0xff]   ;;  %v4887_v4 = vld [vmem:[#allocation5 + $0xac] ss:$16 sps:$4 sm:$0xff]  }
  0x4d   :  { %732 = vmatpush1.bf16.msra.mxu1 %v4758_v29  ;;  %236 = vmatprep.mubr.f32.mxu0 %v6740_v0  ;;  %7123 = vst [vmem:[#allocation22_spill] sm:$0xff] %v4883_v2  ;;  %7124 = vst [vmem:[#allocation23_spill] sm:$0xff] %v4885_v3  ;;  %v4893_v5 = vld [vmem:[#allocation5 + $0xa0] ss:$16 sps:$4 sm:$0xff]   ;;  %v4895_v11 = vld [vmem:[#allocation5 + $0xa8] ss:$16 sps:$4 sm:$0xff]  }
  0x4e   :  { %349 = vmatprep.mubr.f32.mxu1 %v6740_v0  ;;  %3569 = vmatmul.mubr.msk.f32.gmra.mrb[10].mxu0 %vm108_vm1, %v77_v30  ;;  %7125 = vst [vmem:[#allocation24_spill] sm:$0xff] %v4887_v4  ;;  %7126 = vst [vmem:[#allocation25_spill] sm:$0xff] %v4893_v5  ;;  %v4897_v15 = vld [vmem:[#allocation5 + $0xc4] ss:$16 sps:$4 sm:$0xff]   ;;  %v4899_v20 = vld [vmem:[#allocation5 + $0xcc] ss:$16 sps:$4 sm:$0xff]  }
  0x4f   :  { %692 = vmatprep.subr.bf16.mxu0 %v4767_v31  ;;  %733 = vmatprep.subr.bf16.mxu1 %v4769_v32  ;;  %7127 = vst [vmem:[#allocation26_spill] sm:$0xff] %v4895_v11  ;;  %7128 = vst [vmem:[#allocation27_spill] sm:$0xff] %v4897_v15  ;;  %v4907_v26 = vld [vmem:[#allocation5 + $0xc0] ss:$16 sps:$4 sm:$0xff]  }
  0x50   :  { %3579 = vmatmul.mubr.msk.f32.gmra.mrb[10].mxu1 %vm108_vm1, %v77_v30  ;;  %693 = vmatpush1.bf16.msra.mxu0 %v4773_v33  ;;  %7129 = vst [vmem:[#allocation28_spill] sm:$0xff] %v4899_v20  ;;  %7130 = vst [vmem:[#allocation29_spill] sm:$0xff] %v4907_v26  ;;  %v4909_v30 = vld [vmem:[#allocation5 + $0xc8] ss:$16 sps:$4 sm:$0xff]  }
  0x51   :  { %734 = vmatpush1.bf16.msra.mxu1 %v4777_v34  ;;  %242 = vmatprep.mubr.f32.mxu0 %v6740_v0  ;;  %7131 = vst [vmem:[#allocation30_spill] sm:$0xff] %v4909_v30 }
  0x52   :  { %355 = vmatprep.mubr.f32.mxu1 %v6740_v0  ;;  %3570 = vmatmul.mubr.msk.f32.gmra.mrb[12].mxu0 %vm108_vm1, %v78_v35 }
  0x53   :  { %694 = vmatprep.subr.bf16.mxu0 %v4786_v36  ;;  %735 = vmatprep.subr.bf16.mxu1 %v4790_v37 }
  0x54   :  { %3580 = vmatmul.mubr.msk.f32.gmra.mrb[12].mxu1 %vm108_vm1, %v78_v35  ;;  %695 = vmatpush1.bf16.msra.mxu0 %v4792_v38  ;;  %v4913_v35 = vld [vmem:[#allocation5 + $0xe4] ss:$16 sps:$4 sm:$0xff]  }
  0x55   :  { %736 = vmatpush1.bf16.msra.mxu1 %v4796_v39  ;;  %248 = vmatprep.mubr.f32.mxu0 %v6740_v0  ;;  %7132 = vst [vmem:[#allocation31_spill] sm:$0xff] %v4913_v35 }
  0x56   :  { %361 = vmatprep.mubr.f32.mxu1 %v6740_v0  ;;  %3571 = vmatmul.mubr.msk.f32.gmra.mrb[14].mxu0 %vm108_vm1, %v79_v40  ;;  %v4919_v0 = vld [vmem:[#allocation5 + $0xe0] ss:$16 sps:$4 sm:$0xff]  }
  0x57   :  { %696 = vmatprep.subr.bf16.mxu0 %v4805_v41  ;;  %737 = vmatprep.subr.bf16.mxu1 %v4807_v42  ;;  %7134 = vst [vmem:[#allocation33_spill] sm:$0xff] %v4919_v0 }
  0x58   :  { %3581 = vmatmul.mubr.msk.f32.gmra.mrb[14].mxu1 %vm108_vm1, %v79_v40  ;;  %697 = vmatpush1.bf16.msra.mxu0 %v4811_v43  ;;  %v4915_v40 = vld [vmem:[#allocation5 + $0xec] ss:$16 sps:$4 sm:$0xff]  }
  0x59   :  { %738 = vmatpush1.bf16.msra.mxu1 %v4815_v44  ;;  %714 = vmatprep.mubr.bf16.mxu0 %v6741_v50  ;;  %7133 = vst [vmem:[#allocation32_spill] sm:$0xff] %v4915_v40 }
  0x5a   :  { %755 = vmatprep.mubr.bf16.mxu1 %v6741_v50  ;;  %924 = vmatprep.subr.bf16.mxu0 %v4819_v45 }
  0x5b   :  { %965 = vmatprep.subr.bf16.mxu1 %v4823_v46  ;;  %715 = vmatmul.mubr.bf16.vlgmr.msra.gmra.mrb[16].mxu0 %v6741_v50 }
  0x5c   :  { %756 = vmatmul.mubr.bf16.vlgmr.msra.gmra.mrb[16].mxu1 %v6741_v50  ;;  %925 = vmatpush1.bf16.msra.mxu0 %v4827_v47 }
  0x5d   :  { %966 = vmatpush1.bf16.msra.mxu1 %v4829_v48  ;;  %926 = vmatprep.subr.bf16.mxu0 %v4833_v49 }
  0x5e   :  { %967 = vmatprep.subr.bf16.mxu1 %v4837_v51  ;;  %956 = vmatprep.mubr.bf16.mxu0 %v6741_v50 }
  0x5f   :  { %997 = vmatprep.mubr.bf16.mxu1 %v6741_v50  ;;  %v4921_v50 = vld [vmem:[#allocation5 + $0xe8] ss:$16 sps:$4 sm:$0xff]  }
  0x60   :  { %927 = vmatpush1.bf16.msra.mxu0 %v4843_v52  ;;  %7135 = vst [vmem:[#allocation34_spill] sm:$0xff] %v4921_v50 }
  0x61   :  { %968 = vmatpush1.bf16.msra.mxu1 %v4847_v53  ;;  %928 = vmatprep.subr.bf16.mxu0 %v4851_v54 }
  0x62   :  { %969 = vmatprep.subr.bf16.mxu1 %v4853_v55 }
  0x64   :  { %929 = vmatpush1.bf16.msra.mxu0 %v4857_v56 }
  0x65   :  { %970 = vmatpush1.bf16.msra.mxu1 %v4859_v57  ;;  %930 = vmatprep.subr.bf16.mxu0 %v4863_v58 }
  0x66   :  { %971 = vmatprep.subr.bf16.mxu1 %v4867_v59 }
  0x68   :  { %931 = vmatpush1.bf16.msra.mxu0 %v4869_v60 }
  0x69   :  { %972 = vmatpush1.bf16.msra.mxu1 %v4871_v61  ;;  %932 = vmatprep.subr.bf16.mxu0 %v4873_v62 }
  0x6a   :  { %973 = vmatprep.subr.bf16.mxu1 %v4875_v63 }
  0x6c   :  { %933 = vmatpush1.bf16.msra.mxu0 %v4881_v1 }
  0x6d   :  { %974 = vmatpush1.bf16.msra.mxu1 %v4883_v2  ;;  %934 = vmatprep.subr.bf16.mxu0 %v4885_v3 }
  0x6e   :  { %975 = vmatprep.subr.bf16.mxu1 %v4887_v4 }
  0x70   :  { %935 = vmatpush1.bf16.msra.mxu0 %v4893_v5 }
  0x71   :  { %976 = vmatpush1.bf16.msra.mxu1 %v4895_v11  ;;  %936 = vmatprep.subr.bf16.mxu0 %v4897_v15  ;;  %v82_v11 = vld [vmem:[%s6733_s3] sm:$0xf] }
  0x72   :  { %977 = vmatprep.subr.bf16.mxu1 %v4899_v20  ;;  %v7136_v20 = vmov 0  }
  0x74   :  { %937 = vmatpush1.bf16.msra.mxu0 %v4907_v26  ;;  %v4963_v26 = vld [vmem:[%s6734_s4 + $0x2c] ss:$16 sps:$4 sm:$0xff]  }
  0x75   :  { %978 = vmatpush1.bf16.msra.mxu1 %v4909_v30  ;;  %938 = vmatprep.subr.bf16.mxu0 %v4913_v35  ;;  %v4934_v30 = vld [vmem:[%s6734_s4 + $0x4] ss:$16 sps:$4 sm:$0xff]   ;;  %7142 = vst [vmem:[#allocation40_spill] sm:$0xff] %v4963_v26 }
  0x76   :  { %979 = vmatprep.subr.bf16.mxu1 %v4915_v40  ;;  %7137 = vst [vmem:[#allocation35_spill] sm:$0xff] %v4934_v30  ;;  %v4939_v40 = vld [vmem:[%s6734_s4 + $0xc] ss:$16 sps:$4 sm:$0xff]   ;;  %v4958_v35 = vld [vmem:[%s6734_s4 + $0x24] ss:$16 sps:$4 sm:$0xff]  }
  0x77   :  { %7138 = vst [vmem:[#allocation36_spill] sm:$0xff] %v4939_v40  ;;  %7141 = vst [vmem:[#allocation39_spill] sm:$0xff] %v4958_v35 }
  0x78   :  { %939 = vmatpush1.bf16.msra.mxu0 %v4919_v0  ;;  %v4949_v0 = vld [vmem:[%s6734_s4 + $0x8] ss:$16 sps:$4 sm:$0xff]  }
  0x79   :  { %980 = vmatpush1.bf16.msra.mxu1 %v4921_v50  ;;  %v4944_v50 = vld [vmem:[%s6734_s4] ss:$16 sps:$4 sm:$0xff]   ;;  %7140 = vst [vmem:[#allocation38_spill] sm:$0xff] %v4949_v0  ;;  %1195 = vmatprep.subr.bf16.mxu0 %v4934_v30 }
  0x7a   :  { %7139 = vst [vmem:[#allocation37_spill] sm:$0xff] %v4944_v50  ;;  %1236 = vmatprep.subr.bf16.mxu1 %v4939_v40  ;;  %v4968_v30 = vld [vmem:[%s6734_s4 + $0x20] ss:$16 sps:$4 sm:$0xff]   ;;  %v4987_v40 = vld [vmem:[%s6734_s4 + $0x4c] ss:$16 sps:$4 sm:$0xff]  }
  0x7b   :  { %957 = vmatmul.mubr.bf16.vlgmr.msra.gmra.mrb[20].mxu0 %v7136_v20  ;;  %7143 = vst [vmem:[#allocation41_spill] sm:$0xff] %v4968_v30  ;;  %7146 = vst [vmem:[#allocation44_spill] sm:$0xff] %v4987_v40 }
  0x7c   :  { %998 = vmatmul.mubr.bf16.vlgmr.msra.gmra.mrb[20].mxu1 %v7136_v20  ;;  %1227 = vmatprep.mubr.bf16.mxu0 %v7136_v20 }
  0x7d   :  { %1268 = vmatprep.mubr.bf16.mxu1 %v7136_v20  ;;  %1196 = vmatpush1.bf16.msra.mxu0 %v4944_v50  ;;  %v4973_v50 = vld [vmem:[%s6734_s4 + $0x28] ss:$16 sps:$4 sm:$0xff]  }
  0x7e   :  { %1237 = vmatpush1.bf16.msra.mxu1 %v4949_v0  ;;  %7144 = vst [vmem:[#allocation42_spill] sm:$0xff] %v4973_v50  ;;  %1197 = vmatprep.subr.bf16.mxu0 %v4958_v35  ;;  %v4982_v0 = vld [vmem:[%s6734_s4 + $0x44] ss:$16 sps:$4 sm:$0xff]   ;;  %v4992_v35 = vld [vmem:[%s6734_s4 + $0x40] ss:$16 sps:$4 sm:$0xff]  }
  0x7f   :  { %1238 = vmatprep.subr.bf16.mxu1 %v4963_v26  ;;  %7145 = vst [vmem:[#allocation43_spill] sm:$0xff] %v4982_v0  ;;  %7147 = vst [vmem:[#allocation45_spill] sm:$0xff] %v4992_v35  ;;  %v5011_v26 = vld [vmem:[%s6734_s4 + $0x6c] ss:$16 sps:$4 sm:$0xff]  }
  0x80   :  { %7150 = vst [vmem:[#allocation48_spill] sm:$0xff] %v5011_v26 }
  0x81   :  { %1198 = vmatpush1.bf16.msra.mxu0 %v4968_v30  ;;  %v4997_v30 = vld [vmem:[%s6734_s4 + $0x48] ss:$16 sps:$4 sm:$0xff]  }
  0x82   :  { %1239 = vmatpush1.bf16.msra.mxu1 %v4973_v50  ;;  %7148 = vst [vmem:[#allocation46_spill] sm:$0xff] %v4997_v30  ;;  %1199 = vmatprep.subr.bf16.mxu0 %v4982_v0  ;;  %v5006_v50 = vld [vmem:[%s6734_s4 + $0x64] ss:$16 sps:$4 sm:$0xff]   ;;  %v5016_v0 = vld [vmem:[%s6734_s4 + $0x60] ss:$16 sps:$4 sm:$0xff]  }
  0x83   :  { %1240 = vmatprep.subr.bf16.mxu1 %v4987_v40  ;;  %7149 = vst [vmem:[#allocation47_spill] sm:$0xff] %v5006_v50  ;;  %7151 = vst [vmem:[#allocation49_spill] sm:$0xff] %v5016_v0  ;;  %v5035_v40 = vld [vmem:[%s6734_s4 + $0x8c] ss:$16 sps:$4 sm:$0xff]  }
  0x84   :  { %7154 = vst [vmem:[#allocation52_spill] sm:$0xff] %v5035_v40 }
  0x85   :  { %1200 = vmatpush1.bf16.msra.mxu0 %v4992_v35  ;;  %v5021_v35 = vld [vmem:[%s6734_s4 + $0x68] ss:$16 sps:$4 sm:$0xff]  }
  0x86   :  { %1241 = vmatpush1.bf16.msra.mxu1 %v4997_v30  ;;  %7152 = vst [vmem:[#allocation50_spill] sm:$0xff] %v5021_v35  ;;  %1201 = vmatprep.subr.bf16.mxu0 %v5006_v50  ;;  %v5030_v30 = vld [vmem:[%s6734_s4 + $0x84] ss:$16 sps:$4 sm:$0xff]   ;;  %v5040_v50 = vld [vmem:[%s6734_s4 + $0x80] ss:$16 sps:$4 sm:$0xff]  }
  0x87   :  { %1242 = vmatprep.subr.bf16.mxu1 %v5011_v26  ;;  %7153 = vst [vmem:[#allocation51_spill] sm:$0xff] %v5030_v30  ;;  %7155 = vst [vmem:[#allocation53_spill] sm:$0xff] %v5040_v50  ;;  %v5057_v26 = vld [vmem:[%s6734_s4 + $0xac] ss:$16 sps:$4 sm:$0xff]  }
  0x88   :  { %7158 = vst [vmem:[#allocation56_spill] sm:$0xff] %v5057_v26 }
  0x89   :  { %1202 = vmatpush1.bf16.msra.mxu0 %v5016_v0  ;;  %v5045_v0 = vld [vmem:[%s6734_s4 + $0x88] ss:$16 sps:$4 sm:$0xff]  }
  0x8a   :  { %1243 = vmatpush1.bf16.msra.mxu1 %v5021_v35  ;;  %7156 = vst [vmem:[#allocation54_spill] sm:$0xff] %v5045_v0  ;;  %1203 = vmatprep.subr.bf16.mxu0 %v5030_v30  ;;  %v5052_v35 = vld [vmem:[%s6734_s4 + $0xa4] ss:$16 sps:$4 sm:$0xff]   ;;  %v5064_v30 = vld [vmem:[%s6734_s4 + $0xa0] ss:$16 sps:$4 sm:$0xff]  }
  0x8b   :  { %1244 = vmatprep.subr.bf16.mxu1 %v5035_v40  ;;  %7157 = vst [vmem:[#allocation55_spill] sm:$0xff] %v5052_v35  ;;  %7159 = vst [vmem:[#allocation57_spill] sm:$0xff] %v5064_v30  ;;  %v5069_v40 = vld [vmem:[%s6734_s4 + $0xa8] ss:$16 sps:$4 sm:$0xff]  }
  0x8c   :  { %7160 = vst [vmem:[#allocation58_spill] sm:$0xff] %v5069_v40 }
  0x8d   :  { %1204 = vmatpush1.bf16.msra.mxu0 %v5040_v50  ;;  %v5076_v50 = vld [vmem:[%s6734_s4 + $0xc4] ss:$16 sps:$4 sm:$0xff]  }
  0x8e   :  { %1245 = vmatpush1.bf16.msra.mxu1 %v5045_v0  ;;  %1205 = vmatprep.subr.bf16.mxu0 %v5052_v35  ;;  %7161 = vst [vmem:[#allocation59_spill] sm:$0xff] %v5076_v50  ;;  %v5081_v0 = vld [vmem:[%s6734_s4 + $0xcc] ss:$16 sps:$4 sm:$0xff]   ;;  %v5088_v35 = vld [vmem:[%s6734_s4 + $0xc0] ss:$16 sps:$4 sm:$0xff]  }
  0x8f   :  { %1246 = vmatprep.subr.bf16.mxu1 %v5057_v26  ;;  %7162 = vst [vmem:[#allocation60_spill] sm:$0xff] %v5081_v0  ;;  %7163 = vst [vmem:[#allocation61_spill] sm:$0xff] %v5088_v35  ;;  %v5093_v26 = vld [vmem:[%s6734_s4 + $0xc8] ss:$16 sps:$4 sm:$0xff]  }
  0x90   :  { %7164 = vst [vmem:[#allocation62_spill] sm:$0xff] %v5093_v26 }
  0x91   :  { %1206 = vmatpush1.bf16.msra.mxu0 %v5064_v30  ;;  %v5100_v30 = vld [vmem:[%s6734_s4 + $0xe4] ss:$16 sps:$4 sm:$0xff]  }
  0x92   :  { %1247 = vmatpush1.bf16.msra.mxu1 %v5069_v40  ;;  %1207 = vmatprep.subr.bf16.mxu0 %v5076_v50  ;;  %7165 = vst [vmem:[#allocation63_spill] sm:$0xff] %v5100_v30  ;;  %v5105_v40 = vld [vmem:[%s6734_s4 + $0xec] ss:$16 sps:$4 sm:$0xff]   ;;  %v5112_v50 = vld [vmem:[%s6734_s4 + $0xe0] ss:$16 sps:$4 sm:$0xff]  }
  0x93   :  { %1248 = vmatprep.subr.bf16.mxu1 %v5081_v0  ;;  %7166 = vst [vmem:[#allocation64_spill] sm:$0xff] %v5105_v40  ;;  %7167 = vst [vmem:[#allocation65_spill] sm:$0xff] %v5112_v50  ;;  %v5117_v0 = vld [vmem:[%s6734_s4 + $0xe8] ss:$16 sps:$4 sm:$0xff]  }
  0x94   :  { %7168 = vst [vmem:[#allocation66_spill] sm:$0xff] %v5117_v0 }
  0x95   :  { %1208 = vmatpush1.bf16.msra.mxu0 %v5088_v35 }
  0x96   :  { %1249 = vmatpush1.bf16.msra.mxu1 %v5093_v26  ;;  %1209 = vmatprep.subr.bf16.mxu0 %v5100_v30  ;;  %v84_v26 = vlaneseq }
  0x97   :  { %1250 = vmatprep.subr.bf16.mxu1 %v5105_v40 }
  0x98   :  { %v5125_v35 = vshrl.u32 %v84_v26, 7 }
  0x99   :  { %1210 = vmatpush1.bf16.msra.mxu0 %v5112_v50 }
  0x9a   :  { %1251 = vmatpush1.bf16.msra.mxu1 %v5117_v0  ;;  %1310 = vmatprep.subr.bf16.mxu0 %v4678_v6  ;;  %v6837_v15 = vsub.s32 0, %v5125_v35  ;;  %v6839_v40 = vsub.s32 1, %v5125_v35  ;;  %v6842_v50 = vsub.s32 2, %v5125_v35 }
  0x9b   :  { %1351 = vmatprep.subr.bf16.mxu1 %v4680_v7  ;;  %v6844_v7 = vsub.s32 3, %v5125_v35 }
  0x9c   :  { %v87_v5 = vrot.slane %v82_v11, %v6837_v15  ;;  %v91_v4 = vrot.slane %v82_v11, %v6839_v40  ;;  %v95_v2 = vrot.slane %v82_v11, %v6842_v50 }
  0x9d   :  { %v99_v62 = vrot.slane %v82_v11, %v6844_v7 }
 0x10d   :  { %v5131_v30 = vpop.f32.mrb[0].mxu0 }
 0x10e   :  { %v5135_v0 = vpop.f32.mrb[1].mxu0 }
 0x10f   :  { %v5137_v6 = vpop.f32.mrb[0].mxu1 }
 0x110   :  { %v5140_v26 = vpop.f32.mrb[1].mxu1 }
 0x111   :  { %v214_v3 = vpop.f32.mrb[2].mxu0 }
 0x112   :  { %v5148_v1 = vadd.f32 %v214_v3, %v87_v5  ;;  %v216_v63 = vpop.f32.mrb[3].mxu0 }
 0x113   :  { %v327_v61 = vpop.f32.mrb[2].mxu1  ;;  %v5152_v60 = vadd.f32 %v216_v63, %v91_v4 }
 0x114   :  { %7169 = vst [vmem:[#allocation67_spill] sm:$0xff] %v5148_v1  ;;  %v5154_v59 = vadd.f32 %v327_v61, %v95_v2  ;;  %v329_v58 = vpop.f32.mrb[3].mxu1 }
 0x115   :  { %7170 = vst [vmem:[#allocation68_spill] sm:$0xff] %v5152_v60  ;;  %v5156_v15 = vadd.f32 %v329_v58, %v99_v62  ;;  %v220_v57 = vpop.f32.mrb[4].mxu0 }
 0x116   :  { %7171 = vst [vmem:[#allocation69_spill] sm:$0xff] %v5154_v59  ;;  %v5158_v40 = vadd.f32 %v220_v57, %v87_v5  ;;  %v222_v56 = vpop.f32.mrb[5].mxu0 }
 0x117   :  { %7172 = vst [vmem:[#allocation70_spill] sm:$0xff] %v5156_v15  ;;  %v333_v55 = vpop.f32.mrb[4].mxu1  ;;  %v5160_v50 = vadd.f32 %v222_v56, %v91_v4 }
 0x118   :  { %7173 = vst [vmem:[#allocation71_spill] sm:$0xff] %v5158_v40  ;;  %v5162_v3 = vadd.f32 %v333_v55, %v95_v2  ;;  %v335_v1 = vpop.f32.mrb[5].mxu1 }
 0x119   :  { %7174 = vst [vmem:[#allocation72_spill] sm:$0xff] %v5160_v50  ;;  %v5164_v54 = vadd.f32 %v335_v1, %v99_v62  ;;  %v226_v11 = vpop.f32.mrb[6].mxu0 }
 0x11a   :  { %7175 = vst [vmem:[#allocation73_spill] sm:$0xff] %v5162_v3  ;;  %v5166_v63 = vadd.f32 %v226_v11, %v87_v5  ;;  %v228_v61 = vpop.f32.mrb[7].mxu0 }
 0x11b   :  { %7176 = vst [vmem:[#allocation74_spill] sm:$0xff] %v5164_v54  ;;  %v339_v7 = vpop.f32.mrb[6].mxu1  ;;  %v5168_v60 = vadd.f32 %v228_v61, %v91_v4 }
 0x11c   :  { %7177 = vst [vmem:[#allocation75_spill] sm:$0xff] %v5166_v63  ;;  %v5170_v58 = vadd.f32 %v339_v7, %v95_v2  ;;  %v341_v57 = vpop.f32.mrb[7].mxu1 }
 0x11d   :  { %7178 = vst [vmem:[#allocation76_spill] sm:$0xff] %v5168_v60  ;;  %v5172_v40 = vadd.f32 %v341_v57, %v99_v62  ;;  %v232_v15 = vpop.f32.mrb[8].mxu0 }
 0x11e   :  { %7179 = vst [vmem:[#allocation77_spill] sm:$0xff] %v5170_v58  ;;  %v5174_v56 = vadd.f32 %v232_v15, %v87_v5  ;;  %v234_v55 = vpop.f32.mrb[9].mxu0 }
 0x11f   :  { %7180 = vst [vmem:[#allocation78_spill] sm:$0xff] %v5172_v40  ;;  %v345_v50 = vpop.f32.mrb[8].mxu1  ;;  %v5176_v3 = vadd.f32 %v234_v55, %v91_v4 }
 0x120   :  { %7181 = vst [vmem:[#allocation79_spill] sm:$0xff] %v5174_v56  ;;  %v5178_v1 = vadd.f32 %v345_v50, %v95_v2  ;;  %v347_v11 = vpop.f32.mrb[9].mxu1 }
 0x121   :  { %7182 = vst [vmem:[#allocation80_spill] sm:$0xff] %v5176_v3  ;;  %v5180_v63 = vadd.f32 %v347_v11, %v99_v62  ;;  %v238_v54 = vpop.f32.mrb[10].mxu0 }
 0x122   :  { %7183 = vst [vmem:[#allocation81_spill] sm:$0xff] %v5178_v1  ;;  %v5182_v61 = vadd.f32 %v238_v54, %v87_v5  ;;  %v240_v7 = vpop.f32.mrb[11].mxu0 }
 0x123   :  { %7184 = vst [vmem:[#allocation82_spill] sm:$0xff] %v5180_v63  ;;  %v351_v60 = vpop.f32.mrb[10].mxu1  ;;  %v5184_v58 = vadd.f32 %v240_v7, %v91_v4 }
 0x124   :  { %7185 = vst [vmem:[#allocation83_spill] sm:$0xff] %v5182_v61  ;;  %v5186_v57 = vadd.f32 %v351_v60, %v95_v2  ;;  %v353_v15 = vpop.f32.mrb[11].mxu1 }
 0x125   :  { %7186 = vst [vmem:[#allocation84_spill] sm:$0xff] %v5184_v58  ;;  %v5188_v56 = vadd.f32 %v353_v15, %v99_v62  ;;  %v244_v40 = vpop.f32.mrb[12].mxu0 }
 0x126   :  { %7187 = vst [vmem:[#allocation85_spill] sm:$0xff] %v5186_v57  ;;  %v5190_v55 = vadd.f32 %v244_v40, %v87_v5  ;;  %v246_v50 = vpop.f32.mrb[13].mxu0 }
 0x127   :  { %7188 = vst [vmem:[#allocation86_spill] sm:$0xff] %v5188_v56  ;;  %v357_v3 = vpop.f32.mrb[12].mxu1  ;;  %v5192_v1 = vadd.f32 %v246_v50, %v91_v4  ;;  %v209_v50 = vadd.f32 %v5131_v30, %v87_v5 }
 0x128   :  { %7189 = vst [vmem:[#allocation87_spill] sm:$0xff] %v5190_v55  ;;  %v5194_v11 = vadd.f32 %v357_v3, %v95_v2  ;;  %v359_v54 = vpop.f32.mrb[13].mxu1  ;;  %v322_v3 = vadd.f32 %v5137_v6, %v95_v2 }
 0x129   :  { %7190 = vst [vmem:[#allocation88_spill] sm:$0xff] %v5192_v1  ;;  %v5196_v61 = vadd.f32 %v359_v54, %v99_v62  ;;  %v250_v63 = vpop.f32.mrb[14].mxu0  ;;  %v211_v1 = vadd.f32 %v5135_v0, %v91_v4  ;;  %v324_v54 = vadd.f32 %v5140_v26, %v99_v62 }
 0x12a   :  { %7191 = vst [vmem:[#allocation89_spill] sm:$0xff] %v5194_v11  ;;  %v5198_v7 = vadd.f32 %v250_v63, %v87_v5  ;;  %v252_v60 = vpop.f32.mrb[15].mxu0 }
 0x12b   :  { %7192 = vst [vmem:[#allocation90_spill] sm:$0xff] %v5196_v61  ;;  %v363_v58 = vpop.f32.mrb[14].mxu1  ;;  %v5200_v57 = vadd.f32 %v252_v60, %v91_v4 }
 0x12c   :  { %7193 = vst [vmem:[#allocation91_spill] sm:$0xff] %v5198_v7  ;;  %v5202_v15 = vadd.f32 %v363_v58, %v95_v2  ;;  %v365_v40 = vpop.f32.mrb[15].mxu1 }
 0x12d   :  { %7194 = vst [vmem:[#allocation92_spill] sm:$0xff] %v5200_v57  ;;  %v5204_v55 = vadd.f32 %v365_v40, %v99_v62 }
 0x12e   :  { %7195 = vst [vmem:[#allocation93_spill] sm:$0xff] %v5202_v15 }
 0x12f   :  { %7196 = vst [vmem:[#allocation94_spill] sm:$0xff] %v5204_v55 }
 0x14e   :  { %v958_v61 = vpop.f32.mrb[20].mxu0 }
 0x14f   :  { %v999_v63 = vpop.f32.mrb[20].mxu1  ;;  %v1006_v7 = vadd.f32 %v958_v61, %v209_v50  ;;  %v960_v56 = vpop.f32.mrb[21].mxu0 }
 0x150   :  { %v1008_v11 = vadd.f32 %v999_v63, %v322_v3  ;;  %v1001_v60 = vpop.f32.mrb[21].mxu1  ;;  %v1007_v57 = vadd.f32 %v960_v56, %v211_v1  ;;  %v962_v15 = vpop.f32.mrb[22].mxu0 }
 0x151   :  { %v1009_v58 = vadd.f32 %v1001_v60, %v324_v54  ;;  %v1003_v59 = vpop.f32.mrb[22].mxu1  ;;  %v3646_v40 = vmul.f32 -1.442695, %v1006_v7  ;;  %v963_v55 = vpop.f32.mrb[23].mxu0 }
 0x152   :  { %v1004_v53 = vpop.f32.mrb[23].mxu1  ;;  %v3647_v5 = vmul.f32 -1.442695, %v1007_v57 }
 0x153   :  { %4054 = vpow2.f32 %v3646_v40  ;;  %v3648_v2 = vmul.f32 -1.442695, %v1009_v58 }
 0x154   :  { %4056 = vpow2.f32 %v3647_v5  ;;  %v7202_v5 = vld [vmem:[#allocation10_spill] sm:$0xff] }
 0x155   :  { %4058 = vpow2.f32 %v3648_v2  ;;  %v7203_v2 = vld [vmem:[#allocation11_spill] sm:$0xff] }
 0x156   :  { %4060 = vtanh.f32 %v1008_v11 }
 0x15d   :  { %v4055_v0 = vpop.eup %4054 }
 0x15e   :  { %v4057_v4 = vpop.eup %4056  ;;  %v1016_v62 = vadd.f32 1.0, %v4055_v0  ;;  %v7204_v0 = vld [vmem:[#allocation12_spill] sm:$0xff] }
 0x15f   :  { %v1017_v30 = vadd.f32 1.0, %v4057_v4  ;;  %v4059_v6 = vpop.eup %4058  ;;  %v7205_v4 = vld [vmem:[#allocation13_spill] sm:$0xff] }
 0x160   :  { %4062 = vrcp.f32 %v1016_v62  ;;  %v4061_v26 = vpop.eup %4060  ;;  %v1026_v61 = vadd.f32 1.0, %v4059_v6  ;;  %v7210_v62 = vld [vmem:[#allocation18_spill] sm:$0xff]  ;;  %v7213_v6 = vld [vmem:[#allocation21_spill] sm:$0xff] }
 0x161   :  { %4064 = vrcp.f32 %v1017_v30  ;;  %v7211_v30 = vld [vmem:[#allocation19_spill] sm:$0xff] }
 0x162   :  { %4066 = vrcp.f32 %v1026_v61  ;;  %v7218_v61 = vld [vmem:[#allocation26_spill] sm:$0xff] }
 0x16a   :  { %v4063_v56 = vpop.eup %4062 }
 0x16b   :  { %v4065_v1 = vpop.eup %4064  ;;  %v1030_v59 = vmul.f32 %v4063_v56, %v4061_v26  ;;  %v7214_v26 = vld [vmem:[#allocation22_spill] sm:$0xff]  ;;  %v7215_v56 = vld [vmem:[#allocation23_spill] sm:$0xff] }
 0x16c   :  { %v1029_v55 = vmul.f32 0.0, %v4065_v1  ;;  %v4067_v57 = vpop.eup %4066  ;;  %v7216_v1 = vld [vmem:[#allocation24_spill] sm:$0xff] }
 0x16e   :  { %v5210_v53 = vadd.f32 %v1030_v59, %v1029_v55  ;;  %v7217_v59 = vld [vmem:[#allocation25_spill] sm:$0xff]  ;;  %v7219_v55 = vld [vmem:[#allocation27_spill] sm:$0xff] }
 0x170   :  { %4068 = vtanh.f32 %v5210_v53 }
 0x17a   :  { %v4069_v7 = vpop.eup %4068 }
 0x17b   :  { %v1033_v15 = vmul.f32 %v4069_v7, %v4067_v57  ;;  %v7220_v57 = vld [vmem:[#allocation28_spill] sm:$0xff]  ;;  %v7221_v7 = vld [vmem:[#allocation29_spill] sm:$0xff] }
 0x17d   :  { %v5213_v50 = vpack.c.bf16 %v1033_v15, %v1033_v15  ;;  %v7222_v15 = vld [vmem:[#allocation30_spill] sm:$0xff] }
 0x17f   :  { %1228 = vmatmul.mubr.bf16.vlgmr.msra.gmra.mrb[16].mxu0 %v5213_v50  ;;  %1269 = vmatmul.mubr.bf16.vlgmr.msra.gmra.mrb[16].mxu1 %v5213_v50 }
 0x180   :  { %1311 = vmatpush1.bf16.msra.mxu0 %v4682_v8  ;;  %1352 = vmatpush1.bf16.msra.mxu1 %v4684_v9  ;;  %v496_v8 = vld [vmem:[%s6736_s6] sm:$0xf]  ;;  %v7197_v9 = vsub.s32 0, %v5125_v35 }
 0x181   :  { %1312 = vmatprep.subr.bf16.mxu0 %v4688_v10  ;;  %1353 = vmatprep.subr.bf16.mxu1 %v4695_v12  ;;  %v7199_v12 = vsub.s32 1, %v5125_v35 }
 0x182   :  { %1342 = vmatprep.mubr.bf16.mxu0 %v7136_v20  ;;  %1383 = vmatprep.mubr.bf16.mxu1 %v7136_v20  ;;  %v5256_v10 = vrot.slane %v496_v8, %v7197_v9  ;;  %v7224_v9 = vld [vmem:[#allocation32_spill] sm:$0xff] }
 0x184   :  { %1313 = vmatpush1.bf16.msra.mxu0 %v4697_v13  ;;  %1354 = vmatpush1.bf16.msra.mxu1 %v4701_v14  ;;  %7198 = vst [vmem:[#allocation95_spill] sm:$0xff] %v5256_v10  ;;  %v5260_v13 = vrot.slane %v496_v8, %v7199_v12  ;;  %v7225_v12 = vld [vmem:[#allocation33_spill] sm:$0xff] }
 0x185   :  { %1314 = vmatprep.subr.bf16.mxu0 %v4710_v16  ;;  %1355 = vmatprep.subr.bf16.mxu1 %v4712_v17 }
 0x188   :  { %1315 = vmatpush1.bf16.msra.mxu0 %v4716_v18  ;;  %1356 = vmatpush1.bf16.msra.mxu1 %v4720_v19 }
 0x189   :  { %1316 = vmatprep.subr.bf16.mxu0 %v4729_v21  ;;  %1357 = vmatprep.subr.bf16.mxu1 %v4733_v22 }
 0x18c   :  { %1317 = vmatpush1.bf16.msra.mxu0 %v4737_v23  ;;  %1358 = vmatpush1.bf16.msra.mxu1 %v4739_v24 }
 0x18d   :  { %1318 = vmatprep.subr.bf16.mxu0 %v4745_v25  ;;  %1359 = vmatprep.subr.bf16.mxu1 %v4752_v27 }
 0x190   :  { %1319 = vmatpush1.bf16.msra.mxu0 %v4754_v28  ;;  %1360 = vmatpush1.bf16.msra.mxu1 %v4758_v29  ;;  %v7200_v29 = vsub.s32 3, %v5125_v35 }
 0x191   :  { %1320 = vmatprep.subr.bf16.mxu0 %v4767_v31  ;;  %1361 = vmatprep.subr.bf16.mxu1 %v4769_v32 }
 0x192   :  { %v5266_v31 = vrot.slane %v496_v8, %v7200_v29  ;;  %v7239_v29 = vld [vmem:[#allocation47_spill] sm:$0xff] }
 0x194   :  { %1321 = vmatpush1.bf16.msra.mxu0 %v4773_v33  ;;  %1362 = vmatpush1.bf16.msra.mxu1 %v4777_v34  ;;  %v7201_v33 = vsub.s32 2, %v5125_v35 }
 0x195   :  { %1322 = vmatprep.subr.bf16.mxu0 %v4786_v36  ;;  %1363 = vmatprep.subr.bf16.mxu1 %v4790_v37 }
 0x196   :  { %v5271_v34 = vrot.slane %v496_v8, %v7201_v33  ;;  %v7223_v8 = vld [vmem:[#allocation31_spill] sm:$0xff]  ;;  %v7241_v33 = vld [vmem:[#allocation49_spill] sm:$0xff] }
 0x198   :  { %1323 = vmatpush1.bf16.msra.mxu0 %v4792_v38  ;;  %1364 = vmatpush1.bf16.msra.mxu1 %v4796_v39 }
 0x199   :  { %1324 = vmatprep.subr.bf16.mxu0 %v4805_v41  ;;  %1365 = vmatprep.subr.bf16.mxu1 %v4807_v42 }
 0x19c   :  { %1325 = vmatpush1.bf16.msra.mxu0 %v4811_v43  ;;  %1366 = vmatpush1.bf16.msra.mxu1 %v4815_v44 }
 0x19d   :  { %1392 = vmatprep.subr.bf16.mxu0 %v4819_v45  ;;  %1433 = vmatprep.subr.bf16.mxu1 %v4823_v46 }
 0x252   :  { %v1229_v14 = vpop.f32.mrb[16].mxu0  ;;  %v1270_v16 = vpop.f32.mrb[16].mxu1 }
 0x253   :  { %v3803_v17 = vadd.f32 %v1229_v14, %v5256_v10  ;;  %v1231_v18 = vpop.f32.mrb[17].mxu0  ;;  %v1272_v19 = vpop.f32.mrb[17].mxu1  ;;  %v3805_v37 = vadd.f32 %v1270_v16, %v5271_v34  ;;  %v7226_v14 = vld [vmem:[#allocation34_spill] sm:$0xff]  ;;  %v7227_v16 = vld [vmem:[#allocation35_spill] sm:$0xff] }
 0x254   :  { %v3804_v21 = vadd.f32 %v1231_v18, %v5260_v13  ;;  %v1233_v22 = vpop.f32.mrb[18].mxu0  ;;  %v1274_v23 = vpop.f32.mrb[18].mxu1  ;;  %v3806_v32 = vadd.f32 %v1272_v19, %v5266_v31  ;;  %v7229_v18 = vld [vmem:[#allocation37_spill] sm:$0xff]  ;;  %v7230_v19 = vld [vmem:[#allocation38_spill] sm:$0xff] }
 0x255   :  { %v3681_v24 = vmul.f32 -1.442695, %v3803_v17  ;;  %v1234_v25 = vpop.f32.mrb[19].mxu0  ;;  %v1275_v27 = vpop.f32.mrb[19].mxu1  ;;  %v7228_v17 = vld [vmem:[#allocation36_spill] sm:$0xff]  ;;  %v7233_v23 = vld [vmem:[#allocation41_spill] sm:$0xff] }
 0x256   :  { %v3682_v28 = vmul.f32 -1.442695, %v3804_v21  ;;  %v3683_v36 = vmul.f32 -1.442695, %v3806_v32  ;;  %v7231_v21 = vld [vmem:[#allocation39_spill] sm:$0xff]  ;;  %v7232_v22 = vld [vmem:[#allocation40_spill] sm:$0xff] }
 0x257   :  { %4070 = vpow2.f32 %v3681_v24  ;;  %v7234_v24 = vld [vmem:[#allocation42_spill] sm:$0xff]  ;;  %v7235_v25 = vld [vmem:[#allocation43_spill] sm:$0xff]  ;;  %v7236_v27 = vld [vmem:[#allocation44_spill] sm:$0xff] }
 0x258   :  { %4072 = vpow2.f32 %v3682_v28  ;;  %v7238_v28 = vld [vmem:[#allocation46_spill] sm:$0xff]  ;;  %v7240_v32 = vld [vmem:[#allocation48_spill] sm:$0xff] }
 0x259   :  { %4074 = vpow2.f32 %v3683_v36  ;;  %v7242_v36 = vld [vmem:[#allocation50_spill] sm:$0xff] }
 0x25a   :  { %4076 = vtanh.f32 %v3805_v37  ;;  %v7243_v37 = vld [vmem:[#allocation51_spill] sm:$0xff] }
 0x261   :  { %v4071_v38 = vpop.eup %4070 }
 0x262   :  { %v4073_v39 = vpop.eup %4072  ;;  %v1287_v41 = vadd.f32 1.0, %v4071_v38  ;;  %v7244_v38 = vld [vmem:[#allocation52_spill] sm:$0xff] }
 0x263   :  { %v1288_v42 = vadd.f32 1.0, %v4073_v39  ;;  %v4075_v43 = vpop.eup %4074  ;;  %v7245_v39 = vld [vmem:[#allocation53_spill] sm:$0xff] }
 0x264   :  { %4078 = vrcp.f32 %v1287_v41  ;;  %v4077_v44 = vpop.eup %4076  ;;  %v1297_v3 = vadd.f32 1.0, %v4075_v43  ;;  %v7246_v41 = vld [vmem:[#allocation54_spill] sm:$0xff]  ;;  %v7248_v43 = vld [vmem:[#allocation56_spill] sm:$0xff] }
 0x265   :  { %4080 = vrcp.f32 %v1288_v42  ;;  %v7247_v42 = vld [vmem:[#allocation55_spill] sm:$0xff] }
 0x266   :  { %4082 = vrcp.f32 %v1297_v3  ;;  %v7253_v3 = vld [vmem:[#allocation61_spill] sm:$0xff] }
 0x26e   :  { %v4079_v45 = vpop.eup %4078 }
 0x26f   :  { %v4081_v46 = vpop.eup %4080  ;;  %v1301_v11 = vmul.f32 %v4079_v45, %v4077_v44  ;;  %v7249_v44 = vld [vmem:[#allocation57_spill] sm:$0xff]  ;;  %v7250_v45 = vld [vmem:[#allocation58_spill] sm:$0xff] }
 0x270   :  { %v1300_v35 = vmul.f32 0.0, %v4081_v46  ;;  %v4083_v63 = vpop.eup %4082  ;;  %v7251_v46 = vld [vmem:[#allocation59_spill] sm:$0xff] }
 0x272   :  { %v5274_v54 = vadd.f32 %v1301_v11, %v1300_v35  ;;  %v7252_v11 = vld [vmem:[#allocation60_spill] sm:$0xff]  ;;  %v7254_v35 = vld [vmem:[#allocation62_spill] sm:$0xff] }
 0x274   :  { %4084 = vtanh.f32 %v5274_v54 }
 0x27e   :  { %v4085_v60 = vpop.eup %4084 }
 0x27f   :  { %v1304_v58 = vmul.f32 %v4085_v60, %v4083_v63  ;;  %v7255_v63 = vld [vmem:[#allocation63_spill] sm:$0xff]  ;;  %v7256_v60 = vld [vmem:[#allocation64_spill] sm:$0xff] }
 0x281   :  { %v1309_v40 = vpack.c.bf16 %v1304_v58, %v1304_v58  ;;  %v7257_v58 = vld [vmem:[#allocation65_spill] sm:$0xff] }
 0x283   :  { %1343 = vmatmul.mubr.bf16.vlgmr.msra.gmra.mrb[24].mxu0 %v1309_v40  ;;  %1384 = vmatmul.mubr.bf16.vlgmr.msra.gmra.mrb[24].mxu1 %v1309_v40  ;;  %v7258_v40 = vld [vmem:[#allocation66_spill] sm:$0xff] }
 0x284   :  { %1393 = vmatpush1.bf16.msra.mxu0 %v4827_v47  ;;  %1434 = vmatpush1.bf16.msra.mxu1 %v4829_v48  ;;  %v7206_v47 = vld [vmem:[#allocation14_spill] sm:$0xff]  ;;  %v7207_v48 = vld [vmem:[#allocation15_spill] sm:$0xff] }
 0x285   :  { %1394 = vmatprep.subr.bf16.mxu0 %v4833_v49  ;;  %1435 = vmatprep.subr.bf16.mxu1 %v4837_v51  ;;  %v7208_v49 = vld [vmem:[#allocation16_spill] sm:$0xff]  ;;  %v7209_v51 = vld [vmem:[#allocation17_spill] sm:$0xff] }
 0x286   :  { %1424 = vmatprep.mubr.bf16.mxu0 %v7136_v20  ;;  %1465 = vmatprep.mubr.bf16.mxu1 %v7136_v20 }
 0x288   :  { %1395 = vmatpush1.bf16.msra.mxu0 %v4843_v52  ;;  %1436 = vmatpush1.bf16.msra.mxu1 %v7202_v5  ;;  %v7212_v52 = vld [vmem:[#allocation20_spill] sm:$0xff] }
 0x289   :  { %1396 = vmatprep.subr.bf16.mxu0 %v7203_v2  ;;  %1437 = vmatprep.subr.bf16.mxu1 %v7204_v0  ;;  %v5345_v5 = vld [vmem:[#allocation7 + $0x4] ss:$16 sps:$4 sm:$0xff]   ;;  %v5348_v2 = vld [vmem:[#allocation7 + $0xc] ss:$16 sps:$4 sm:$0xff]  }
 0x28a   :  { %7259 = vst [vmem:[#allocation10_spill] sm:$0xff] %v5345_v5  ;;  %7260 = vst [vmem:[#allocation11_spill] sm:$0xff] %v5348_v2 }
 0x28c   :  { %1397 = vmatpush1.bf16.msra.mxu0 %v7205_v4  ;;  %1438 = vmatpush1.bf16.msra.mxu1 %v7206_v47  ;;  %v7261_v47 = vld [vmem:[#allocation67_spill] sm:$0xff] }
 0x28d   :  { %1398 = vmatprep.subr.bf16.mxu0 %v7207_v48  ;;  %1439 = vmatprep.subr.bf16.mxu1 %v7208_v49  ;;  %v7262_v49 = vld [vmem:[#allocation69_spill] sm:$0xff] }
 0x290   :  { %1399 = vmatpush1.bf16.msra.mxu0 %v7209_v51  ;;  %1440 = vmatpush1.bf16.msra.mxu1 %v7210_v62 }
 0x291   :  { %1400 = vmatprep.subr.bf16.mxu0 %v7211_v30  ;;  %1441 = vmatprep.subr.bf16.mxu1 %v7212_v52  ;;  %v7263_v52 = vld [vmem:[#allocation68_spill] sm:$0xff] }
 0x294   :  { %1401 = vmatpush1.bf16.msra.mxu0 %v7213_v6  ;;  %1442 = vmatpush1.bf16.msra.mxu1 %v7214_v26  ;;  %v7264_v26 = vld [vmem:[#allocation70_spill] sm:$0xff] }
 0x295   :  { %1402 = vmatprep.subr.bf16.mxu0 %v7215_v56  ;;  %1443 = vmatprep.subr.bf16.mxu1 %v7216_v1 }
 0x298   :  { %1403 = vmatpush1.bf16.msra.mxu0 %v7217_v59  ;;  %1444 = vmatpush1.bf16.msra.mxu1 %v7218_v61 }
 0x299   :  { %1404 = vmatprep.subr.bf16.mxu0 %v7219_v55  ;;  %1445 = vmatprep.subr.bf16.mxu1 %v7220_v57 }
 0x29c   :  { %1405 = vmatpush1.bf16.msra.mxu0 %v7221_v7  ;;  %1446 = vmatpush1.bf16.msra.mxu1 %v7222_v15 }
 0x29d   :  { %1406 = vmatprep.subr.bf16.mxu0 %v7223_v8  ;;  %1447 = vmatprep.subr.bf16.mxu1 %v7224_v9 }
 0x2a0   :  { %1407 = vmatpush1.bf16.msra.mxu0 %v7225_v12  ;;  %1448 = vmatpush1.bf16.msra.mxu1 %v7226_v14 }
 0x2a1   :  { %1503 = vmatprep.subr.bf16.mxu0 %v7227_v16  ;;  %1544 = vmatprep.subr.bf16.mxu1 %v7228_v17 }
 0x2a3   :  { %1425 = vmatmul.mubr.bf16.vlgmr.msra.gmra.mrb[28].mxu0 %v5213_v50  ;;  %1466 = vmatmul.mubr.bf16.vlgmr.msra.gmra.mrb[28].mxu1 %v5213_v50  ;;  %v7237_v50 = vld [vmem:[#allocation45_spill] sm:$0xff] }
 0x2a4   :  { %1504 = vmatpush1.bf16.msra.mxu0 %v7229_v18  ;;  %1545 = vmatpush1.bf16.msra.mxu1 %v7230_v19 }
 0x2a5   :  { %1505 = vmatprep.subr.bf16.mxu0 %v7231_v21  ;;  %1546 = vmatprep.subr.bf16.mxu1 %v7232_v22 }
 0x2a6   :  { %1535 = vmatprep.mubr.bf16.mxu0 %v7136_v20  ;;  %1576 = vmatprep.mubr.bf16.mxu1 %v7136_v20 }
 0x2a8   :  { %1506 = vmatpush1.bf16.msra.mxu0 %v7233_v23  ;;  %1547 = vmatpush1.bf16.msra.mxu1 %v7234_v24 }
 0x2a9   :  { %1507 = vmatprep.subr.bf16.mxu0 %v7235_v25  ;;  %1548 = vmatprep.subr.bf16.mxu1 %v7236_v27 }
 0x2ac   :  { %1508 = vmatpush1.bf16.msra.mxu0 %v7237_v50  ;;  %1549 = vmatpush1.bf16.msra.mxu1 %v7238_v28 }
 0x2ad   :  { %1509 = vmatprep.subr.bf16.mxu0 %v7239_v29  ;;  %1550 = vmatprep.subr.bf16.mxu1 %v7240_v32 }
 0x2b0   :  { %1510 = vmatpush1.bf16.msra.mxu0 %v7241_v33  ;;  %1551 = vmatpush1.bf16.msra.mxu1 %v7242_v36 }
 0x2b1   :  { %1511 = vmatprep.subr.bf16.mxu0 %v7243_v37  ;;  %1552 = vmatprep.subr.bf16.mxu1 %v7244_v38 }
 0x2b4   :  { %1512 = vmatpush1.bf16.msra.mxu0 %v7245_v39  ;;  %1553 = vmatpush1.bf16.msra.mxu1 %v7246_v41 }
 0x2b5   :  { %1513 = vmatprep.subr.bf16.mxu0 %v7247_v42  ;;  %1554 = vmatprep.subr.bf16.mxu1 %v7248_v43 }
 0x2b8   :  { %1514 = vmatpush1.bf16.msra.mxu0 %v7249_v44  ;;  %1555 = vmatpush1.bf16.msra.mxu1 %v7250_v45 }
 0x2b9   :  { %1515 = vmatprep.subr.bf16.mxu0 %v7251_v46  ;;  %1556 = vmatprep.subr.bf16.mxu1 %v7252_v11 }
 0x2bc   :  { %1516 = vmatpush1.bf16.msra.mxu0 %v7253_v3  ;;  %1557 = vmatpush1.bf16.msra.mxu1 %v7254_v35 }
 0x2bd   :  { %1517 = vmatprep.subr.bf16.mxu0 %v7255_v63  ;;  %1558 = vmatprep.subr.bf16.mxu1 %v7256_v60 }
 0x2c0   :  { %1518 = vmatpush1.bf16.msra.mxu0 %v7257_v58  ;;  %1559 = vmatpush1.bf16.msra.mxu1 %v7258_v40 }
 0x2c1   :  { %1618 = vmatprep.subr.bf16.mxu0 %v5345_v5  ;;  %1659 = vmatprep.subr.bf16.mxu1 %v5348_v2 }
 0x376   :  { %v1426_v0 = vpop.f32.mrb[28].mxu0  ;;  %v1467_v4 = vpop.f32.mrb[28].mxu1 }
 0x377   :  { %v1474_v48 = vadd.f32 %v1426_v0, %v7261_v47  ;;  %v1476_v51 = vadd.f32 %v1467_v4, %v7262_v49  ;;  %v1428_v62 = vpop.f32.mrb[29].mxu0  ;;  %v1469_v30 = vpop.f32.mrb[29].mxu1 }
 0x378   :  { %v1475_v6 = vadd.f32 %v1428_v62, %v7263_v52  ;;  %v1477_v56 = vadd.f32 %v1469_v30, %v7264_v26  ;;  %v1430_v1 = vpop.f32.mrb[30].mxu0  ;;  %v1471_v40 = vpop.f32.mrb[30].mxu1  ;;  %v5372_v52 = vld [vmem:[#allocation7 + $0x2c] ss:$16 sps:$4 sm:$0xff]   ;;  %v5380_v26 = vld [vmem:[#allocation7 + $0x28] ss:$16 sps:$4 sm:$0xff]  }
 0x379   :  { %v3684_v58 = vmul.f32 -1.442695, %v1474_v48  ;;  %v1431_v5 = vpop.f32.mrb[31].mxu0  ;;  %v1472_v60 = vpop.f32.mrb[31].mxu1  ;;  %7265 = vst [vmem:[#allocation12_spill] sm:$0xff] %v5372_v52  ;;  %7267 = vst [vmem:[#allocation14_spill] sm:$0xff] %v5380_v26 }
 0x37a   :  { %v3685_v63 = vmul.f32 -1.442695, %v1475_v6  ;;  %v3686_v2 = vmul.f32 -1.442695, %v1477_v56  ;;  %v5377_v6 = vld [vmem:[#allocation7 + $0x20] ss:$16 sps:$4 sm:$0xff]  }
 0x37b   :  { %4086 = vpow2.f32 %v3684_v58  ;;  %7266 = vst [vmem:[#allocation13_spill] sm:$0xff] %v5377_v6  ;;  %v5383_v56 = vld [vmem:[#allocation7 + $0x44] ss:$16 sps:$4 sm:$0xff]   ;;  %v5386_v1 = vld [vmem:[#allocation7 + $0x4c] ss:$16 sps:$4 sm:$0xff]  }
 0x37c   :  { %4088 = vpow2.f32 %v3685_v63  ;;  %7268 = vst [vmem:[#allocation15_spill] sm:$0xff] %v5383_v56  ;;  %7269 = vst [vmem:[#allocation16_spill] sm:$0xff] %v5386_v1 }
 0x37d   :  { %4090 = vpow2.f32 %v3686_v2 }
 0x37e   :  { %4092 = vtanh.f32 %v1476_v51  ;;  %v5366_v51 = vld [vmem:[#allocation7 + $0x8] ss:$16 sps:$4 sm:$0xff]  }
 0x385   :  { %v4087_v35 = vpop.eup %4086 }
 0x386   :  { %v4089_v3 = vpop.eup %4088  ;;  %v1484_v0 = vadd.f32 1.0, %v4087_v35 }
 0x387   :  { %v1485_v4 = vadd.f32 1.0, %v4089_v3  ;;  %v4091_v47 = vpop.eup %4090  ;;  %v5363_v3 = vld [vmem:[#allocation7] ss:$16 sps:$4 sm:$0xff]  }
 0x388   :  { %4094 = vrcp.f32 %v1484_v0  ;;  %v4093_v49 = vpop.eup %4092  ;;  %v1494_v48 = vadd.f32 1.0, %v4091_v47  ;;  %v5389_v0 = vld [vmem:[#allocation7 + $0x40] ss:$16 sps:$4 sm:$0xff]   ;;  %v5395_v47 = vld [vmem:[#allocation7 + $0x64] ss:$16 sps:$4 sm:$0xff]  }
 0x389   :  { %4096 = vrcp.f32 %v1485_v4  ;;  %7270 = vst [vmem:[#allocation17_spill] sm:$0xff] %v5389_v0  ;;  %v5392_v4 = vld [vmem:[#allocation7 + $0x48] ss:$16 sps:$4 sm:$0xff]   ;;  %7272 = vst [vmem:[#allocation19_spill] sm:$0xff] %v5395_v47 }
 0x38a   :  { %4098 = vrcp.f32 %v1494_v48  ;;  %7271 = vst [vmem:[#allocation18_spill] sm:$0xff] %v5392_v4  ;;  %v5410_v48 = vld [vmem:[#allocation7 + $0x8c] ss:$16 sps:$4 sm:$0xff]  }
 0x38b   :  { %7277 = vst [vmem:[#allocation24_spill] sm:$0xff] %v5410_v48 }
 0x392   :  { %v4095_v62 = vpop.eup %4094 }
 0x393   :  { %v4097_v30 = vpop.eup %4096  ;;  %v1498_v40 = vmul.f32 %v4095_v62, %v4093_v49  ;;  %v5398_v49 = vld [vmem:[#allocation7 + $0x6c] ss:$16 sps:$4 sm:$0xff]   ;;  %v5401_v62 = vld [vmem:[#allocation7 + $0x60] ss:$16 sps:$4 sm:$0xff]  }
 0x394   :  { %v1497_v60 = vmul.f32 %v4097_v30, %v5210_v53  ;;  %v4099_v63 = vpop.eup %4098  ;;  %v5369_v53 = vld [vmem:[#allocation7 + $0x24] ss:$16 sps:$4 sm:$0xff]   ;;  %7273 = vst [vmem:[#allocation20_spill] sm:$0xff] %v5398_v49  ;;  %7274 = vst [vmem:[#allocation21_spill] sm:$0xff] %v5401_v62  ;;  %v5404_v30 = vld [vmem:[#allocation7 + $0x68] ss:$16 sps:$4 sm:$0xff]  }
 0x395   :  { %7275 = vst [vmem:[#allocation22_spill] sm:$0xff] %v5404_v30 }
 0x396   :  { %v5356_v5 = vadd.f32 %v1498_v40, %v1497_v60  ;;  %v5407_v40 = vld [vmem:[#allocation7 + $0x84] ss:$16 sps:$4 sm:$0xff]   ;;  %v5413_v60 = vld [vmem:[#allocation7 + $0x80] ss:$16 sps:$4 sm:$0xff]  }
 0x397   :  { %7276 = vst [vmem:[#allocation23_spill] sm:$0xff] %v5407_v40  ;;  %7278 = vst [vmem:[#allocation25_spill] sm:$0xff] %v5413_v60 }
 0x398   :  { %4100 = vtanh.f32 %v5356_v5 }
 0x3a2   :  { %v4101_v35 = vpop.eup %4100 }
 0x3a3   :  { %v1501_v58 = vmul.f32 %v4101_v35, %v4099_v63  ;;  %v5416_v63 = vld [vmem:[#allocation7 + $0x88] ss:$16 sps:$4 sm:$0xff]   ;;  %v5419_v35 = vld [vmem:[#allocation7 + $0xa4] ss:$16 sps:$4 sm:$0xff]  }
 0x3a4   :  { %7279 = vst [vmem:[#allocation26_spill] sm:$0xff] %v5416_v63  ;;  %7280 = vst [vmem:[#allocation27_spill] sm:$0xff] %v5419_v35 }
 0x3a5   :  { %v5359_v2 = vpack.c.bf16 %v1501_v58, %v1501_v58  ;;  %v5422_v58 = vld [vmem:[#allocation7 + $0xac] ss:$16 sps:$4 sm:$0xff]  }
 0x3a6   :  { %7281 = vst [vmem:[#allocation28_spill] sm:$0xff] %v5422_v58 }
 0x3a7   :  { %1536 = vmatmul.mubr.bf16.vlgmr.msra.gmra.mrb[24].mxu0 %v5359_v2  ;;  %1577 = vmatmul.mubr.bf16.vlgmr.msra.gmra.mrb[24].mxu1 %v5359_v2 }
 0x3a8   :  { %1619 = vmatpush1.bf16.msra.mxu0 %v5363_v3  ;;  %1660 = vmatpush1.bf16.msra.mxu1 %v5366_v51 }
 0x3a9   :  { %1620 = vmatprep.subr.bf16.mxu0 %v5369_v53  ;;  %1661 = vmatprep.subr.bf16.mxu1 %v5372_v52 }
 0x3aa   :  { %1650 = vmatprep.mubr.bf16.mxu0 %v7136_v20  ;;  %1691 = vmatprep.mubr.bf16.mxu1 %v7136_v20 }
 0x3ac   :  { %1621 = vmatpush1.bf16.msra.mxu0 %v5377_v6  ;;  %1662 = vmatpush1.bf16.msra.mxu1 %v5380_v26 }
 0x3ad   :  { %1622 = vmatprep.subr.bf16.mxu0 %v5383_v56  ;;  %1663 = vmatprep.subr.bf16.mxu1 %v5386_v1 }
 0x3b0   :  { %1623 = vmatpush1.bf16.msra.mxu0 %v5389_v0  ;;  %1664 = vmatpush1.bf16.msra.mxu1 %v5392_v4 }
 0x3b1   :  { %1624 = vmatprep.subr.bf16.mxu0 %v5395_v47  ;;  %1665 = vmatprep.subr.bf16.mxu1 %v5398_v49 }
 0x3b4   :  { %1625 = vmatpush1.bf16.msra.mxu0 %v5401_v62  ;;  %1666 = vmatpush1.bf16.msra.mxu1 %v5404_v30 }
 0x3b5   :  { %1626 = vmatprep.subr.bf16.mxu0 %v5407_v40  ;;  %1667 = vmatprep.subr.bf16.mxu1 %v5410_v48  ;;  %v5425_v40 = vld [vmem:[#allocation7 + $0xa0] ss:$16 sps:$4 sm:$0xff]   ;;  %v5428_v48 = vld [vmem:[#allocation7 + $0xa8] ss:$16 sps:$4 sm:$0xff]  }
 0x3b6   :  { %7282 = vst [vmem:[#allocation29_spill] sm:$0xff] %v5425_v40  ;;  %7283 = vst [vmem:[#allocation30_spill] sm:$0xff] %v5428_v48 }
 0x3b8   :  { %1627 = vmatpush1.bf16.msra.mxu0 %v5413_v60  ;;  %1668 = vmatpush1.bf16.msra.mxu1 %v5416_v63  ;;  %v5431_v60 = vld [vmem:[#allocation7 + $0xc4] ss:$16 sps:$4 sm:$0xff]   ;;  %v5434_v63 = vld [vmem:[#allocation7 + $0xcc] ss:$16 sps:$4 sm:$0xff]  }
 0x3b9   :  { %1628 = vmatprep.subr.bf16.mxu0 %v5419_v35  ;;  %1669 = vmatprep.subr.bf16.mxu1 %v5422_v58  ;;  %7284 = vst [vmem:[#allocation31_spill] sm:$0xff] %v5431_v60  ;;  %7285 = vst [vmem:[#allocation32_spill] sm:$0xff] %v5434_v63  ;;  %v5437_v35 = vld [vmem:[#allocation7 + $0xc0] ss:$16 sps:$4 sm:$0xff]   ;;  %v5440_v58 = vld [vmem:[#allocation7 + $0xc8] ss:$16 sps:$4 sm:$0xff]  }
 0x3ba   :  { %7286 = vst [vmem:[#allocation33_spill] sm:$0xff] %v5437_v35  ;;  %7287 = vst [vmem:[#allocation34_spill] sm:$0xff] %v5440_v58 }
 0x3bc   :  { %1629 = vmatpush1.bf16.msra.mxu0 %v5425_v40  ;;  %1670 = vmatpush1.bf16.msra.mxu1 %v5428_v48  ;;  %v5443_v40 = vld [vmem:[#allocation7 + $0xe4] ss:$16 sps:$4 sm:$0xff]   ;;  %v5446_v48 = vld [vmem:[#allocation7 + $0xec] ss:$16 sps:$4 sm:$0xff]  }
 0x3bd   :  { %1630 = vmatprep.subr.bf16.mxu0 %v5431_v60  ;;  %1671 = vmatprep.subr.bf16.mxu1 %v5434_v63  ;;  %7288 = vst [vmem:[#allocation35_spill] sm:$0xff] %v5443_v40  ;;  %7289 = vst [vmem:[#allocation36_spill] sm:$0xff] %v5446_v48  ;;  %v5449_v60 = vld [vmem:[#allocation7 + $0xe0] ss:$16 sps:$4 sm:$0xff]   ;;  %v5452_v63 = vld [vmem:[#allocation7 + $0xe8] ss:$16 sps:$4 sm:$0xff]  }
 0x3be   :  { %7290 = vst [vmem:[#allocation37_spill] sm:$0xff] %v5449_v60  ;;  %7291 = vst [vmem:[#allocation38_spill] sm:$0xff] %v5452_v63 }
 0x3c0   :  { %1631 = vmatpush1.bf16.msra.mxu0 %v5437_v35  ;;  %1672 = vmatpush1.bf16.msra.mxu1 %v5440_v58  ;;  %v5455_v35 = vld [vmem:[#allocation5 + $0x4] ss:$16 sps:$4 sm:$0xff]   ;;  %v5458_v58 = vld [vmem:[#allocation5 + $0xc] ss:$16 sps:$4 sm:$0xff]  }
 0x3c1   :  { %1632 = vmatprep.subr.bf16.mxu0 %v5443_v40  ;;  %1673 = vmatprep.subr.bf16.mxu1 %v5446_v48  ;;  %7292 = vst [vmem:[#allocation39_spill] sm:$0xff] %v5455_v35  ;;  %7293 = vst [vmem:[#allocation40_spill] sm:$0xff] %v5458_v58 }
 0x3c4   :  { %1633 = vmatpush1.bf16.msra.mxu0 %v5449_v60  ;;  %1674 = vmatpush1.bf16.msra.mxu1 %v5452_v63 }
 0x3c5   :  { %1700 = vmatprep.subr.bf16.mxu0 %v5455_v35  ;;  %1741 = vmatprep.subr.bf16.mxu1 %v5458_v58 }
 0x47a   :  { %v1537_v40 = vpop.f32.mrb[24].mxu0  ;;  %v1578_v30 = vpop.f32.mrb[24].mxu1 }
 0x47b   :  { %v3807_v48 = vadd.f32 %v1537_v40, %v5256_v10  ;;  %v1539_v62 = vpop.f32.mrb[25].mxu0  ;;  %v1580_v49 = vpop.f32.mrb[25].mxu1  ;;  %v3809_v58 = vadd.f32 %v1578_v30, %v5271_v34 }
 0x47c   :  { %v3808_v60 = vadd.f32 %v1539_v62, %v5260_v13  ;;  %v1541_v47 = vpop.f32.mrb[26].mxu0  ;;  %v1582_v4 = vpop.f32.mrb[26].mxu1  ;;  %v3810_v35 = vadd.f32 %v1580_v49, %v5266_v31 }
 0x47d   :  { %v3687_v0 = vmul.f32 -1.442695, %v3807_v48  ;;  %v1542_v63 = vpop.f32.mrb[27].mxu0  ;;  %v1583_v1 = vpop.f32.mrb[27].mxu1 }
 0x47e   :  { %v3688_v56 = vmul.f32 -1.442695, %v3808_v60  ;;  %v3689_v26 = vmul.f32 -1.442695, %v3810_v35  ;;  %v5478_v63 = vld [vmem:[#allocation5 + $0x2c] ss:$16 sps:$4 sm:$0xff]  }
 0x47f   :  { %4102 = vpow2.f32 %v3687_v0  ;;  %v5483_v35 = vld [vmem:[#allocation5 + $0x20] ss:$16 sps:$4 sm:$0xff]  }
 0x480   :  { %4104 = vpow2.f32 %v3688_v56 }
 0x481   :  { %4106 = vpow2.f32 %v3689_v26 }
 0x482   :  { %4108 = vtanh.f32 %v3809_v58  ;;  %v5486_v58 = vld [vmem:[#allocation5 + $0x28] ss:$16 sps:$4 sm:$0xff]  }
 0x489   :  { %v4103_v6 = vpop.eup %4102 }
 0x48a   :  { %v4105_v52 = vpop.eup %4104  ;;  %v1595_v40 = vadd.f32 1.0, %v4103_v6 }
 0x48b   :  { %v1596_v10 = vadd.f32 1.0, %v4105_v52  ;;  %v4107_v4 = vpop.eup %4106  ;;  %v5472_v52 = vld [vmem:[#allocation5 + $0x8] ss:$16 sps:$4 sm:$0xff]  }
 0x48c   :  { %4110 = vrcp.f32 %v1595_v40  ;;  %v4109_v47 = vpop.eup %4108  ;;  %v1605_v0 = vadd.f32 1.0, %v4107_v4  ;;  %v5489_v40 = vld [vmem:[#allocation5 + $0x44] ss:$16 sps:$4 sm:$0xff]   ;;  %v5492_v4 = vld [vmem:[#allocation5 + $0x4c] ss:$16 sps:$4 sm:$0xff]  }
 0x48d   :  { %4112 = vrcp.f32 %v1596_v10  ;;  %v5469_v10 = vld [vmem:[#allocation5] ss:$16 sps:$4 sm:$0xff]  }
 0x48e   :  { %4114 = vrcp.f32 %v1605_v0  ;;  %v5507_v0 = vld [vmem:[#allocation5 + $0x60] ss:$16 sps:$4 sm:$0xff]  }
 0x48f   :  { %7294 = vst [vmem:[#allocation41_spill] sm:$0xff] %v5507_v0 }
 0x496   :  { %v4111_v62 = vpop.eup %4110 }
 0x497   :  { %v4113_v1 = vpop.eup %4112  ;;  %v1609_v48 = vmul.f32 %v4111_v62, %v4109_v47  ;;  %v5495_v47 = vld [vmem:[#allocation5 + $0x40] ss:$16 sps:$4 sm:$0xff]   ;;  %v5498_v62 = vld [vmem:[#allocation5 + $0x48] ss:$16 sps:$4 sm:$0xff]  }
 0x498   :  { %v1608_v56 = vmul.f32 %v4113_v1, %v5274_v54  ;;  %v4115_v30 = vpop.eup %4114  ;;  %v5475_v54 = vld [vmem:[#allocation5 + $0x24] ss:$16 sps:$4 sm:$0xff]  }
 0x499   :  { %v5501_v1 = vld [vmem:[#allocation5 + $0x64] ss:$16 sps:$4 sm:$0xff]  }
 0x49a   :  { %v5466_v49 = vadd.f32 %v1609_v48, %v1608_v56  ;;  %v5504_v48 = vld [vmem:[#allocation5 + $0x6c] ss:$16 sps:$4 sm:$0xff]   ;;  %v5510_v56 = vld [vmem:[#allocation5 + $0x68] ss:$16 sps:$4 sm:$0xff]  }
 0x49b   :  { %7295 = vst [vmem:[#allocation42_spill] sm:$0xff] %v5510_v56 }
 0x49c   :  { %4116 = vtanh.f32 %v5466_v49 }
 0x4a6   :  { %v4117_v6 = vpop.eup %4116 }
 0x4a7   :  { %v1612_v26 = vmul.f32 %v4117_v6, %v4115_v30  ;;  %v5513_v30 = vld [vmem:[#allocation5 + $0x84] ss:$16 sps:$4 sm:$0xff]   ;;  %v5516_v6 = vld [vmem:[#allocation5 + $0x8c] ss:$16 sps:$4 sm:$0xff]  }
 0x4a9   :  { %v1617_v60 = vpack.c.bf16 %v1612_v26, %v1612_v26  ;;  %v5519_v26 = vld [vmem:[#allocation5 + $0x80] ss:$16 sps:$4 sm:$0xff]  }
 0x4ab   :  { %1651 = vmatmul.mubr.bf16.vlgmr.msra.gmra.mrb[32].mxu0 %v1617_v60  ;;  %1692 = vmatmul.mubr.bf16.vlgmr.msra.gmra.mrb[32].mxu1 %v1617_v60  ;;  %v5522_v60 = vld [vmem:[#allocation5 + $0x88] ss:$16 sps:$4 sm:$0xff]  }
 0x4ac   :  { %1701 = vmatpush1.bf16.msra.mxu0 %v5469_v10  ;;  %1742 = vmatpush1.bf16.msra.mxu1 %v5472_v52 }
 0x4ad   :  { %1702 = vmatprep.subr.bf16.mxu0 %v5475_v54  ;;  %1743 = vmatprep.subr.bf16.mxu1 %v5478_v63 }
 0x4ae   :  { %1732 = vmatprep.mubr.bf16.mxu0 %v7136_v20  ;;  %1773 = vmatprep.mubr.bf16.mxu1 %v7136_v20 }
 0x4b0   :  { %1703 = vmatpush1.bf16.msra.mxu0 %v5483_v35  ;;  %1744 = vmatpush1.bf16.msra.mxu1 %v5486_v58 }
 0x4b1   :  { %1704 = vmatprep.subr.bf16.mxu0 %v5489_v40  ;;  %1745 = vmatprep.subr.bf16.mxu1 %v5492_v4 }
 0x4b4   :  { %1705 = vmatpush1.bf16.msra.mxu0 %v5495_v47  ;;  %1746 = vmatpush1.bf16.msra.mxu1 %v5498_v62 }
 0x4b5   :  { %1706 = vmatprep.subr.bf16.mxu0 %v5501_v1  ;;  %1747 = vmatprep.subr.bf16.mxu1 %v5504_v48 }
 0x4b8   :  { %1707 = vmatpush1.bf16.msra.mxu0 %v5507_v0  ;;  %1748 = vmatpush1.bf16.msra.mxu1 %v5510_v56  ;;  %v5525_v0 = vld [vmem:[#allocation5 + $0xa4] ss:$16 sps:$4 sm:$0xff]   ;;  %v5528_v56 = vld [vmem:[#allocation5 + $0xac] ss:$16 sps:$4 sm:$0xff]  }
 0x4b9   :  { %1708 = vmatprep.subr.bf16.mxu0 %v5513_v30  ;;  %1749 = vmatprep.subr.bf16.mxu1 %v5516_v6  ;;  %7296 = vst [vmem:[#allocation43_spill] sm:$0xff] %v5525_v0  ;;  %7297 = vst [vmem:[#allocation44_spill] sm:$0xff] %v5528_v56 }
 0x4bc   :  { %1709 = vmatpush1.bf16.msra.mxu0 %v5519_v26  ;;  %1750 = vmatpush1.bf16.msra.mxu1 %v5522_v60 }
 0x4bd   :  { %1710 = vmatprep.subr.bf16.mxu0 %v5525_v0  ;;  %1751 = vmatprep.subr.bf16.mxu1 %v5528_v56 }
 0x4c0   :  { %1711 = vmatpush1.bf16.msra.mxu0 %v7217_v59  ;;  %1752 = vmatpush1.bf16.msra.mxu1 %v7218_v61  ;;  %v7298_v59 = vld [vmem:[#allocation61_spill] sm:$0xff]  ;;  %v7299_v61 = vld [vmem:[#allocation62_spill] sm:$0xff] }
 0x4c1   :  { %1712 = vmatprep.subr.bf16.mxu0 %v7219_v55  ;;  %1753 = vmatprep.subr.bf16.mxu1 %v7220_v57  ;;  %v7300_v55 = vld [vmem:[#allocation63_spill] sm:$0xff]  ;;  %v7301_v57 = vld [vmem:[#allocation64_spill] sm:$0xff] }
 0x4c4   :  { %1713 = vmatpush1.bf16.msra.mxu0 %v7221_v7  ;;  %1754 = vmatpush1.bf16.msra.mxu1 %v7222_v15  ;;  %v7302_v7 = vld [vmem:[#allocation65_spill] sm:$0xff]  ;;  %v7303_v15 = vld [vmem:[#allocation66_spill] sm:$0xff] }
 0x4c5   :  { %1714 = vmatprep.subr.bf16.mxu0 %v7223_v8  ;;  %1755 = vmatprep.subr.bf16.mxu1 %v7224_v9  ;;  %v7304_v8 = vld [vmem:[#allocation10_spill] sm:$0xff]  ;;  %v7305_v9 = vld [vmem:[#allocation11_spill] sm:$0xff] }
 0x4c8   :  { %1715 = vmatpush1.bf16.msra.mxu0 %v7225_v12  ;;  %1756 = vmatpush1.bf16.msra.mxu1 %v7226_v14 }
 0x4c9   :  { %1811 = vmatprep.subr.bf16.mxu0 %v7227_v16  ;;  %1852 = vmatprep.subr.bf16.mxu1 %v7228_v17  ;;  %v7306_v16 = vld [vmem:[#allocation71_spill] sm:$0xff] }
 0x4cb   :  { %1733 = vmatmul.mubr.bf16.vlgmr.msra.gmra.mrb[36].mxu0 %v5359_v2  ;;  %1774 = vmatmul.mubr.bf16.vlgmr.msra.gmra.mrb[36].mxu1 %v5359_v2 }
 0x4cc   :  { %1812 = vmatpush1.bf16.msra.mxu0 %v7229_v18  ;;  %1853 = vmatpush1.bf16.msra.mxu1 %v7230_v19  ;;  %v7307_v18 = vld [vmem:[#allocation73_spill] sm:$0xff] }
 0x4cd   :  { %1813 = vmatprep.subr.bf16.mxu0 %v7231_v21  ;;  %1854 = vmatprep.subr.bf16.mxu1 %v7232_v22 }
 0x4ce   :  { %1843 = vmatprep.mubr.bf16.mxu0 %v7136_v20  ;;  %1884 = vmatprep.mubr.bf16.mxu1 %v7136_v20 }
 0x4d0   :  { %1814 = vmatpush1.bf16.msra.mxu0 %v7233_v23  ;;  %1855 = vmatpush1.bf16.msra.mxu1 %v7234_v24  ;;  %v7308_v23 = vld [vmem:[#allocation72_spill] sm:$0xff] }
 0x4d1   :  { %1815 = vmatprep.subr.bf16.mxu0 %v7235_v25  ;;  %1856 = vmatprep.subr.bf16.mxu1 %v7236_v27  ;;  %v7309_v25 = vld [vmem:[#allocation74_spill] sm:$0xff] }
 0x4d4   :  { %1816 = vmatpush1.bf16.msra.mxu0 %v7237_v50  ;;  %1857 = vmatpush1.bf16.msra.mxu1 %v7238_v28 }
 0x4d5   :  { %1817 = vmatprep.subr.bf16.mxu0 %v7239_v29  ;;  %1858 = vmatprep.subr.bf16.mxu1 %v7240_v32 }
 0x4d8   :  { %1818 = vmatpush1.bf16.msra.mxu0 %v7241_v33  ;;  %1859 = vmatpush1.bf16.msra.mxu1 %v7242_v36 }
 0x4d9   :  { %1819 = vmatprep.subr.bf16.mxu0 %v7243_v37  ;;  %1860 = vmatprep.subr.bf16.mxu1 %v7244_v38 }
 0x4dc   :  { %1820 = vmatpush1.bf16.msra.mxu0 %v7245_v39  ;;  %1861 = vmatpush1.bf16.msra.mxu1 %v7246_v41 }
 0x4dd   :  { %1821 = vmatprep.subr.bf16.mxu0 %v7247_v42  ;;  %1862 = vmatprep.subr.bf16.mxu1 %v7248_v43 }
 0x4e0   :  { %1822 = vmatpush1.bf16.msra.mxu0 %v7249_v44  ;;  %1863 = vmatpush1.bf16.msra.mxu1 %v7250_v45 }
 0x4e1   :  { %1823 = vmatprep.subr.bf16.mxu0 %v7251_v46  ;;  %1864 = vmatprep.subr.bf16.mxu1 %v7252_v11 }
 0x4e4   :  { %1824 = vmatpush1.bf16.msra.mxu0 %v7298_v59  ;;  %1865 = vmatpush1.bf16.msra.mxu1 %v7299_v61 }
 0x4e5   :  { %1825 = vmatprep.subr.bf16.mxu0 %v7300_v55  ;;  %1866 = vmatprep.subr.bf16.mxu1 %v7301_v57 }
 0x4e8   :  { %1826 = vmatpush1.bf16.msra.mxu0 %v7302_v7  ;;  %1867 = vmatpush1.bf16.msra.mxu1 %v7303_v15 }
 0x4e9   :  { %1926 = vmatprep.subr.bf16.mxu0 %v7304_v8  ;;  %1967 = vmatprep.subr.bf16.mxu1 %v7305_v9 }
 0x59e   :  { %v1734_v12 = vpop.f32.mrb[36].mxu0  ;;  %v1775_v14 = vpop.f32.mrb[36].mxu1 }
 0x59f   :  { %v1782_v17 = vadd.f32 %v1734_v12, %v7306_v16  ;;  %v1784_v19 = vadd.f32 %v1775_v14, %v7307_v18  ;;  %v1736_v21 = vpop.f32.mrb[37].mxu0  ;;  %v1777_v22 = vpop.f32.mrb[37].mxu1  ;;  %v7311_v12 = vld [vmem:[#allocation13_spill] sm:$0xff]  ;;  %v7312_v14 = vld [vmem:[#allocation14_spill] sm:$0xff]  ;;  %v7313_v16 = vld [vmem:[#allocation15_spill] sm:$0xff] }
 0x5a0   :  { %v1783_v24 = vadd.f32 %v1736_v21, %v7308_v23  ;;  %v1785_v27 = vadd.f32 %v1777_v22, %v7309_v25  ;;  %v1738_v50 = vpop.f32.mrb[38].mxu0  ;;  %v1779_v28 = vpop.f32.mrb[38].mxu1  ;;  %v7315_v18 = vld [vmem:[#allocation17_spill] sm:$0xff]  ;;  %v7317_v21 = vld [vmem:[#allocation19_spill] sm:$0xff]  ;;  %v7318_v22 = vld [vmem:[#allocation20_spill] sm:$0xff] }
 0x5a1   :  { %v3690_v29 = vmul.f32 -1.442695, %v1782_v17  ;;  %v1739_v32 = vpop.f32.mrb[39].mxu0  ;;  %v1780_v33 = vpop.f32.mrb[39].mxu1  ;;  %v7314_v17 = vld [vmem:[#allocation16_spill] sm:$0xff]  ;;  %v7319_v23 = vld [vmem:[#allocation21_spill] sm:$0xff] }
 0x5a2   :  { %v3691_v36 = vmul.f32 -1.442695, %v1783_v24  ;;  %v3692_v37 = vmul.f32 -1.442695, %v1785_v27  ;;  %v7320_v24 = vld [vmem:[#allocation22_spill] sm:$0xff]  ;;  %v7321_v25 = vld [vmem:[#allocation23_spill] sm:$0xff] }
 0x5a3   :  { %4118 = vpow2.f32 %v3690_v29  ;;  %v7322_v27 = vld [vmem:[#allocation24_spill] sm:$0xff]  ;;  %v7323_v50 = vld [vmem:[#allocation25_spill] sm:$0xff]  ;;  %v7324_v28 = vld [vmem:[#allocation26_spill] sm:$0xff] }
 0x5a4   :  { %4120 = vpow2.f32 %v3691_v36  ;;  %v7325_v29 = vld [vmem:[#allocation27_spill] sm:$0xff]  ;;  %v7326_v32 = vld [vmem:[#allocation28_spill] sm:$0xff]  ;;  %v7327_v33 = vld [vmem:[#allocation29_spill] sm:$0xff] }
 0x5a5   :  { %4122 = vpow2.f32 %v3692_v37  ;;  %v7328_v36 = vld [vmem:[#allocation30_spill] sm:$0xff]  ;;  %v7329_v37 = vld [vmem:[#allocation31_spill] sm:$0xff] }
 0x5a6   :  { %4124 = vtanh.f32 %v1784_v19  ;;  %v7316_v19 = vld [vmem:[#allocation18_spill] sm:$0xff] }
 0x5ad   :  { %v4119_v38 = vpop.eup %4118 }
 0x5ae   :  { %v4121_v39 = vpop.eup %4120  ;;  %v1792_v41 = vadd.f32 1.0, %v4119_v38  ;;  %v7330_v38 = vld [vmem:[#allocation32_spill] sm:$0xff] }
 0x5af   :  { %v1793_v42 = vadd.f32 1.0, %v4121_v39  ;;  %v4123_v43 = vpop.eup %4122  ;;  %v7331_v39 = vld [vmem:[#allocation33_spill] sm:$0xff] }
 0x5b0   :  { %4126 = vrcp.f32 %v1792_v41  ;;  %v4125_v44 = vpop.eup %4124  ;;  %v1802_v2 = vadd.f32 1.0, %v4123_v43  ;;  %v7332_v41 = vld [vmem:[#allocation34_spill] sm:$0xff]  ;;  %v7334_v43 = vld [vmem:[#allocation36_spill] sm:$0xff] }
 0x5b1   :  { %4128 = vrcp.f32 %v1793_v42  ;;  %v7333_v42 = vld [vmem:[#allocation35_spill] sm:$0xff] }
 0x5b2   :  { %4130 = vrcp.f32 %v1802_v2 }
 0x5ba   :  { %v4127_v45 = vpop.eup %4126 }
 0x5bb   :  { %v4129_v46 = vpop.eup %4128  ;;  %v1806_v11 = vmul.f32 %v4127_v45, %v4125_v44  ;;  %v7335_v44 = vld [vmem:[#allocation37_spill] sm:$0xff]  ;;  %v7336_v45 = vld [vmem:[#allocation38_spill] sm:$0xff] }
 0x5bc   :  { %v1805_v59 = vmul.f32 %v4129_v46, %v5356_v5  ;;  %v4131_v55 = vpop.eup %4130  ;;  %v7310_v5 = vld [vmem:[#allocation12_spill] sm:$0xff]  ;;  %v7337_v46 = vld [vmem:[#allocation39_spill] sm:$0xff] }
 0x5be   :  { %v5584_v61 = vadd.f32 %v1806_v11, %v1805_v59  ;;  %v7338_v11 = vld [vmem:[#allocation40_spill] sm:$0xff] }
 0x5c0   :  { %4132 = vtanh.f32 %v5584_v61 }
 0x5ca   :  { %v4133_v57 = vpop.eup %4132 }
 0x5cb   :  { %v1809_v7 = vmul.f32 %v4133_v57, %v4131_v55  ;;  %v7339_v55 = vld [vmem:[#allocation95_spill] sm:$0xff] }
 0x5cd   :  { %v5587_v15 = vpack.c.bf16 %v1809_v7, %v1809_v7 }
 0x5cf   :  { %1844 = vmatmul.mubr.bf16.vlgmr.msra.gmra.mrb[32].mxu0 %v5587_v15  ;;  %1885 = vmatmul.mubr.bf16.vlgmr.msra.gmra.mrb[32].mxu1 %v5587_v15 }
 0x5d0   :  { %1927 = vmatpush1.bf16.msra.mxu0 %v5363_v3  ;;  %1968 = vmatpush1.bf16.msra.mxu1 %v5366_v51 }
 0x5d1   :  { %1928 = vmatprep.subr.bf16.mxu0 %v5369_v53  ;;  %1969 = vmatprep.subr.bf16.mxu1 %v7310_v5 }
 0x5d2   :  { %1958 = vmatprep.mubr.bf16.mxu0 %v7136_v20  ;;  %1999 = vmatprep.mubr.bf16.mxu1 %v7136_v20 }
 0x5d4   :  { %1929 = vmatpush1.bf16.msra.mxu0 %v7311_v12  ;;  %1970 = vmatpush1.bf16.msra.mxu1 %v7312_v14 }
 0x5d5   :  { %1930 = vmatprep.subr.bf16.mxu0 %v7313_v16  ;;  %1971 = vmatprep.subr.bf16.mxu1 %v7314_v17 }
 0x5d8   :  { %1931 = vmatpush1.bf16.msra.mxu0 %v7315_v18  ;;  %1972 = vmatpush1.bf16.msra.mxu1 %v7316_v19 }
 0x5d9   :  { %1932 = vmatprep.subr.bf16.mxu0 %v7317_v21  ;;  %1973 = vmatprep.subr.bf16.mxu1 %v7318_v22 }
 0x5dc   :  { %1933 = vmatpush1.bf16.msra.mxu0 %v7319_v23  ;;  %1974 = vmatpush1.bf16.msra.mxu1 %v7320_v24 }
 0x5dd   :  { %1934 = vmatprep.subr.bf16.mxu0 %v7321_v25  ;;  %1975 = vmatprep.subr.bf16.mxu1 %v7322_v27 }
 0x5e0   :  { %1935 = vmatpush1.bf16.msra.mxu0 %v7323_v50  ;;  %1976 = vmatpush1.bf16.msra.mxu1 %v7324_v28 }
 0x5e1   :  { %1936 = vmatprep.subr.bf16.mxu0 %v7325_v29  ;;  %1977 = vmatprep.subr.bf16.mxu1 %v7326_v32 }
 0x5e4   :  { %1937 = vmatpush1.bf16.msra.mxu0 %v7327_v33  ;;  %1978 = vmatpush1.bf16.msra.mxu1 %v7328_v36 }
 0x5e5   :  { %1938 = vmatprep.subr.bf16.mxu0 %v7329_v37  ;;  %1979 = vmatprep.subr.bf16.mxu1 %v7330_v38 }
 0x5e8   :  { %1939 = vmatpush1.bf16.msra.mxu0 %v7331_v39  ;;  %1980 = vmatpush1.bf16.msra.mxu1 %v7332_v41 }
 0x5e9   :  { %1940 = vmatprep.subr.bf16.mxu0 %v7333_v42  ;;  %1981 = vmatprep.subr.bf16.mxu1 %v7334_v43 }
 0x5ec   :  { %1941 = vmatpush1.bf16.msra.mxu0 %v7335_v44  ;;  %1982 = vmatpush1.bf16.msra.mxu1 %v7336_v45 }
 0x5ed   :  { %2008 = vmatprep.subr.bf16.mxu0 %v7337_v46  ;;  %2049 = vmatprep.subr.bf16.mxu1 %v7338_v11 }
 0x6a2   :  { %v1845_v2 = vpop.f32.mrb[32].mxu0  ;;  %v1886_v59 = vpop.f32.mrb[32].mxu1 }
 0x6a3   :  { %v3811_v57 = vadd.f32 %v1845_v2, %v7339_v55  ;;  %v1847_v7 = vpop.f32.mrb[33].mxu0  ;;  %v1888_v39 = vpop.f32.mrb[33].mxu1  ;;  %v3813_v11 = vadd.f32 %v1886_v59, %v5271_v34  ;;  %v5655_v59 = vld [vmem:[#allocation5 + $0xa0] ss:$16 sps:$4 sm:$0xff]  }
 0x6a4   :  { %v3812_v41 = vadd.f32 %v1847_v7, %v5260_v13  ;;  %v1849_v38 = vpop.f32.mrb[34].mxu0  ;;  %v1890_v42 = vpop.f32.mrb[34].mxu1  ;;  %v3814_v46 = vadd.f32 %v1888_v39, %v5266_v31  ;;  %7342 = vst [vmem:[#allocation45_spill] sm:$0xff] %v5655_v59  ;;  %v5664_v7 = vld [vmem:[#allocation5 + $0xcc] ss:$16 sps:$4 sm:$0xff]  }
 0x6a5   :  { %v3693_v37 = vmul.f32 -1.442695, %v3811_v57  ;;  %v1850_v43 = vpop.f32.mrb[35].mxu0  ;;  %v1891_v36 = vpop.f32.mrb[35].mxu1  ;;  %v5661_v57 = vld [vmem:[#allocation5 + $0xc4] ss:$16 sps:$4 sm:$0xff]  }
 0x6a6   :  { %v3694_v44 = vmul.f32 -1.442695, %v3812_v41  ;;  %v3695_v45 = vmul.f32 -1.442695, %v3814_v46  ;;  %7344 = vst [vmem:[#allocation47_spill] sm:$0xff] %v5661_v57  ;;  %7345 = vst [vmem:[#allocation48_spill] sm:$0xff] %v5664_v7 }
 0x6a7   :  { %4134 = vpow2.f32 %v3693_v37 }
 0x6a8   :  { %4136 = vpow2.f32 %v3694_v44 }
 0x6a9   :  { %4138 = vpow2.f32 %v3695_v45 }
 0x6aa   :  { %4140 = vtanh.f32 %v3813_v11 }
 0x6b1   :  { %v4135_v33 = vpop.eup %4134 }
 0x6b2   :  { %v4137_v32 = vpop.eup %4136  ;;  %v1903_v2 = vadd.f32 1.0, %v4135_v33 }
 0x6b3   :  { %v1904_v55 = vadd.f32 1.0, %v4137_v32  ;;  %v4139_v38 = vpop.eup %4138  ;;  %v7341_v32 = vld [vmem:[#allocation42_spill] sm:$0xff] }
 0x6b4   :  { %4142 = vrcp.f32 %v1903_v2  ;;  %v4141_v42 = vpop.eup %4140  ;;  %v1913_v37 = vadd.f32 1.0, %v4139_v38  ;;  %v5667_v2 = vld [vmem:[#allocation5 + $0xc0] ss:$16 sps:$4 sm:$0xff]   ;;  %v5670_v38 = vld [vmem:[#allocation5 + $0xc8] ss:$16 sps:$4 sm:$0xff]  }
 0x6b5   :  { %4144 = vrcp.f32 %v1904_v55  ;;  %v5658_v55 = vld [vmem:[#allocation5 + $0xa8] ss:$16 sps:$4 sm:$0xff]   ;;  %7346 = vst [vmem:[#allocation49_spill] sm:$0xff] %v5667_v2  ;;  %7347 = vst [vmem:[#allocation50_spill] sm:$0xff] %v5670_v38 }
 0x6b6   :  { %4146 = vrcp.f32 %v1913_v37  ;;  %7343 = vst [vmem:[#allocation46_spill] sm:$0xff] %v5658_v55  ;;  %v5688_v37 = vld [vmem:[%s6734_s4 + $0x4] ss:$16 sps:$4 sm:$0xff]  }
 0x6b7   :  { %7352 = vst [vmem:[#allocation55_spill] sm:$0xff] %v5688_v37 }
 0x6be   :  { %v4143_v43 = vpop.eup %4142 }
 0x6bf   :  { %v4145_v36 = vpop.eup %4144  ;;  %v1917_v41 = vmul.f32 %v4143_v43, %v4141_v42  ;;  %v5673_v42 = vld [vmem:[#allocation5 + $0xe4] ss:$16 sps:$4 sm:$0xff]   ;;  %v5676_v43 = vld [vmem:[#allocation5 + $0xec] ss:$16 sps:$4 sm:$0xff]  }
 0x6c0   :  { %v1916_v44 = vmul.f32 %v4145_v36, %v5466_v49  ;;  %v4147_v46 = vpop.eup %4146  ;;  %v7340_v49 = vld [vmem:[#allocation41_spill] sm:$0xff]  ;;  %7348 = vst [vmem:[#allocation51_spill] sm:$0xff] %v5673_v42  ;;  %7349 = vst [vmem:[#allocation52_spill] sm:$0xff] %v5676_v43  ;;  %v5679_v36 = vld [vmem:[#allocation5 + $0xe0] ss:$16 sps:$4 sm:$0xff]  }
 0x6c1   :  { %7350 = vst [vmem:[#allocation53_spill] sm:$0xff] %v5679_v36 }
 0x6c2   :  { %v5630_v39 = vadd.f32 %v1917_v41, %v1916_v44  ;;  %v5682_v41 = vld [vmem:[#allocation5 + $0xe8] ss:$16 sps:$4 sm:$0xff]   ;;  %v5694_v44 = vld [vmem:[%s6734_s4 + $0xc] ss:$16 sps:$4 sm:$0xff]  }
 0x6c3   :  { %7351 = vst [vmem:[#allocation54_spill] sm:$0xff] %v5682_v41  ;;  %7353 = vst [vmem:[#allocation56_spill] sm:$0xff] %v5694_v44 }
 0x6c4   :  { %4148 = vtanh.f32 %v5630_v39 }
 0x6ce   :  { %v4149_v33 = vpop.eup %4148 }
 0x6cf   :  { %v1920_v45 = vmul.f32 %v4149_v33, %v4147_v46  ;;  %v5702_v46 = vld [vmem:[%s6734_s4] ss:$16 sps:$4 sm:$0xff]   ;;  %v5708_v33 = vld [vmem:[%s6734_s4 + $0x8] ss:$16 sps:$4 sm:$0xff]  }
 0x6d0   :  { %7354 = vst [vmem:[#allocation57_spill] sm:$0xff] %v5702_v46  ;;  %7355 = vst [vmem:[#allocation58_spill] sm:$0xff] %v5708_v33 }
 0x6d1   :  { %v1925_v11 = vpack.c.bf16 %v1920_v45, %v1920_v45  ;;  %v5714_v45 = vld [vmem:[%s6734_s4 + $0x24] ss:$16 sps:$4 sm:$0xff]  }
 0x6d2   :  { %7356 = vst [vmem:[#allocation59_spill] sm:$0xff] %v5714_v45 }
 0x6d3   :  { %1959 = vmatmul.mubr.bf16.vlgmr.msra.gmra.mrb[40].mxu0 %v1925_v11  ;;  %2000 = vmatmul.mubr.bf16.vlgmr.msra.gmra.mrb[40].mxu1 %v1925_v11  ;;  %v5728_v11 = vld [vmem:[%s6734_s4 + $0x20] ss:$16 sps:$4 sm:$0xff]  }
 0x6d4   :  { %2009 = vmatpush1.bf16.msra.mxu0 %v5469_v10  ;;  %2050 = vmatpush1.bf16.msra.mxu1 %v5472_v52  ;;  %7358 = vst [vmem:[#allocation67_spill] sm:$0xff] %v5728_v11 }
 0x6d5   :  { %2010 = vmatprep.subr.bf16.mxu0 %v5475_v54  ;;  %2051 = vmatprep.subr.bf16.mxu1 %v5478_v63 }
 0x6d6   :  { %2040 = vmatprep.mubr.bf16.mxu0 %v7136_v20  ;;  %2081 = vmatprep.mubr.bf16.mxu1 %v7136_v20 }
 0x6d8   :  { %2011 = vmatpush1.bf16.msra.mxu0 %v5483_v35  ;;  %2052 = vmatpush1.bf16.msra.mxu1 %v5486_v58 }
 0x6d9   :  { %2012 = vmatprep.subr.bf16.mxu0 %v5489_v40  ;;  %2053 = vmatprep.subr.bf16.mxu1 %v5492_v4 }
 0x6dc   :  { %2013 = vmatpush1.bf16.msra.mxu0 %v5495_v47  ;;  %2054 = vmatpush1.bf16.msra.mxu1 %v5498_v62 }
 0x6dd   :  { %2014 = vmatprep.subr.bf16.mxu0 %v5501_v1  ;;  %2055 = vmatprep.subr.bf16.mxu1 %v5504_v48 }
 0x6e0   :  { %2015 = vmatpush1.bf16.msra.mxu0 %v7340_v49  ;;  %2056 = vmatpush1.bf16.msra.mxu1 %v7341_v32 }
 0x6e1   :  { %2016 = vmatprep.subr.bf16.mxu0 %v5513_v30  ;;  %2057 = vmatprep.subr.bf16.mxu1 %v5516_v6 }
 0x6e4   :  { %2017 = vmatpush1.bf16.msra.mxu0 %v5519_v26  ;;  %2058 = vmatpush1.bf16.msra.mxu1 %v5522_v60 }
 0x6e5   :  { %2018 = vmatprep.subr.bf16.mxu0 %v5525_v0  ;;  %2059 = vmatprep.subr.bf16.mxu1 %v5528_v56 }
 0x6e8   :  { %2019 = vmatpush1.bf16.msra.mxu0 %v5655_v59  ;;  %2060 = vmatpush1.bf16.msra.mxu1 %v5658_v55 }
 0x6e9   :  { %2020 = vmatprep.subr.bf16.mxu0 %v5661_v57  ;;  %2061 = vmatprep.subr.bf16.mxu1 %v5664_v7 }
 0x6ec   :  { %2021 = vmatpush1.bf16.msra.mxu0 %v5667_v2  ;;  %2062 = vmatpush1.bf16.msra.mxu1 %v5670_v38  ;;  %v7387_v38 = vld [vmem:[#allocation78_spill] sm:$0xff] }
 0x6ed   :  { %2022 = vmatprep.subr.bf16.mxu0 %v5673_v42  ;;  %2063 = vmatprep.subr.bf16.mxu1 %v5676_v43 }
 0x6f0   :  { %2023 = vmatpush1.bf16.msra.mxu0 %v5679_v36  ;;  %2064 = vmatpush1.bf16.msra.mxu1 %v5682_v41 }
 0x6f1   :  { %2119 = vmatprep.subr.bf16.mxu0 %v5688_v37  ;;  %2160 = vmatprep.subr.bf16.mxu1 %v5694_v44  ;;  %v7385_v37 = vld [vmem:[#allocation77_spill] sm:$0xff] }
 0x6f3   :  { %2041 = vmatmul.mubr.bf16.vlgmr.msra.gmra.mrb[44].mxu0 %v5587_v15  ;;  %2082 = vmatmul.mubr.bf16.vlgmr.msra.gmra.mrb[44].mxu1 %v5587_v15  ;;  %v5720_v15 = vld [vmem:[%s6734_s4 + $0x2c] ss:$16 sps:$4 sm:$0xff]  }
 0x6f4   :  { %2120 = vmatpush1.bf16.msra.mxu0 %v5702_v46  ;;  %2161 = vmatpush1.bf16.msra.mxu1 %v5708_v33  ;;  %7357 = vst [vmem:[#allocation60_spill] sm:$0xff] %v5720_v15  ;;  %v5746_v33 = vld [vmem:[%s6734_s4 + $0x4c] ss:$16 sps:$4 sm:$0xff]  }
 0x6f5   :  { %2121 = vmatprep.subr.bf16.mxu0 %v5714_v45  ;;  %2162 = vmatprep.subr.bf16.mxu1 %v5720_v15  ;;  %v5734_v45 = vld [vmem:[%s6734_s4 + $0x28] ss:$16 sps:$4 sm:$0xff]   ;;  %v5740_v15 = vld [vmem:[%s6734_s4 + $0x44] ss:$16 sps:$4 sm:$0xff]   ;;  %7361 = vst [vmem:[#allocation70_spill] sm:$0xff] %v5746_v33 }
 0x6f6   :  { %2151 = vmatprep.mubr.bf16.mxu0 %v7136_v20  ;;  %2192 = vmatprep.mubr.bf16.mxu1 %v7136_v20  ;;  %7359 = vst [vmem:[#allocation69_spill] sm:$0xff] %v5734_v45  ;;  %7360 = vst [vmem:[#allocation68_spill] sm:$0xff] %v5740_v15  ;;  %v7384_v46 = vld [vmem:[#allocation75_spill] sm:$0xff] }
 0x6f8   :  { %2122 = vmatpush1.bf16.msra.mxu0 %v5728_v11  ;;  %2163 = vmatpush1.bf16.msra.mxu1 %v5734_v45  ;;  %v5752_v11 = vld [vmem:[%s6734_s4 + $0x40] ss:$16 sps:$4 sm:$0xff]   ;;  %v5758_v45 = vld [vmem:[%s6734_s4 + $0x48] ss:$16 sps:$4 sm:$0xff]  }
 0x6f9   :  { %2123 = vmatprep.subr.bf16.mxu0 %v5740_v15  ;;  %2164 = vmatprep.subr.bf16.mxu1 %v5746_v33  ;;  %7362 = vst [vmem:[#allocation61_spill] sm:$0xff] %v5752_v11  ;;  %7363 = vst [vmem:[#allocation62_spill] sm:$0xff] %v5758_v45  ;;  %v5764_v15 = vld [vmem:[%s6734_s4 + $0x64] ss:$16 sps:$4 sm:$0xff]   ;;  %v5770_v33 = vld [vmem:[%s6734_s4 + $0x6c] ss:$16 sps:$4 sm:$0xff]  }
 0x6fa   :  { %7364 = vst [vmem:[#allocation63_spill] sm:$0xff] %v5764_v15  ;;  %7365 = vst [vmem:[#allocation64_spill] sm:$0xff] %v5770_v33 }
 0x6fc   :  { %2124 = vmatpush1.bf16.msra.mxu0 %v5752_v11  ;;  %2165 = vmatpush1.bf16.msra.mxu1 %v5758_v45  ;;  %v5776_v11 = vld [vmem:[%s6734_s4 + $0x60] ss:$16 sps:$4 sm:$0xff]   ;;  %v5782_v45 = vld [vmem:[%s6734_s4 + $0x68] ss:$16 sps:$4 sm:$0xff]  }
 0x6fd   :  { %2125 = vmatprep.subr.bf16.mxu0 %v5764_v15  ;;  %2166 = vmatprep.subr.bf16.mxu1 %v5770_v33  ;;  %7366 = vst [vmem:[#allocation65_spill] sm:$0xff] %v5776_v11  ;;  %7367 = vst [vmem:[#allocation66_spill] sm:$0xff] %v5782_v45  ;;  %v5788_v15 = vld [vmem:[%s6734_s4 + $0x84] ss:$16 sps:$4 sm:$0xff]   ;;  %v5794_v33 = vld [vmem:[%s6734_s4 + $0x8c] ss:$16 sps:$4 sm:$0xff]  }
 0x6fe   :  { %7368 = vst [vmem:[#allocation10_spill] sm:$0xff] %v5788_v15  ;;  %7369 = vst [vmem:[#allocation11_spill] sm:$0xff] %v5794_v33 }
 0x700   :  { %2126 = vmatpush1.bf16.msra.mxu0 %v5776_v11  ;;  %2167 = vmatpush1.bf16.msra.mxu1 %v5782_v45  ;;  %v5800_v11 = vld [vmem:[%s6734_s4 + $0x80] ss:$16 sps:$4 sm:$0xff]   ;;  %v5806_v45 = vld [vmem:[%s6734_s4 + $0x88] ss:$16 sps:$4 sm:$0xff]  }
 0x701   :  { %2127 = vmatprep.subr.bf16.mxu0 %v5788_v15  ;;  %2168 = vmatprep.subr.bf16.mxu1 %v5794_v33  ;;  %7370 = vst [vmem:[#allocation71_spill] sm:$0xff] %v5800_v11  ;;  %7371 = vst [vmem:[#allocation73_spill] sm:$0xff] %v5806_v45  ;;  %v5812_v15 = vld [vmem:[%s6734_s4 + $0xa4] ss:$16 sps:$4 sm:$0xff]   ;;  %v5818_v33 = vld [vmem:[%s6734_s4 + $0xac] ss:$16 sps:$4 sm:$0xff]  }
 0x702   :  { %7372 = vst [vmem:[#allocation72_spill] sm:$0xff] %v5812_v15  ;;  %7373 = vst [vmem:[#allocation74_spill] sm:$0xff] %v5818_v33 }
 0x704   :  { %2128 = vmatpush1.bf16.msra.mxu0 %v5800_v11  ;;  %2169 = vmatpush1.bf16.msra.mxu1 %v5806_v45  ;;  %v5824_v11 = vld [vmem:[%s6734_s4 + $0xa0] ss:$16 sps:$4 sm:$0xff]   ;;  %v5830_v45 = vld [vmem:[%s6734_s4 + $0xa8] ss:$16 sps:$4 sm:$0xff]  }
 0x705   :  { %2129 = vmatprep.subr.bf16.mxu0 %v5812_v15  ;;  %2170 = vmatprep.subr.bf16.mxu1 %v5818_v33  ;;  %7374 = vst [vmem:[#allocation12_spill] sm:$0xff] %v5824_v11  ;;  %7375 = vst [vmem:[#allocation13_spill] sm:$0xff] %v5830_v45  ;;  %v5836_v15 = vld [vmem:[%s6734_s4 + $0xc4] ss:$16 sps:$4 sm:$0xff]   ;;  %v5842_v33 = vld [vmem:[%s6734_s4 + $0xcc] ss:$16 sps:$4 sm:$0xff]  }
 0x706   :  { %7376 = vst [vmem:[#allocation14_spill] sm:$0xff] %v5836_v15  ;;  %7377 = vst [vmem:[#allocation15_spill] sm:$0xff] %v5842_v33 }
 0x708   :  { %2130 = vmatpush1.bf16.msra.mxu0 %v5824_v11  ;;  %2171 = vmatpush1.bf16.msra.mxu1 %v5830_v45  ;;  %v5848_v11 = vld [vmem:[%s6734_s4 + $0xc0] ss:$16 sps:$4 sm:$0xff]   ;;  %v5854_v45 = vld [vmem:[%s6734_s4 + $0xc8] ss:$16 sps:$4 sm:$0xff]  }
 0x709   :  { %2131 = vmatprep.subr.bf16.mxu0 %v5836_v15  ;;  %2172 = vmatprep.subr.bf16.mxu1 %v5842_v33  ;;  %7378 = vst [vmem:[#allocation16_spill] sm:$0xff] %v5848_v11  ;;  %7379 = vst [vmem:[#allocation17_spill] sm:$0xff] %v5854_v45  ;;  %v5860_v15 = vld [vmem:[%s6734_s4 + $0xe4] ss:$16 sps:$4 sm:$0xff]   ;;  %v5866_v33 = vld [vmem:[%s6734_s4 + $0xec] ss:$16 sps:$4 sm:$0xff]  }
 0x70a   :  { %7380 = vst [vmem:[#allocation18_spill] sm:$0xff] %v5860_v15  ;;  %7381 = vst [vmem:[#allocation19_spill] sm:$0xff] %v5866_v33 }
 0x70c   :  { %2132 = vmatpush1.bf16.msra.mxu0 %v5848_v11  ;;  %2173 = vmatpush1.bf16.msra.mxu1 %v5854_v45  ;;  %v5872_v11 = vld [vmem:[%s6734_s4 + $0xe0] ss:$16 sps:$4 sm:$0xff]   ;;  %v5878_v45 = vld [vmem:[%s6734_s4 + $0xe8] ss:$16 sps:$4 sm:$0xff]  }
 0x70d   :  { %2133 = vmatprep.subr.bf16.mxu0 %v5860_v15  ;;  %2174 = vmatprep.subr.bf16.mxu1 %v5866_v33  ;;  %7382 = vst [vmem:[#allocation20_spill] sm:$0xff] %v5872_v11  ;;  %7383 = vst [vmem:[#allocation21_spill] sm:$0xff] %v5878_v45 }
 0x710   :  { %2134 = vmatpush1.bf16.msra.mxu0 %v5872_v11  ;;  %2175 = vmatpush1.bf16.msra.mxu1 %v5878_v45  ;;  %v7386_v11 = vld [vmem:[#allocation76_spill] sm:$0xff] }
 0x711   :  { %2234 = vmatprep.subr.bf16.mxu0 %v7304_v8  ;;  %2275 = vmatprep.subr.bf16.mxu1 %v7305_v9 }
 0x7c6   :  { %v2042_v15 = vpop.f32.mrb[44].mxu0  ;;  %v2083_v33 = vpop.f32.mrb[44].mxu1 }
 0x7c7   :  { %v2090_v44 = vadd.f32 %v2042_v15, %v7384_v46  ;;  %v2092_v41 = vadd.f32 %v2083_v33, %v7385_v37  ;;  %v2044_v36 = vpop.f32.mrb[45].mxu0  ;;  %v2085_v43 = vpop.f32.mrb[45].mxu1 }
 0x7c8   :  { %v2091_v42 = vadd.f32 %v2044_v36, %v7386_v11  ;;  %v2093_v2 = vadd.f32 %v2085_v43, %v7387_v38  ;;  %v2046_v7 = vpop.f32.mrb[46].mxu0  ;;  %v2087_v57 = vpop.f32.mrb[46].mxu1 }
 0x7c9   :  { %v3696_v55 = vmul.f32 -1.442695, %v2090_v44  ;;  %v2047_v45 = vpop.f32.mrb[47].mxu0  ;;  %v2088_v59 = vpop.f32.mrb[47].mxu1 }
 0x7ca   :  { %v3697_v8 = vmul.f32 -1.442695, %v2091_v42  ;;  %v3698_v9 = vmul.f32 -1.442695, %v2093_v2 }
 0x7cb   :  { %4150 = vpow2.f32 %v3696_v55 }
 0x7cc   :  { %4152 = vpow2.f32 %v3697_v8 }
 0x7cd   :  { %4154 = vpow2.f32 %v3698_v9 }
 0x7ce   :  { %4156 = vtanh.f32 %v2092_v41 }
 0x7d5   :  { %v4151_v56 = vpop.eup %4150 }
 0x7d6   :  { %v4153_v0 = vpop.eup %4152  ;;  %v2100_v46 = vadd.f32 1.0, %v4151_v56 }
 0x7d7   :  { %v2101_v37 = vadd.f32 1.0, %v4153_v0  ;;  %v4155_v36 = vpop.eup %4154  ;;  %v7391_v0 = vld [vmem:[#allocation31_spill] sm:$0xff] }
 0x7d8   :  { %4158 = vrcp.f32 %v2100_v46  ;;  %v4157_v33 = vpop.eup %4156  ;;  %v2110_v43 = vadd.f32 1.0, %v4155_v36 }
 0x7d9   :  { %4160 = vrcp.f32 %v2101_v37 }
 0x7da   :  { %4162 = vrcp.f32 %v2110_v43 }
 0x7e2   :  { %v4159_v38 = vpop.eup %4158 }
 0x7e3   :  { %v4161_v7 = vpop.eup %4160  ;;  %v2114_v57 = vmul.f32 %v4159_v38, %v4157_v33 }
 0x7e4   :  { %v2113_v59 = vmul.f32 %v4161_v7, %v5584_v61  ;;  %v4163_v55 = vpop.eup %4162  ;;  %v7392_v61 = vld [vmem:[#allocation32_spill] sm:$0xff] }
 0x7e6   :  { %v5888_v42 = vadd.f32 %v2114_v57, %v2113_v59 }
 0x7e8   :  { %4164 = vtanh.f32 %v5888_v42 }
 0x7f2   :  { %v4165_v56 = vpop.eup %4164 }
 0x7f3   :  { %v2117_v2 = vmul.f32 %v4165_v56, %v4163_v55 }
 0x7f5   :  { %v5891_v41 = vpack.c.bf16 %v2117_v2, %v2117_v2 }
 0x7f7   :  { %2152 = vmatmul.mubr.bf16.vlgmr.msra.gmra.mrb[40].mxu0 %v5891_v41  ;;  %2193 = vmatmul.mubr.bf16.vlgmr.msra.gmra.mrb[40].mxu1 %v5891_v41 }
 0x7f8   :  { %2235 = vmatpush1.bf16.msra.mxu0 %v5363_v3  ;;  %2276 = vmatpush1.bf16.msra.mxu1 %v5366_v51  ;;  %v7388_v3 = vld [vmem:[#allocation28_spill] sm:$0xff]  ;;  %v7389_v51 = vld [vmem:[#allocation29_spill] sm:$0xff] }
 0x7f9   :  { %2236 = vmatprep.subr.bf16.mxu0 %v5369_v53  ;;  %2277 = vmatprep.subr.bf16.mxu1 %v7310_v5  ;;  %v7390_v53 = vld [vmem:[#allocation30_spill] sm:$0xff]  ;;  %v7393_v5 = vld [vmem:[#allocation33_spill] sm:$0xff] }
 0x7fa   :  { %2266 = vmatprep.mubr.bf16.mxu0 %v7136_v20  ;;  %2307 = vmatprep.mubr.bf16.mxu1 %v7136_v20 }
 0x7fc   :  { %2237 = vmatpush1.bf16.msra.mxu0 %v7311_v12  ;;  %2278 = vmatpush1.bf16.msra.mxu1 %v7312_v14  ;;  %v7394_v12 = vld [vmem:[#allocation34_spill] sm:$0xff]  ;;  %v7395_v14 = vld [vmem:[#allocation35_spill] sm:$0xff] }
 0x7fd   :  { %2238 = vmatprep.subr.bf16.mxu0 %v7313_v16  ;;  %2279 = vmatprep.subr.bf16.mxu1 %v7314_v17  ;;  %v7396_v16 = vld [vmem:[#allocation36_spill] sm:$0xff]  ;;  %v7397_v17 = vld [vmem:[#allocation37_spill] sm:$0xff] }
 0x800   :  { %2239 = vmatpush1.bf16.msra.mxu0 %v7315_v18  ;;  %2280 = vmatpush1.bf16.msra.mxu1 %v7316_v19  ;;  %v7398_v18 = vld [vmem:[#allocation38_spill] sm:$0xff]  ;;  %v7399_v19 = vld [vmem:[#allocation39_spill] sm:$0xff] }
 0x801   :  { %2240 = vmatprep.subr.bf16.mxu0 %v7317_v21  ;;  %2281 = vmatprep.subr.bf16.mxu1 %v7318_v22  ;;  %v7400_v21 = vld [vmem:[#allocation40_spill] sm:$0xff] }
 0x804   :  { %2241 = vmatpush1.bf16.msra.mxu0 %v7319_v23  ;;  %2282 = vmatpush1.bf16.msra.mxu1 %v7320_v24  ;;  %v7401_v24 = vld [vmem:[#allocation95_spill] sm:$0xff] }
 0x805   :  { %2242 = vmatprep.subr.bf16.mxu0 %v7321_v25  ;;  %2283 = vmatprep.subr.bf16.mxu1 %v7322_v27 }
 0x808   :  { %2243 = vmatpush1.bf16.msra.mxu0 %v7323_v50  ;;  %2284 = vmatpush1.bf16.msra.mxu1 %v7324_v28 }
 0x809   :  { %2244 = vmatprep.subr.bf16.mxu0 %v7325_v29  ;;  %2285 = vmatprep.subr.bf16.mxu1 %v7388_v3 }
 0x80c   :  { %2245 = vmatpush1.bf16.msra.mxu0 %v7389_v51  ;;  %2286 = vmatpush1.bf16.msra.mxu1 %v7390_v53 }
 0x80d   :  { %2246 = vmatprep.subr.bf16.mxu0 %v7391_v0  ;;  %2287 = vmatprep.subr.bf16.mxu1 %v7392_v61 }
 0x810   :  { %2247 = vmatpush1.bf16.msra.mxu0 %v7393_v5  ;;  %2288 = vmatpush1.bf16.msra.mxu1 %v7394_v12  ;;  %v7421_v12 = vld [vmem:[#allocation69_spill] sm:$0xff] }
 0x811   :  { %2248 = vmatprep.subr.bf16.mxu0 %v7395_v14  ;;  %2289 = vmatprep.subr.bf16.mxu1 %v7396_v16  ;;  %v7422_v14 = vld [vmem:[#allocation68_spill] sm:$0xff]  ;;  %v7423_v16 = vld [vmem:[#allocation70_spill] sm:$0xff] }
 0x814   :  { %2249 = vmatpush1.bf16.msra.mxu0 %v7397_v17  ;;  %2290 = vmatpush1.bf16.msra.mxu1 %v7398_v18  ;;  %v7425_v17 = vld [vmem:[#allocation62_spill] sm:$0xff]  ;;  %v7426_v18 = vld [vmem:[#allocation63_spill] sm:$0xff] }
 0x815   :  { %2316 = vmatprep.subr.bf16.mxu0 %v7399_v19  ;;  %2357 = vmatprep.subr.bf16.mxu1 %v7400_v21  ;;  %v7427_v19 = vld [vmem:[#allocation64_spill] sm:$0xff]  ;;  %v7428_v21 = vld [vmem:[#allocation65_spill] sm:$0xff] }
 0x8ca   :  { %v2153_v22 = vpop.f32.mrb[40].mxu0  ;;  %v2194_v23 = vpop.f32.mrb[40].mxu1 }
 0x8cb   :  { %v3815_v25 = vadd.f32 %v2153_v22, %v7401_v24  ;;  %v2155_v27 = vpop.f32.mrb[41].mxu0  ;;  %v2196_v50 = vpop.f32.mrb[41].mxu1  ;;  %v3817_v37 = vadd.f32 %v2194_v23, %v5271_v34  ;;  %v7429_v22 = vld [vmem:[#allocation66_spill] sm:$0xff] }
 0x8cc   :  { %v3816_v28 = vadd.f32 %v2155_v27, %v5260_v13  ;;  %v2157_v29 = vpop.f32.mrb[42].mxu0  ;;  %v2198_v44 = vpop.f32.mrb[42].mxu1  ;;  %v3818_v9 = vadd.f32 %v2196_v50, %v5266_v31  ;;  %v7430_v23 = vld [vmem:[#allocation10_spill] sm:$0xff]  ;;  %v7432_v27 = vld [vmem:[#allocation71_spill] sm:$0xff]  ;;  %v7433_v50 = vld [vmem:[#allocation73_spill] sm:$0xff] }
 0x8cd   :  { %v3699_v45 = vmul.f32 -1.442695, %v3815_v25  ;;  %v2158_v15 = vpop.f32.mrb[43].mxu0  ;;  %v2199_v11 = vpop.f32.mrb[43].mxu1  ;;  %v7431_v25 = vld [vmem:[#allocation11_spill] sm:$0xff]  ;;  %v7435_v29 = vld [vmem:[#allocation74_spill] sm:$0xff] }
 0x8ce   :  { %v3700_v8 = vmul.f32 -1.442695, %v3816_v28  ;;  %v3701_v46 = vmul.f32 -1.442695, %v3818_v9  ;;  %v7434_v28 = vld [vmem:[#allocation72_spill] sm:$0xff]  ;;  %v7438_v15 = vld [vmem:[#allocation14_spill] sm:$0xff] }
 0x8cf   :  { %4166 = vpow2.f32 %v3699_v45  ;;  %v7436_v44 = vld [vmem:[#allocation12_spill] sm:$0xff]  ;;  %v7437_v45 = vld [vmem:[#allocation13_spill] sm:$0xff]  ;;  %v7439_v11 = vld [vmem:[#allocation15_spill] sm:$0xff] }
 0x8d0   :  { %4168 = vpow2.f32 %v3700_v8  ;;  %v7440_v8 = vld [vmem:[#allocation16_spill] sm:$0xff]  ;;  %v7441_v9 = vld [vmem:[#allocation17_spill] sm:$0xff] }
 0x8d1   :  { %4170 = vpow2.f32 %v3701_v46  ;;  %v7442_v46 = vld [vmem:[#allocation18_spill] sm:$0xff] }
 0x8d2   :  { %4172 = vtanh.f32 %v3817_v37  ;;  %v7443_v37 = vld [vmem:[#allocation19_spill] sm:$0xff] }
 0x8d9   :  { %v4167_v36 = vpop.eup %4166 }
 0x8da   :  { %v4169_v33 = vpop.eup %4168  ;;  %v2211_v38 = vadd.f32 1.0, %v4167_v36  ;;  %v7444_v36 = vld [vmem:[#allocation20_spill] sm:$0xff] }
 0x8db   :  { %v2212_v7 = vadd.f32 1.0, %v4169_v33  ;;  %v4171_v57 = vpop.eup %4170  ;;  %v7445_v33 = vld [vmem:[#allocation21_spill] sm:$0xff] }
 0x8dc   :  { %4174 = vrcp.f32 %v2211_v38  ;;  %v4173_v43 = vpop.eup %4172  ;;  %v2221_v2 = vadd.f32 1.0, %v4171_v57  ;;  %v6005_v38 = vld [vmem:[#allocation7 + $0x4] ss:$16 sps:$4 sm:$0xff]  }
 0x8dd   :  { %4176 = vrcp.f32 %v2212_v7  ;;  %7446 = vst [vmem:[#allocation22_spill] sm:$0xff] %v6005_v38  ;;  %v6008_v7 = vld [vmem:[#allocation7 + $0xc] ss:$16 sps:$4 sm:$0xff]  }
 0x8de   :  { %4178 = vrcp.f32 %v2221_v2  ;;  %7447 = vst [vmem:[#allocation23_spill] sm:$0xff] %v6008_v7 }
 0x8e6   :  { %v4175_v59 = vpop.eup %4174 }
 0x8e7   :  { %v4177_v55 = vpop.eup %4176  ;;  %v2225_v56 = vmul.f32 %v4175_v59, %v4173_v43  ;;  %v7448_v59 = vld [vmem:[#allocation79_spill] sm:$0xff] }
 0x8e8   :  { %v2224_v3 = vmul.f32 %v4177_v55, %v5630_v39  ;;  %v4179_v53 = vpop.eup %4178  ;;  %v7418_v39 = vld [vmem:[#allocation59_spill] sm:$0xff] }
 0x8ea   :  { %v5934_v51 = vadd.f32 %v2225_v56, %v2224_v3  ;;  %v7449_v56 = vld [vmem:[#allocation81_spill] sm:$0xff] }
 0x8ec   :  { %4180 = vtanh.f32 %v5934_v51 }
 0x8f6   :  { %v4181_v0 = vpop.eup %4180 }
 0x8f7   :  { %v2228_v61 = vmul.f32 %v4181_v0, %v4179_v53  ;;  %v7450_v0 = vld [vmem:[#allocation80_spill] sm:$0xff] }
 0x8f9   :  { %v2233_v5 = vpack.c.bf16 %v2228_v61, %v2228_v61 }
 0x8fb   :  { %2267 = vmatmul.mubr.bf16.vlgmr.msra.gmra.mrb[48].mxu0 %v2233_v5  ;;  %2308 = vmatmul.mubr.bf16.vlgmr.msra.gmra.mrb[48].mxu1 %v2233_v5  ;;  %v7451_v5 = vld [vmem:[#allocation82_spill] sm:$0xff] }
 0x8fc   :  { %2317 = vmatpush1.bf16.msra.mxu0 %v5469_v10  ;;  %2358 = vmatpush1.bf16.msra.mxu1 %v5472_v52  ;;  %v7402_v10 = vld [vmem:[#allocation43_spill] sm:$0xff]  ;;  %v7403_v52 = vld [vmem:[#allocation44_spill] sm:$0xff] }
 0x8fd   :  { %2318 = vmatprep.subr.bf16.mxu0 %v5475_v54  ;;  %2359 = vmatprep.subr.bf16.mxu1 %v5478_v63  ;;  %v7404_v54 = vld [vmem:[#allocation45_spill] sm:$0xff]  ;;  %v7405_v63 = vld [vmem:[#allocation46_spill] sm:$0xff] }
 0x8fe   :  { %2348 = vmatprep.mubr.bf16.mxu0 %v7136_v20  ;;  %2389 = vmatprep.mubr.bf16.mxu1 %v7136_v20 }
 0x900   :  { %2319 = vmatpush1.bf16.msra.mxu0 %v5483_v35  ;;  %2360 = vmatpush1.bf16.msra.mxu1 %v5486_v58  ;;  %v7406_v35 = vld [vmem:[#allocation47_spill] sm:$0xff]  ;;  %v7407_v58 = vld [vmem:[#allocation48_spill] sm:$0xff] }
 0x901   :  { %2320 = vmatprep.subr.bf16.mxu0 %v5489_v40  ;;  %2361 = vmatprep.subr.bf16.mxu1 %v5492_v4  ;;  %v7408_v40 = vld [vmem:[#allocation49_spill] sm:$0xff]  ;;  %v7409_v4 = vld [vmem:[#allocation50_spill] sm:$0xff] }
 0x904   :  { %2321 = vmatpush1.bf16.msra.mxu0 %v5495_v47  ;;  %2362 = vmatpush1.bf16.msra.mxu1 %v5498_v62  ;;  %v7410_v47 = vld [vmem:[#allocation51_spill] sm:$0xff]  ;;  %v7411_v62 = vld [vmem:[#allocation52_spill] sm:$0xff] }
 0x905   :  { %2322 = vmatprep.subr.bf16.mxu0 %v5501_v1  ;;  %2363 = vmatprep.subr.bf16.mxu1 %v5504_v48  ;;  %v7412_v1 = vld [vmem:[#allocation53_spill] sm:$0xff]  ;;  %v7413_v48 = vld [vmem:[#allocation54_spill] sm:$0xff] }
 0x908   :  { %2323 = vmatpush1.bf16.msra.mxu0 %v7340_v49  ;;  %2364 = vmatpush1.bf16.msra.mxu1 %v7341_v32  ;;  %v7419_v49 = vld [vmem:[#allocation60_spill] sm:$0xff]  ;;  %v7420_v32 = vld [vmem:[#allocation67_spill] sm:$0xff] }
 0x909   :  { %2324 = vmatprep.subr.bf16.mxu0 %v5513_v30  ;;  %2365 = vmatprep.subr.bf16.mxu1 %v5516_v6  ;;  %v7414_v30 = vld [vmem:[#allocation55_spill] sm:$0xff]  ;;  %v7415_v6 = vld [vmem:[#allocation56_spill] sm:$0xff] }
 0x90c   :  { %2325 = vmatpush1.bf16.msra.mxu0 %v5519_v26  ;;  %2366 = vmatpush1.bf16.msra.mxu1 %v5522_v60  ;;  %v7416_v26 = vld [vmem:[#allocation57_spill] sm:$0xff]  ;;  %v7417_v60 = vld [vmem:[#allocation58_spill] sm:$0xff] }
 0x90d   :  { %2326 = vmatprep.subr.bf16.mxu0 %v7402_v10  ;;  %2367 = vmatprep.subr.bf16.mxu1 %v7403_v52 }
 0x910   :  { %2327 = vmatpush1.bf16.msra.mxu0 %v7404_v54  ;;  %2368 = vmatpush1.bf16.msra.mxu1 %v7405_v63 }
 0x911   :  { %2328 = vmatprep.subr.bf16.mxu0 %v7406_v35  ;;  %2369 = vmatprep.subr.bf16.mxu1 %v7407_v58 }
 0x914   :  { %2329 = vmatpush1.bf16.msra.mxu0 %v7408_v40  ;;  %2370 = vmatpush1.bf16.msra.mxu1 %v7409_v4 }
 0x915   :  { %2330 = vmatprep.subr.bf16.mxu0 %v7410_v47  ;;  %2371 = vmatprep.subr.bf16.mxu1 %v7411_v62 }
 0x918   :  { %2331 = vmatpush1.bf16.msra.mxu0 %v7412_v1  ;;  %2372 = vmatpush1.bf16.msra.mxu1 %v7413_v48 }
 0x919   :  { %2427 = vmatprep.subr.bf16.mxu0 %v7414_v30  ;;  %2468 = vmatprep.subr.bf16.mxu1 %v7415_v6 }
 0x91b   :  { %2349 = vmatmul.mubr.bf16.vlgmr.msra.gmra.mrb[52].mxu0 %v5891_v41  ;;  %2390 = vmatmul.mubr.bf16.vlgmr.msra.gmra.mrb[52].mxu1 %v5891_v41  ;;  %v7424_v41 = vld [vmem:[#allocation61_spill] sm:$0xff] }
 0x91c   :  { %2428 = vmatpush1.bf16.msra.mxu0 %v7416_v26  ;;  %2469 = vmatpush1.bf16.msra.mxu1 %v7417_v60 }
 0x91d   :  { %2429 = vmatprep.subr.bf16.mxu0 %v7418_v39  ;;  %2470 = vmatprep.subr.bf16.mxu1 %v7419_v49 }
 0x91e   :  { %2459 = vmatprep.mubr.bf16.mxu0 %v7136_v20  ;;  %2500 = vmatprep.mubr.bf16.mxu1 %v7136_v20 }
 0x920   :  { %2430 = vmatpush1.bf16.msra.mxu0 %v7420_v32  ;;  %2471 = vmatpush1.bf16.msra.mxu1 %v7421_v12 }
 0x921   :  { %2431 = vmatprep.subr.bf16.mxu0 %v7422_v14  ;;  %2472 = vmatprep.subr.bf16.mxu1 %v7423_v16 }
 0x924   :  { %2432 = vmatpush1.bf16.msra.mxu0 %v7424_v41  ;;  %2473 = vmatpush1.bf16.msra.mxu1 %v7425_v17 }
 0x925   :  { %2433 = vmatprep.subr.bf16.mxu0 %v7426_v18  ;;  %2474 = vmatprep.subr.bf16.mxu1 %v7427_v19 }
 0x928   :  { %2434 = vmatpush1.bf16.msra.mxu0 %v7428_v21  ;;  %2475 = vmatpush1.bf16.msra.mxu1 %v7429_v22 }
 0x929   :  { %2435 = vmatprep.subr.bf16.mxu0 %v7430_v23  ;;  %2476 = vmatprep.subr.bf16.mxu1 %v7431_v25 }
 0x92c   :  { %2436 = vmatpush1.bf16.msra.mxu0 %v7432_v27  ;;  %2477 = vmatpush1.bf16.msra.mxu1 %v7433_v50 }
 0x92d   :  { %2437 = vmatprep.subr.bf16.mxu0 %v7434_v28  ;;  %2478 = vmatprep.subr.bf16.mxu1 %v7435_v29 }
 0x930   :  { %2438 = vmatpush1.bf16.msra.mxu0 %v7436_v44  ;;  %2479 = vmatpush1.bf16.msra.mxu1 %v7437_v45 }
 0x931   :  { %2439 = vmatprep.subr.bf16.mxu0 %v7438_v15  ;;  %2480 = vmatprep.subr.bf16.mxu1 %v7439_v11 }
 0x934   :  { %2440 = vmatpush1.bf16.msra.mxu0 %v7440_v8  ;;  %2481 = vmatpush1.bf16.msra.mxu1 %v7441_v9 }
 0x935   :  { %2441 = vmatprep.subr.bf16.mxu0 %v7442_v46  ;;  %2482 = vmatprep.subr.bf16.mxu1 %v7443_v37 }
 0x938   :  { %2442 = vmatpush1.bf16.msra.mxu0 %v7444_v36  ;;  %2483 = vmatpush1.bf16.msra.mxu1 %v7445_v33 }
 0x939   :  { %2542 = vmatprep.subr.bf16.mxu0 %v6005_v38  ;;  %2583 = vmatprep.subr.bf16.mxu1 %v6008_v7 }
 0x9ee   :  { %v2350_v57 = vpop.f32.mrb[52].mxu0  ;;  %v2391_v43 = vpop.f32.mrb[52].mxu1 }
 0x9ef   :  { %v2398_v55 = vadd.f32 %v2350_v57, %v7448_v59  ;;  %v2400_v2 = vadd.f32 %v2391_v43, %v7449_v56  ;;  %v2352_v3 = vpop.f32.mrb[53].mxu0  ;;  %v2393_v53 = vpop.f32.mrb[53].mxu1 }
 0x9f0   :  { %v2399_v61 = vadd.f32 %v2352_v3, %v7450_v0  ;;  %v2401_v10 = vadd.f32 %v2393_v53, %v7451_v5  ;;  %v2354_v52 = vpop.f32.mrb[54].mxu0  ;;  %v2395_v33 = vpop.f32.mrb[54].mxu1  ;;  %v6032_v0 = vld [vmem:[#allocation7 + $0x2c] ss:$16 sps:$4 sm:$0xff]   ;;  %v6040_v5 = vld [vmem:[#allocation7 + $0x28] ss:$16 sps:$4 sm:$0xff]  }
 0x9f1   :  { %v3702_v36 = vmul.f32 -1.442695, %v2398_v55  ;;  %v2355_v38 = vpop.f32.mrb[55].mxu0  ;;  %v2396_v37 = vpop.f32.mrb[55].mxu1  ;;  %7452 = vst [vmem:[#allocation24_spill] sm:$0xff] %v6032_v0  ;;  %7454 = vst [vmem:[#allocation26_spill] sm:$0xff] %v6040_v5 }
 0x9f2   :  { %v3703_v46 = vmul.f32 -1.442695, %v2399_v61  ;;  %v3704_v7 = vmul.f32 -1.442695, %v2401_v10  ;;  %v6037_v61 = vld [vmem:[#allocation7 + $0x20] ss:$16 sps:$4 sm:$0xff]  }
 0x9f3   :  { %4182 = vpow2.f32 %v3702_v36  ;;  %7453 = vst [vmem:[#allocation25_spill] sm:$0xff] %v6037_v61  ;;  %v6043_v10 = vld [vmem:[#allocation7 + $0x44] ss:$16 sps:$4 sm:$0xff]   ;;  %v6046_v52 = vld [vmem:[#allocation7 + $0x4c] ss:$16 sps:$4 sm:$0xff]  }
 0x9f4   :  { %4184 = vpow2.f32 %v3703_v46  ;;  %7455 = vst [vmem:[#allocation27_spill] sm:$0xff] %v6043_v10  ;;  %7456 = vst [vmem:[#allocation41_spill] sm:$0xff] %v6046_v52 }
 0x9f5   :  { %4186 = vpow2.f32 %v3704_v7 }
 0x9f6   :  { %4188 = vtanh.f32 %v2400_v2  ;;  %v6026_v2 = vld [vmem:[#allocation7 + $0x8] ss:$16 sps:$4 sm:$0xff]  }
 0x9fd   :  { %v4183_v9 = vpop.eup %4182 }
 0x9fe   :  { %v4185_v8 = vpop.eup %4184  ;;  %v2408_v57 = vadd.f32 1.0, %v4183_v9 }
 0x9ff   :  { %v2409_v43 = vadd.f32 1.0, %v4185_v8  ;;  %v4187_v59 = vpop.eup %4186  ;;  %v6023_v8 = vld [vmem:[#allocation7] ss:$16 sps:$4 sm:$0xff]  }
 0xa00   :  { %4190 = vrcp.f32 %v2408_v57  ;;  %v4189_v56 = vpop.eup %4188  ;;  %v2418_v55 = vadd.f32 1.0, %v4187_v59  ;;  %v6049_v57 = vld [vmem:[#allocation7 + $0x40] ss:$16 sps:$4 sm:$0xff]   ;;  %v6055_v59 = vld [vmem:[#allocation7 + $0x64] ss:$16 sps:$4 sm:$0xff]  }
 0xa01   :  { %4192 = vrcp.f32 %v2409_v43  ;;  %7457 = vst [vmem:[#allocation42_spill] sm:$0xff] %v6049_v57  ;;  %v6052_v43 = vld [vmem:[#allocation7 + $0x48] ss:$16 sps:$4 sm:$0xff]   ;;  %7459 = vst [vmem:[#allocation77_spill] sm:$0xff] %v6055_v59 }
 0xa02   :  { %4194 = vrcp.f32 %v2418_v55  ;;  %7458 = vst [vmem:[#allocation75_spill] sm:$0xff] %v6052_v43  ;;  %v6070_v55 = vld [vmem:[#allocation7 + $0x8c] ss:$16 sps:$4 sm:$0xff]  }
 0xa03   :  { %7464 = vst [vmem:[#allocation30_spill] sm:$0xff] %v6070_v55 }
 0xa0a   :  { %v4191_v3 = vpop.eup %4190 }
 0xa0b   :  { %v4193_v53 = vpop.eup %4192  ;;  %v2422_v33 = vmul.f32 %v4191_v3, %v4189_v56  ;;  %v6058_v56 = vld [vmem:[#allocation7 + $0x6c] ss:$16 sps:$4 sm:$0xff]   ;;  %v6061_v3 = vld [vmem:[#allocation7 + $0x60] ss:$16 sps:$4 sm:$0xff]  }
 0xa0c   :  { %v2421_v37 = vmul.f32 %v4193_v53, %v5888_v42  ;;  %v4195_v46 = vpop.eup %4194  ;;  %v6029_v42 = vld [vmem:[#allocation7 + $0x24] ss:$16 sps:$4 sm:$0xff]   ;;  %7460 = vst [vmem:[#allocation76_spill] sm:$0xff] %v6058_v56  ;;  %7461 = vst [vmem:[#allocation78_spill] sm:$0xff] %v6061_v3  ;;  %v6064_v53 = vld [vmem:[#allocation7 + $0x68] ss:$16 sps:$4 sm:$0xff]  }
 0xa0d   :  { %7462 = vst [vmem:[#allocation28_spill] sm:$0xff] %v6064_v53 }
 0xa0e   :  { %v6016_v38 = vadd.f32 %v2422_v33, %v2421_v37  ;;  %v6067_v33 = vld [vmem:[#allocation7 + $0x84] ss:$16 sps:$4 sm:$0xff]   ;;  %v6073_v37 = vld [vmem:[#allocation7 + $0x80] ss:$16 sps:$4 sm:$0xff]  }
 0xa0f   :  { %7463 = vst [vmem:[#allocation29_spill] sm:$0xff] %v6067_v33  ;;  %7465 = vst [vmem:[#allocation31_spill] sm:$0xff] %v6073_v37 }
 0xa10   :  { %4196 = vtanh.f32 %v6016_v38 }
 0xa1a   :  { %v4197_v9 = vpop.eup %4196 }
 0xa1b   :  { %v2425_v36 = vmul.f32 %v4197_v9, %v4195_v46  ;;  %v6076_v46 = vld [vmem:[#allocation7 + $0x88] ss:$16 sps:$4 sm:$0xff]   ;;  %v6079_v9 = vld [vmem:[#allocation7 + $0xa4] ss:$16 sps:$4 sm:$0xff]  }
 0xa1c   :  { %7466 = vst [vmem:[#allocation32_spill] sm:$0xff] %v6076_v46  ;;  %7467 = vst [vmem:[#allocation33_spill] sm:$0xff] %v6079_v9 }
 0xa1d   :  { %v6019_v7 = vpack.c.bf16 %v2425_v36, %v2425_v36  ;;  %v6082_v36 = vld [vmem:[#allocation7 + $0xac] ss:$16 sps:$4 sm:$0xff]  }
 0xa1e   :  { %7468 = vst [vmem:[#allocation34_spill] sm:$0xff] %v6082_v36 }
 0xa1f   :  { %2460 = vmatmul.mubr.bf16.vlgmr.msra.gmra.mrb[48].mxu0 %v6019_v7  ;;  %2501 = vmatmul.mubr.bf16.vlgmr.msra.gmra.mrb[48].mxu1 %v6019_v7 }
 0xa20   :  { %2543 = vmatpush1.bf16.msra.mxu0 %v6023_v8  ;;  %2584 = vmatpush1.bf16.msra.mxu1 %v6026_v2 }
 0xa21   :  { %2544 = vmatprep.subr.bf16.mxu0 %v6029_v42  ;;  %2585 = vmatprep.subr.bf16.mxu1 %v6032_v0 }
 0xa22   :  { %2574 = vmatprep.mubr.bf16.mxu0 %v7136_v20  ;;  %2615 = vmatprep.mubr.bf16.mxu1 %v7136_v20 }
 0xa24   :  { %2545 = vmatpush1.bf16.msra.mxu0 %v6037_v61  ;;  %2586 = vmatpush1.bf16.msra.mxu1 %v6040_v5 }
 0xa25   :  { %2546 = vmatprep.subr.bf16.mxu0 %v6043_v10  ;;  %2587 = vmatprep.subr.bf16.mxu1 %v6046_v52 }
 0xa28   :  { %2547 = vmatpush1.bf16.msra.mxu0 %v6049_v57  ;;  %2588 = vmatpush1.bf16.msra.mxu1 %v6052_v43 }
 0xa29   :  { %2548 = vmatprep.subr.bf16.mxu0 %v6055_v59  ;;  %2589 = vmatprep.subr.bf16.mxu1 %v6058_v56 }
 0xa2c   :  { %2549 = vmatpush1.bf16.msra.mxu0 %v6061_v3  ;;  %2590 = vmatpush1.bf16.msra.mxu1 %v6064_v53 }
 0xa2d   :  { %2550 = vmatprep.subr.bf16.mxu0 %v6067_v33  ;;  %2591 = vmatprep.subr.bf16.mxu1 %v6070_v55  ;;  %v6085_v33 = vld [vmem:[#allocation7 + $0xa0] ss:$16 sps:$4 sm:$0xff]   ;;  %v6088_v55 = vld [vmem:[#allocation7 + $0xa8] ss:$16 sps:$4 sm:$0xff]  }
 0xa2e   :  { %7469 = vst [vmem:[#allocation35_spill] sm:$0xff] %v6085_v33  ;;  %7470 = vst [vmem:[#allocation36_spill] sm:$0xff] %v6088_v55 }
 0xa30   :  { %2551 = vmatpush1.bf16.msra.mxu0 %v6073_v37  ;;  %2592 = vmatpush1.bf16.msra.mxu1 %v6076_v46  ;;  %v6091_v37 = vld [vmem:[#allocation7 + $0xc4] ss:$16 sps:$4 sm:$0xff]   ;;  %v6094_v46 = vld [vmem:[#allocation7 + $0xcc] ss:$16 sps:$4 sm:$0xff]  }
 0xa31   :  { %2552 = vmatprep.subr.bf16.mxu0 %v6079_v9  ;;  %2593 = vmatprep.subr.bf16.mxu1 %v6082_v36  ;;  %7471 = vst [vmem:[#allocation37_spill] sm:$0xff] %v6091_v37  ;;  %7472 = vst [vmem:[#allocation38_spill] sm:$0xff] %v6094_v46  ;;  %v6097_v9 = vld [vmem:[#allocation7 + $0xc0] ss:$16 sps:$4 sm:$0xff]   ;;  %v6100_v36 = vld [vmem:[#allocation7 + $0xc8] ss:$16 sps:$4 sm:$0xff]  }
 0xa32   :  { %7473 = vst [vmem:[#allocation39_spill] sm:$0xff] %v6097_v9  ;;  %7474 = vst [vmem:[#allocation40_spill] sm:$0xff] %v6100_v36 }
 0xa34   :  { %2553 = vmatpush1.bf16.msra.mxu0 %v6085_v33  ;;  %2594 = vmatpush1.bf16.msra.mxu1 %v6088_v55  ;;  %v6103_v33 = vld [vmem:[#allocation7 + $0xe4] ss:$16 sps:$4 sm:$0xff]   ;;  %v6106_v55 = vld [vmem:[#allocation7 + $0xec] ss:$16 sps:$4 sm:$0xff]  }
 0xa35   :  { %2554 = vmatprep.subr.bf16.mxu0 %v6091_v37  ;;  %2595 = vmatprep.subr.bf16.mxu1 %v6094_v46  ;;  %7475 = vst [vmem:[#allocation43_spill] sm:$0xff] %v6103_v33  ;;  %7476 = vst [vmem:[#allocation44_spill] sm:$0xff] %v6106_v55  ;;  %v6109_v37 = vld [vmem:[#allocation7 + $0xe0] ss:$16 sps:$4 sm:$0xff]   ;;  %v6112_v46 = vld [vmem:[#allocation7 + $0xe8] ss:$16 sps:$4 sm:$0xff]  }
 0xa36   :  { %7477 = vst [vmem:[#allocation45_spill] sm:$0xff] %v6109_v37  ;;  %7478 = vst [vmem:[#allocation46_spill] sm:$0xff] %v6112_v46 }
 0xa38   :  { %2555 = vmatpush1.bf16.msra.mxu0 %v6097_v9  ;;  %2596 = vmatpush1.bf16.msra.mxu1 %v6100_v36  ;;  %v6115_v9 = vld [vmem:[#allocation5 + $0x4] ss:$16 sps:$4 sm:$0xff]   ;;  %v6118_v36 = vld [vmem:[#allocation5 + $0xc] ss:$16 sps:$4 sm:$0xff]  }
 0xa39   :  { %2556 = vmatprep.subr.bf16.mxu0 %v6103_v33  ;;  %2597 = vmatprep.subr.bf16.mxu1 %v6106_v55  ;;  %7479 = vst [vmem:[#allocation47_spill] sm:$0xff] %v6115_v9  ;;  %7480 = vst [vmem:[#allocation48_spill] sm:$0xff] %v6118_v36 }
 0xa3c   :  { %2557 = vmatpush1.bf16.msra.mxu0 %v6109_v37  ;;  %2598 = vmatpush1.bf16.msra.mxu1 %v6112_v46 }
 0xa3d   :  { %2624 = vmatprep.subr.bf16.mxu0 %v6115_v9  ;;  %2665 = vmatprep.subr.bf16.mxu1 %v6118_v36 }
 0xaf2   :  { %v2461_v33 = vpop.f32.mrb[48].mxu0  ;;  %v2502_v53 = vpop.f32.mrb[48].mxu1 }
 0xaf3   :  { %v3819_v55 = vadd.f32 %v2461_v33, %v7401_v24  ;;  %v2463_v3 = vpop.f32.mrb[49].mxu0  ;;  %v2504_v56 = vpop.f32.mrb[49].mxu1  ;;  %v3821_v36 = vadd.f32 %v2502_v53, %v5271_v34 }
 0xaf4   :  { %v3820_v37 = vadd.f32 %v2463_v3, %v5260_v13  ;;  %v2465_v59 = vpop.f32.mrb[50].mxu0  ;;  %v2506_v43 = vpop.f32.mrb[50].mxu1  ;;  %v3822_v9 = vadd.f32 %v2504_v56, %v5266_v31 }
 0xaf5   :  { %v3705_v57 = vmul.f32 -1.442695, %v3819_v55  ;;  %v2466_v46 = vpop.f32.mrb[51].mxu0  ;;  %v2507_v52 = vpop.f32.mrb[51].mxu1 }
 0xaf6   :  { %v3706_v10 = vmul.f32 -1.442695, %v3820_v37  ;;  %v3707_v5 = vmul.f32 -1.442695, %v3822_v9  ;;  %v6138_v46 = vld [vmem:[#allocation5 + $0x2c] ss:$16 sps:$4 sm:$0xff]  }
 0xaf7   :  { %4198 = vpow2.f32 %v3705_v57  ;;  %v6143_v9 = vld [vmem:[#allocation5 + $0x20] ss:$16 sps:$4 sm:$0xff]  }
 0xaf8   :  { %4200 = vpow2.f32 %v3706_v10 }
 0xaf9   :  { %4202 = vpow2.f32 %v3707_v5 }
 0xafa   :  { %4204 = vtanh.f32 %v3821_v36  ;;  %v6146_v36 = vld [vmem:[#allocation5 + $0x28] ss:$16 sps:$4 sm:$0xff]  }
 0xb01   :  { %v4199_v61 = vpop.eup %4198 }
 0xb02   :  { %v4201_v0 = vpop.eup %4200  ;;  %v2519_v33 = vadd.f32 1.0, %v4199_v61 }
 0xb03   :  { %v2520_v24 = vadd.f32 1.0, %v4201_v0  ;;  %v4203_v43 = vpop.eup %4202  ;;  %v6132_v0 = vld [vmem:[#allocation5 + $0x8] ss:$16 sps:$4 sm:$0xff]  }
 0xb04   :  { %4206 = vrcp.f32 %v2519_v33  ;;  %v4205_v59 = vpop.eup %4204  ;;  %v2529_v57 = vadd.f32 1.0, %v4203_v43  ;;  %v6149_v33 = vld [vmem:[#allocation5 + $0x44] ss:$16 sps:$4 sm:$0xff]   ;;  %v6152_v43 = vld [vmem:[#allocation5 + $0x4c] ss:$16 sps:$4 sm:$0xff]  }
 0xb05   :  { %4208 = vrcp.f32 %v2520_v24  ;;  %v6129_v24 = vld [vmem:[#allocation5] ss:$16 sps:$4 sm:$0xff]  }
 0xb06   :  { %4210 = vrcp.f32 %v2529_v57  ;;  %v6167_v57 = vld [vmem:[#allocation5 + $0x60] ss:$16 sps:$4 sm:$0xff]  }
 0xb07   :  { %7481 = vst [vmem:[#allocation49_spill] sm:$0xff] %v6167_v57 }
 0xb0e   :  { %v4207_v3 = vpop.eup %4206 }
 0xb0f   :  { %v4209_v52 = vpop.eup %4208  ;;  %v2533_v55 = vmul.f32 %v4207_v3, %v4205_v59  ;;  %v6155_v59 = vld [vmem:[#allocation5 + $0x40] ss:$16 sps:$4 sm:$0xff]   ;;  %v6158_v3 = vld [vmem:[#allocation5 + $0x48] ss:$16 sps:$4 sm:$0xff]  }
 0xb10   :  { %v2532_v10 = vmul.f32 %v4209_v52, %v5934_v51  ;;  %v4211_v53 = vpop.eup %4210  ;;  %v6135_v51 = vld [vmem:[#allocation5 + $0x24] ss:$16 sps:$4 sm:$0xff]  }
 0xb11   :  { %v6161_v52 = vld [vmem:[#allocation5 + $0x64] ss:$16 sps:$4 sm:$0xff]  }
 0xb12   :  { %v6126_v56 = vadd.f32 %v2533_v55, %v2532_v10  ;;  %v6164_v55 = vld [vmem:[#allocation5 + $0x6c] ss:$16 sps:$4 sm:$0xff]   ;;  %v6170_v10 = vld [vmem:[#allocation5 + $0x68] ss:$16 sps:$4 sm:$0xff]  }
 0xb13   :  { %7482 = vst [vmem:[#allocation50_spill] sm:$0xff] %v6170_v10 }
 0xb14   :  { %4212 = vtanh.f32 %v6126_v56 }
 0xb1e   :  { %v4213_v61 = vpop.eup %4212 }
 0xb1f   :  { %v2536_v5 = vmul.f32 %v4213_v61, %v4211_v53  ;;  %v6173_v53 = vld [vmem:[#allocation5 + $0x84] ss:$16 sps:$4 sm:$0xff]   ;;  %v6176_v61 = vld [vmem:[#allocation5 + $0x8c] ss:$16 sps:$4 sm:$0xff]  }
 0xb21   :  { %v2541_v37 = vpack.c.bf16 %v2536_v5, %v2536_v5  ;;  %v6179_v5 = vld [vmem:[#allocation5 + $0x80] ss:$16 sps:$4 sm:$0xff]  }
 0xb23   :  { %2575 = vmatmul.mubr.bf16.vlgmr.msra.gmra.mrb[56].mxu0 %v2541_v37  ;;  %2616 = vmatmul.mubr.bf16.vlgmr.msra.gmra.mrb[56].mxu1 %v2541_v37  ;;  %v6182_v37 = vld [vmem:[#allocation5 + $0x88] ss:$16 sps:$4 sm:$0xff]  }
 0xb24   :  { %2625 = vmatpush1.bf16.msra.mxu0 %v6129_v24  ;;  %2666 = vmatpush1.bf16.msra.mxu1 %v6132_v0 }
 0xb25   :  { %2626 = vmatprep.subr.bf16.mxu0 %v6135_v51  ;;  %2667 = vmatprep.subr.bf16.mxu1 %v6138_v46 }
 0xb26   :  { %2656 = vmatprep.mubr.bf16.mxu0 %v7136_v20  ;;  %2697 = vmatprep.mubr.bf16.mxu1 %v7136_v20 }
 0xb28   :  { %2627 = vmatpush1.bf16.msra.mxu0 %v6143_v9  ;;  %2668 = vmatpush1.bf16.msra.mxu1 %v6146_v36 }
 0xb29   :  { %2628 = vmatprep.subr.bf16.mxu0 %v6149_v33  ;;  %2669 = vmatprep.subr.bf16.mxu1 %v6152_v43 }
 0xb2c   :  { %2629 = vmatpush1.bf16.msra.mxu0 %v6155_v59  ;;  %2670 = vmatpush1.bf16.msra.mxu1 %v6158_v3 }
 0xb2d   :  { %2630 = vmatprep.subr.bf16.mxu0 %v6161_v52  ;;  %2671 = vmatprep.subr.bf16.mxu1 %v6164_v55 }
 0xb30   :  { %2631 = vmatpush1.bf16.msra.mxu0 %v6167_v57  ;;  %2672 = vmatpush1.bf16.msra.mxu1 %v6170_v10  ;;  %v6185_v57 = vld [vmem:[#allocation5 + $0xa4] ss:$16 sps:$4 sm:$0xff]   ;;  %v6188_v10 = vld [vmem:[#allocation5 + $0xac] ss:$16 sps:$4 sm:$0xff]  }
 0xb31   :  { %2632 = vmatprep.subr.bf16.mxu0 %v6173_v53  ;;  %2673 = vmatprep.subr.bf16.mxu1 %v6176_v61  ;;  %7483 = vst [vmem:[#allocation51_spill] sm:$0xff] %v6185_v57  ;;  %7484 = vst [vmem:[#allocation52_spill] sm:$0xff] %v6188_v10 }
 0xb34   :  { %2633 = vmatpush1.bf16.msra.mxu0 %v6179_v5  ;;  %2674 = vmatpush1.bf16.msra.mxu1 %v6182_v37 }
 0xb35   :  { %2634 = vmatprep.subr.bf16.mxu0 %v6185_v57  ;;  %2675 = vmatprep.subr.bf16.mxu1 %v6188_v10 }
 0xb38   :  { %2635 = vmatpush1.bf16.msra.mxu0 %v7404_v54  ;;  %2676 = vmatpush1.bf16.msra.mxu1 %v7405_v63  ;;  %v7485_v54 = vld [vmem:[#allocation16_spill] sm:$0xff]  ;;  %v7486_v63 = vld [vmem:[#allocation17_spill] sm:$0xff] }
 0xb39   :  { %2636 = vmatprep.subr.bf16.mxu0 %v7406_v35  ;;  %2677 = vmatprep.subr.bf16.mxu1 %v7407_v58  ;;  %v7487_v35 = vld [vmem:[#allocation18_spill] sm:$0xff]  ;;  %v7488_v58 = vld [vmem:[#allocation19_spill] sm:$0xff] }
 0xb3c   :  { %2637 = vmatpush1.bf16.msra.mxu0 %v7408_v40  ;;  %2678 = vmatpush1.bf16.msra.mxu1 %v7409_v4  ;;  %v7489_v40 = vld [vmem:[#allocation20_spill] sm:$0xff]  ;;  %v7490_v4 = vld [vmem:[#allocation21_spill] sm:$0xff] }
 0xb3d   :  { %2638 = vmatprep.subr.bf16.mxu0 %v7410_v47  ;;  %2679 = vmatprep.subr.bf16.mxu1 %v7411_v62  ;;  %v7491_v47 = vld [vmem:[#allocation22_spill] sm:$0xff]  ;;  %v7492_v62 = vld [vmem:[#allocation23_spill] sm:$0xff] }
 0xb40   :  { %2639 = vmatpush1.bf16.msra.mxu0 %v7412_v1  ;;  %2680 = vmatpush1.bf16.msra.mxu1 %v7413_v48 }
 0xb41   :  { %2735 = vmatprep.subr.bf16.mxu0 %v7414_v30  ;;  %2776 = vmatprep.subr.bf16.mxu1 %v7415_v6  ;;  %v7493_v30 = vld [vmem:[#allocation83_spill] sm:$0xff] }
 0xb43   :  { %2657 = vmatmul.mubr.bf16.vlgmr.msra.gmra.mrb[60].mxu0 %v6019_v7  ;;  %2698 = vmatmul.mubr.bf16.vlgmr.msra.gmra.mrb[60].mxu1 %v6019_v7 }
 0xb44   :  { %2736 = vmatpush1.bf16.msra.mxu0 %v7416_v26  ;;  %2777 = vmatpush1.bf16.msra.mxu1 %v7417_v60  ;;  %v7494_v26 = vld [vmem:[#allocation85_spill] sm:$0xff] }
 0xb45   :  { %2737 = vmatprep.subr.bf16.mxu0 %v7418_v39  ;;  %2778 = vmatprep.subr.bf16.mxu1 %v7419_v49 }
 0xb46   :  { %2767 = vmatprep.mubr.bf16.mxu0 %v7136_v20  ;;  %2808 = vmatprep.mubr.bf16.mxu1 %v7136_v20 }
 0xb48   :  { %2738 = vmatpush1.bf16.msra.mxu0 %v7420_v32  ;;  %2779 = vmatpush1.bf16.msra.mxu1 %v7421_v12  ;;  %v7495_v32 = vld [vmem:[#allocation84_spill] sm:$0xff] }
 0xb49   :  { %2739 = vmatprep.subr.bf16.mxu0 %v7422_v14  ;;  %2780 = vmatprep.subr.bf16.mxu1 %v7423_v16  ;;  %v7496_v14 = vld [vmem:[#allocation86_spill] sm:$0xff] }
 0xb4c   :  { %2740 = vmatpush1.bf16.msra.mxu0 %v7424_v41  ;;  %2781 = vmatpush1.bf16.msra.mxu1 %v7425_v17 }
 0xb4d   :  { %2741 = vmatprep.subr.bf16.mxu0 %v7426_v18  ;;  %2782 = vmatprep.subr.bf16.mxu1 %v7427_v19 }
 0xb50   :  { %2742 = vmatpush1.bf16.msra.mxu0 %v7428_v21  ;;  %2783 = vmatpush1.bf16.msra.mxu1 %v7429_v22 }
 0xb51   :  { %2743 = vmatprep.subr.bf16.mxu0 %v7430_v23  ;;  %2784 = vmatprep.subr.bf16.mxu1 %v7431_v25 }
 0xb54   :  { %2744 = vmatpush1.bf16.msra.mxu0 %v7432_v27  ;;  %2785 = vmatpush1.bf16.msra.mxu1 %v7433_v50 }
 0xb55   :  { %2745 = vmatprep.subr.bf16.mxu0 %v7434_v28  ;;  %2786 = vmatprep.subr.bf16.mxu1 %v7435_v29 }
 0xb58   :  { %2746 = vmatpush1.bf16.msra.mxu0 %v7436_v44  ;;  %2787 = vmatpush1.bf16.msra.mxu1 %v7437_v45 }
 0xb59   :  { %2747 = vmatprep.subr.bf16.mxu0 %v7438_v15  ;;  %2788 = vmatprep.subr.bf16.mxu1 %v7439_v11 }
 0xb5c   :  { %2748 = vmatpush1.bf16.msra.mxu0 %v7485_v54  ;;  %2789 = vmatpush1.bf16.msra.mxu1 %v7486_v63 }
 0xb5d   :  { %2749 = vmatprep.subr.bf16.mxu0 %v7487_v35  ;;  %2790 = vmatprep.subr.bf16.mxu1 %v7488_v58 }
 0xb60   :  { %2750 = vmatpush1.bf16.msra.mxu0 %v7489_v40  ;;  %2791 = vmatpush1.bf16.msra.mxu1 %v7490_v4 }
 0xb61   :  { %2850 = vmatprep.subr.bf16.mxu0 %v7491_v47  ;;  %2891 = vmatprep.subr.bf16.mxu1 %v7492_v62 }
 0xc16   :  { %v2658_v1 = vpop.f32.mrb[60].mxu0  ;;  %v2699_v48 = vpop.f32.mrb[60].mxu1 }
 0xc17   :  { %v2706_v6 = vadd.f32 %v2658_v1, %v7493_v30  ;;  %v2708_v60 = vadd.f32 %v2699_v48, %v7494_v26  ;;  %v2660_v39 = vpop.f32.mrb[61].mxu0  ;;  %v2701_v49 = vpop.f32.mrb[61].mxu1  ;;  %v7498_v1 = vld [vmem:[#allocation25_spill] sm:$0xff]  ;;  %v7499_v48 = vld [vmem:[#allocation26_spill] sm:$0xff]  ;;  %v7500_v30 = vld [vmem:[#allocation27_spill] sm:$0xff] }
 0xc18   :  { %v2707_v12 = vadd.f32 %v2660_v39, %v7495_v32  ;;  %v2709_v16 = vadd.f32 %v2701_v49, %v7496_v14  ;;  %v2662_v41 = vpop.f32.mrb[62].mxu0  ;;  %v2703_v17 = vpop.f32.mrb[62].mxu1  ;;  %v7502_v26 = vld [vmem:[#allocation42_spill] sm:$0xff]  ;;  %v7504_v39 = vld [vmem:[#allocation77_spill] sm:$0xff]  ;;  %v7505_v49 = vld [vmem:[#allocation76_spill] sm:$0xff] }
 0xc19   :  { %v3708_v18 = vmul.f32 -1.442695, %v2706_v6  ;;  %v2663_v19 = vpop.f32.mrb[63].mxu0  ;;  %v2704_v21 = vpop.f32.mrb[63].mxu1  ;;  %v7501_v6 = vld [vmem:[#allocation41_spill] sm:$0xff]  ;;  %v7506_v32 = vld [vmem:[#allocation78_spill] sm:$0xff] }
 0xc1a   :  { %v3709_v22 = vmul.f32 -1.442695, %v2707_v12  ;;  %v3710_v23 = vmul.f32 -1.442695, %v2709_v16  ;;  %v7507_v12 = vld [vmem:[#allocation28_spill] sm:$0xff]  ;;  %v7508_v14 = vld [vmem:[#allocation29_spill] sm:$0xff] }
 0xc1b   :  { %4214 = vpow2.f32 %v3708_v18  ;;  %v7509_v16 = vld [vmem:[#allocation30_spill] sm:$0xff]  ;;  %v7510_v41 = vld [vmem:[#allocation31_spill] sm:$0xff]  ;;  %v7511_v17 = vld [vmem:[#allocation32_spill] sm:$0xff] }
 0xc1c   :  { %4216 = vpow2.f32 %v3709_v22  ;;  %v7512_v18 = vld [vmem:[#allocation33_spill] sm:$0xff]  ;;  %v7513_v19 = vld [vmem:[#allocation34_spill] sm:$0xff]  ;;  %v7514_v21 = vld [vmem:[#allocation35_spill] sm:$0xff] }
 0xc1d   :  { %4218 = vpow2.f32 %v3710_v23  ;;  %v7515_v22 = vld [vmem:[#allocation36_spill] sm:$0xff]  ;;  %v7516_v23 = vld [vmem:[#allocation37_spill] sm:$0xff] }
 0xc1e   :  { %4220 = vtanh.f32 %v2708_v60  ;;  %v7503_v60 = vld [vmem:[#allocation75_spill] sm:$0xff] }
 0xc25   :  { %v4215_v25 = vpop.eup %4214 }
 0xc26   :  { %v4217_v27 = vpop.eup %4216  ;;  %v2716_v50 = vadd.f32 1.0, %v4215_v25  ;;  %v7517_v25 = vld [vmem:[#allocation38_spill] sm:$0xff] }
 0xc27   :  { %v2717_v28 = vadd.f32 1.0, %v4217_v27  ;;  %v4219_v29 = vpop.eup %4218  ;;  %v7518_v27 = vld [vmem:[#allocation39_spill] sm:$0xff] }
 0xc28   :  { %4222 = vrcp.f32 %v2716_v50  ;;  %v4221_v44 = vpop.eup %4220  ;;  %v2726_v7 = vadd.f32 1.0, %v4219_v29  ;;  %v7519_v50 = vld [vmem:[#allocation40_spill] sm:$0xff] }
 0xc29   :  { %4224 = vrcp.f32 %v2717_v28  ;;  %v7520_v28 = vld [vmem:[#allocation43_spill] sm:$0xff]  ;;  %v7521_v29 = vld [vmem:[#allocation44_spill] sm:$0xff] }
 0xc2a   :  { %4226 = vrcp.f32 %v2726_v7 }
 0xc32   :  { %v4223_v45 = vpop.eup %4222 }
 0xc33   :  { %v4225_v15 = vpop.eup %4224  ;;  %v2730_v11 = vmul.f32 %v4223_v45, %v4221_v44  ;;  %v7522_v44 = vld [vmem:[#allocation45_spill] sm:$0xff]  ;;  %v7523_v45 = vld [vmem:[#allocation46_spill] sm:$0xff] }
 0xc34   :  { %v2729_v54 = vmul.f32 %v4225_v15, %v6016_v38  ;;  %v4227_v35 = vpop.eup %4226  ;;  %v7497_v38 = vld [vmem:[#allocation24_spill] sm:$0xff]  ;;  %v7524_v15 = vld [vmem:[#allocation47_spill] sm:$0xff] }
 0xc36   :  { %v6244_v63 = vadd.f32 %v2730_v11, %v2729_v54  ;;  %v7525_v11 = vld [vmem:[#allocation48_spill] sm:$0xff] }
 0xc38   :  { %4228 = vtanh.f32 %v6244_v63 }
 0xc42   :  { %v4229_v58 = vpop.eup %4228 }
 0xc43   :  { %v2733_v40 = vmul.f32 %v4229_v58, %v4227_v35  ;;  %v7526_v35 = vld [vmem:[#allocation95_spill] sm:$0xff] }
 0xc45   :  { %v6247_v4 = vpack.c.bf16 %v2733_v40, %v2733_v40 }
 0xc47   :  { %2768 = vmatmul.mubr.bf16.vlgmr.msra.gmra.mrb[56].mxu0 %v6247_v4  ;;  %2809 = vmatmul.mubr.bf16.vlgmr.msra.gmra.mrb[56].mxu1 %v6247_v4 }
 0xc48   :  { %2851 = vmatpush1.bf16.msra.mxu0 %v6023_v8  ;;  %2892 = vmatpush1.bf16.msra.mxu1 %v6026_v2 }
 0xc49   :  { %2852 = vmatprep.subr.bf16.mxu0 %v6029_v42  ;;  %2893 = vmatprep.subr.bf16.mxu1 %v7497_v38 }
 0xc4a   :  { %2882 = vmatprep.mubr.bf16.mxu0 %v7136_v20  ;;  %2923 = vmatprep.mubr.bf16.mxu1 %v7136_v20 }
 0xc4c   :  { %2853 = vmatpush1.bf16.msra.mxu0 %v7498_v1  ;;  %2894 = vmatpush1.bf16.msra.mxu1 %v7499_v48 }
 0xc4d   :  { %2854 = vmatprep.subr.bf16.mxu0 %v7500_v30  ;;  %2895 = vmatprep.subr.bf16.mxu1 %v7501_v6 }
 0xc50   :  { %2855 = vmatpush1.bf16.msra.mxu0 %v7502_v26  ;;  %2896 = vmatpush1.bf16.msra.mxu1 %v7503_v60 }
 0xc51   :  { %2856 = vmatprep.subr.bf16.mxu0 %v7504_v39  ;;  %2897 = vmatprep.subr.bf16.mxu1 %v7505_v49 }
 0xc54   :  { %2857 = vmatpush1.bf16.msra.mxu0 %v7506_v32  ;;  %2898 = vmatpush1.bf16.msra.mxu1 %v7507_v12 }
 0xc55   :  { %2858 = vmatprep.subr.bf16.mxu0 %v7508_v14  ;;  %2899 = vmatprep.subr.bf16.mxu1 %v7509_v16 }
 0xc58   :  { %2859 = vmatpush1.bf16.msra.mxu0 %v7510_v41  ;;  %2900 = vmatpush1.bf16.msra.mxu1 %v7511_v17 }
 0xc59   :  { %2860 = vmatprep.subr.bf16.mxu0 %v7512_v18  ;;  %2901 = vmatprep.subr.bf16.mxu1 %v7513_v19 }
 0xc5c   :  { %2861 = vmatpush1.bf16.msra.mxu0 %v7514_v21  ;;  %2902 = vmatpush1.bf16.msra.mxu1 %v7515_v22 }
 0xc5d   :  { %2862 = vmatprep.subr.bf16.mxu0 %v7516_v23  ;;  %2903 = vmatprep.subr.bf16.mxu1 %v7517_v25 }
 0xc60   :  { %2863 = vmatpush1.bf16.msra.mxu0 %v7518_v27  ;;  %2904 = vmatpush1.bf16.msra.mxu1 %v7519_v50 }
 0xc61   :  { %2864 = vmatprep.subr.bf16.mxu0 %v7520_v28  ;;  %2905 = vmatprep.subr.bf16.mxu1 %v7521_v29 }
 0xc64   :  { %2865 = vmatpush1.bf16.msra.mxu0 %v7522_v44  ;;  %2906 = vmatpush1.bf16.msra.mxu1 %v7523_v45 }
 0xc65   :  { %2932 = vmatprep.subr.bf16.mxu0 %v7524_v15  ;;  %2973 = vmatprep.subr.bf16.mxu1 %v7525_v11 }
 0xd1a   :  { %v2769_v7 = vpop.f32.mrb[56].mxu0  ;;  %v2810_v54 = vpop.f32.mrb[56].mxu1 }
 0xd1b   :  { %v3823_v58 = vadd.f32 %v2769_v7, %v7526_v35  ;;  %v2771_v40 = vpop.f32.mrb[57].mxu0  ;;  %v2812_v27 = vpop.f32.mrb[57].mxu1  ;;  %v3825_v11 = vadd.f32 %v2810_v54, %v5271_v34  ;;  %v6315_v54 = vld [vmem:[#allocation5 + $0xa0] ss:$16 sps:$4 sm:$0xff]  }
 0xd1c   :  { %v3824_v50 = vadd.f32 %v2771_v40, %v5260_v13  ;;  %v2773_v25 = vpop.f32.mrb[58].mxu0  ;;  %v2814_v28 = vpop.f32.mrb[58].mxu1  ;;  %v3826_v15 = vadd.f32 %v2812_v27, %v5266_v31  ;;  %7529 = vst [vmem:[#allocation53_spill] sm:$0xff] %v6315_v54  ;;  %v6324_v40 = vld [vmem:[#allocation5 + $0xcc] ss:$16 sps:$4 sm:$0xff]  }
 0xd1d   :  { %v3711_v23 = vmul.f32 -1.442695, %v3823_v58  ;;  %v2774_v29 = vpop.f32.mrb[59].mxu0  ;;  %v2815_v22 = vpop.f32.mrb[59].mxu1  ;;  %v6321_v58 = vld [vmem:[#allocation5 + $0xc4] ss:$16 sps:$4 sm:$0xff]  }
 0xd1e   :  { %v3712_v44 = vmul.f32 -1.442695, %v3824_v50  ;;  %v3713_v45 = vmul.f32 -1.442695, %v3826_v15  ;;  %7531 = vst [vmem:[#allocation55_spill] sm:$0xff] %v6321_v58  ;;  %7532 = vst [vmem:[#allocation56_spill] sm:$0xff] %v6324_v40 }
 0xd1f   :  { %4230 = vpow2.f32 %v3711_v23 }
 0xd20   :  { %4232 = vpow2.f32 %v3712_v44 }
 0xd21   :  { %4234 = vpow2.f32 %v3713_v45 }
 0xd22   :  { %4236 = vtanh.f32 %v3825_v11 }
 0xd29   :  { %v4231_v21 = vpop.eup %4230 }
 0xd2a   :  { %v4233_v19 = vpop.eup %4232  ;;  %v2827_v7 = vadd.f32 1.0, %v4231_v21 }
 0xd2b   :  { %v2828_v35 = vadd.f32 1.0, %v4233_v19  ;;  %v4235_v25 = vpop.eup %4234  ;;  %v7528_v19 = vld [vmem:[#allocation50_spill] sm:$0xff] }
 0xd2c   :  { %4238 = vrcp.f32 %v2827_v7  ;;  %v4237_v28 = vpop.eup %4236  ;;  %v2837_v23 = vadd.f32 1.0, %v4235_v25  ;;  %v6327_v7 = vld [vmem:[#allocation5 + $0xc0] ss:$16 sps:$4 sm:$0xff]   ;;  %v6330_v25 = vld [vmem:[#allocation5 + $0xc8] ss:$16 sps:$4 sm:$0xff]  }
 0xd2d   :  { %4240 = vrcp.f32 %v2828_v35  ;;  %v6318_v35 = vld [vmem:[#allocation5 + $0xa8] ss:$16 sps:$4 sm:$0xff]   ;;  %7533 = vst [vmem:[#allocation57_spill] sm:$0xff] %v6327_v7  ;;  %7534 = vst [vmem:[#allocation58_spill] sm:$0xff] %v6330_v25 }
 0xd2e   :  { %4242 = vrcp.f32 %v2837_v23  ;;  %7530 = vst [vmem:[#allocation54_spill] sm:$0xff] %v6318_v35  ;;  %v6348_v23 = vld [vmem:[%s6734_s4 + $0x4] ss:$16 sps:$4 sm:$0xff]  }
 0xd2f   :  { %7539 = vst [vmem:[#allocation68_spill] sm:$0xff] %v6348_v23 }
 0xd36   :  { %v4239_v29 = vpop.eup %4238 }
 0xd37   :  { %v4241_v22 = vpop.eup %4240  ;;  %v2841_v50 = vmul.f32 %v4239_v29, %v4237_v28  ;;  %v6333_v28 = vld [vmem:[#allocation5 + $0xe4] ss:$16 sps:$4 sm:$0xff]   ;;  %v6336_v29 = vld [vmem:[#allocation5 + $0xec] ss:$16 sps:$4 sm:$0xff]  }
 0xd38   :  { %v2840_v44 = vmul.f32 %v4241_v22, %v6126_v56  ;;  %v4243_v15 = vpop.eup %4242  ;;  %v7527_v56 = vld [vmem:[#allocation49_spill] sm:$0xff]  ;;  %7535 = vst [vmem:[#allocation59_spill] sm:$0xff] %v6333_v28  ;;  %7536 = vst [vmem:[#allocation60_spill] sm:$0xff] %v6336_v29  ;;  %v6339_v22 = vld [vmem:[#allocation5 + $0xe0] ss:$16 sps:$4 sm:$0xff]  }
 0xd39   :  { %7537 = vst [vmem:[#allocation67_spill] sm:$0xff] %v6339_v22 }
 0xd3a   :  { %v6290_v27 = vadd.f32 %v2841_v50, %v2840_v44  ;;  %v6342_v50 = vld [vmem:[#allocation5 + $0xe8] ss:$16 sps:$4 sm:$0xff]   ;;  %v6354_v44 = vld [vmem:[%s6734_s4 + $0xc] ss:$16 sps:$4 sm:$0xff]  }
 0xd3b   :  { %7538 = vst [vmem:[#allocation69_spill] sm:$0xff] %v6342_v50  ;;  %7540 = vst [vmem:[#allocation70_spill] sm:$0xff] %v6354_v44 }
 0xd3c   :  { %4244 = vtanh.f32 %v6290_v27 }
 0xd46   :  { %v4245_v21 = vpop.eup %4244 }
 0xd47   :  { %v2844_v45 = vmul.f32 %v4245_v21, %v4243_v15  ;;  %v6362_v15 = vld [vmem:[%s6734_s4] ss:$16 sps:$4 sm:$0xff]   ;;  %v6368_v21 = vld [vmem:[%s6734_s4 + $0x8] ss:$16 sps:$4 sm:$0xff]  }
 0xd48   :  { %7541 = vst [vmem:[#allocation61_spill] sm:$0xff] %v6362_v15  ;;  %7542 = vst [vmem:[#allocation62_spill] sm:$0xff] %v6368_v21 }
 0xd49   :  { %v2849_v11 = vpack.c.bf16 %v2844_v45, %v2844_v45  ;;  %v6374_v45 = vld [vmem:[%s6734_s4 + $0x24] ss:$16 sps:$4 sm:$0xff]  }
 0xd4a   :  { %7543 = vst [vmem:[#allocation63_spill] sm:$0xff] %v6374_v45 }
 0xd4b   :  { %2883 = vmatmul.mubr.bf16.vlgmr.msra.gmra.mrb[64].mxu0 %v2849_v11  ;;  %2924 = vmatmul.mubr.bf16.vlgmr.msra.gmra.mrb[64].mxu1 %v2849_v11  ;;  %v6388_v11 = vld [vmem:[%s6734_s4 + $0x20] ss:$16 sps:$4 sm:$0xff]  }
 0xd4c   :  { %2933 = vmatpush1.bf16.msra.mxu0 %v6129_v24  ;;  %2974 = vmatpush1.bf16.msra.mxu1 %v6132_v0  ;;  %7545 = vst [vmem:[#allocation65_spill] sm:$0xff] %v6388_v11 }
 0xd4d   :  { %2934 = vmatprep.subr.bf16.mxu0 %v6135_v51  ;;  %2975 = vmatprep.subr.bf16.mxu1 %v6138_v46 }
 0xd4e   :  { %2964 = vmatprep.mubr.bf16.mxu0 %v7136_v20  ;;  %3005 = vmatprep.mubr.bf16.mxu1 %v7136_v20 }
 0xd50   :  { %2935 = vmatpush1.bf16.msra.mxu0 %v6143_v9  ;;  %2976 = vmatpush1.bf16.msra.mxu1 %v6146_v36 }
 0xd51   :  { %2936 = vmatprep.subr.bf16.mxu0 %v6149_v33  ;;  %2977 = vmatprep.subr.bf16.mxu1 %v6152_v43 }
 0xd54   :  { %2937 = vmatpush1.bf16.msra.mxu0 %v6155_v59  ;;  %2978 = vmatpush1.bf16.msra.mxu1 %v6158_v3 }
 0xd55   :  { %2938 = vmatprep.subr.bf16.mxu0 %v6161_v52  ;;  %2979 = vmatprep.subr.bf16.mxu1 %v6164_v55 }
 0xd58   :  { %2939 = vmatpush1.bf16.msra.mxu0 %v7527_v56  ;;  %2980 = vmatpush1.bf16.msra.mxu1 %v7528_v19 }
 0xd59   :  { %2940 = vmatprep.subr.bf16.mxu0 %v6173_v53  ;;  %2981 = vmatprep.subr.bf16.mxu1 %v6176_v61 }
 0xd5c   :  { %2941 = vmatpush1.bf16.msra.mxu0 %v6179_v5  ;;  %2982 = vmatpush1.bf16.msra.mxu1 %v6182_v37 }
 0xd5d   :  { %2942 = vmatprep.subr.bf16.mxu0 %v6185_v57  ;;  %2983 = vmatprep.subr.bf16.mxu1 %v6188_v10 }
 0xd60   :  { %2943 = vmatpush1.bf16.msra.mxu0 %v6315_v54  ;;  %2984 = vmatpush1.bf16.msra.mxu1 %v6318_v35 }
 0xd61   :  { %2944 = vmatprep.subr.bf16.mxu0 %v6321_v58  ;;  %2985 = vmatprep.subr.bf16.mxu1 %v6324_v40 }
 0xd64   :  { %2945 = vmatpush1.bf16.msra.mxu0 %v6327_v7  ;;  %2986 = vmatpush1.bf16.msra.mxu1 %v6330_v25  ;;  %v7574_v25 = vld [vmem:[#allocation90_spill] sm:$0xff] }
 0xd65   :  { %2946 = vmatprep.subr.bf16.mxu0 %v6333_v28  ;;  %2987 = vmatprep.subr.bf16.mxu1 %v6336_v29 }
 0xd68   :  { %2947 = vmatpush1.bf16.msra.mxu0 %v6339_v22  ;;  %2988 = vmatpush1.bf16.msra.mxu1 %v6342_v50 }
 0xd69   :  { %3043 = vmatprep.subr.bf16.mxu0 %v6348_v23  ;;  %3084 = vmatprep.subr.bf16.mxu1 %v6354_v44  ;;  %v7572_v23 = vld [vmem:[#allocation89_spill] sm:$0xff] }
 0xd6b   :  { %2965 = vmatmul.mubr.bf16.vlgmr.msra.gmra.mrb[68].mxu0 %v6247_v4  ;;  %3006 = vmatmul.mubr.bf16.vlgmr.msra.gmra.mrb[68].mxu1 %v6247_v4  ;;  %v6380_v4 = vld [vmem:[%s6734_s4 + $0x2c] ss:$16 sps:$4 sm:$0xff]  }
 0xd6c   :  { %3044 = vmatpush1.bf16.msra.mxu0 %v6362_v15  ;;  %3085 = vmatpush1.bf16.msra.mxu1 %v6368_v21  ;;  %7544 = vst [vmem:[#allocation64_spill] sm:$0xff] %v6380_v4  ;;  %v6406_v21 = vld [vmem:[%s6734_s4 + $0x4c] ss:$16 sps:$4 sm:$0xff]  }
 0xd6d   :  { %3045 = vmatprep.subr.bf16.mxu0 %v6374_v45  ;;  %3086 = vmatprep.subr.bf16.mxu1 %v6380_v4  ;;  %v6394_v45 = vld [vmem:[%s6734_s4 + $0x28] ss:$16 sps:$4 sm:$0xff]   ;;  %v6400_v4 = vld [vmem:[%s6734_s4 + $0x44] ss:$16 sps:$4 sm:$0xff]   ;;  %7548 = vst [vmem:[#allocation11_spill] sm:$0xff] %v6406_v21 }
 0xd6e   :  { %3075 = vmatprep.mubr.bf16.mxu0 %v7136_v20  ;;  %3116 = vmatprep.mubr.bf16.mxu1 %v7136_v20  ;;  %7546 = vst [vmem:[#allocation66_spill] sm:$0xff] %v6394_v45  ;;  %7547 = vst [vmem:[#allocation10_spill] sm:$0xff] %v6400_v4  ;;  %v7571_v15 = vld [vmem:[#allocation87_spill] sm:$0xff] }
 0xd70   :  { %3046 = vmatpush1.bf16.msra.mxu0 %v6388_v11  ;;  %3087 = vmatpush1.bf16.msra.mxu1 %v6394_v45  ;;  %v6412_v11 = vld [vmem:[%s6734_s4 + $0x40] ss:$16 sps:$4 sm:$0xff]   ;;  %v6418_v45 = vld [vmem:[%s6734_s4 + $0x48] ss:$16 sps:$4 sm:$0xff]  }
 0xd71   :  { %3047 = vmatprep.subr.bf16.mxu0 %v6400_v4  ;;  %3088 = vmatprep.subr.bf16.mxu1 %v6406_v21  ;;  %7549 = vst [vmem:[#allocation71_spill] sm:$0xff] %v6412_v11  ;;  %7550 = vst [vmem:[#allocation73_spill] sm:$0xff] %v6418_v45  ;;  %v6424_v4 = vld [vmem:[%s6734_s4 + $0x64] ss:$16 sps:$4 sm:$0xff]   ;;  %v6430_v21 = vld [vmem:[%s6734_s4 + $0x6c] ss:$16 sps:$4 sm:$0xff]  }
 0xd72   :  { %7551 = vst [vmem:[#allocation72_spill] sm:$0xff] %v6424_v4  ;;  %7552 = vst [vmem:[#allocation74_spill] sm:$0xff] %v6430_v21 }
 0xd74   :  { %3048 = vmatpush1.bf16.msra.mxu0 %v6412_v11  ;;  %3089 = vmatpush1.bf16.msra.mxu1 %v6418_v45  ;;  %v6436_v11 = vld [vmem:[%s6734_s4 + $0x60] ss:$16 sps:$4 sm:$0xff]   ;;  %v6442_v45 = vld [vmem:[%s6734_s4 + $0x68] ss:$16 sps:$4 sm:$0xff]  }
 0xd75   :  { %3049 = vmatprep.subr.bf16.mxu0 %v6424_v4  ;;  %3090 = vmatprep.subr.bf16.mxu1 %v6430_v21  ;;  %7553 = vst [vmem:[#allocation12_spill] sm:$0xff] %v6436_v11  ;;  %7554 = vst [vmem:[#allocation13_spill] sm:$0xff] %v6442_v45  ;;  %v6448_v4 = vld [vmem:[%s6734_s4 + $0x84] ss:$16 sps:$4 sm:$0xff]   ;;  %v6454_v21 = vld [vmem:[%s6734_s4 + $0x8c] ss:$16 sps:$4 sm:$0xff]  }
 0xd76   :  { %7555 = vst [vmem:[#allocation14_spill] sm:$0xff] %v6448_v4  ;;  %7556 = vst [vmem:[#allocation15_spill] sm:$0xff] %v6454_v21 }
 0xd78   :  { %3050 = vmatpush1.bf16.msra.mxu0 %v6436_v11  ;;  %3091 = vmatpush1.bf16.msra.mxu1 %v6442_v45  ;;  %v6460_v11 = vld [vmem:[%s6734_s4 + $0x80] ss:$16 sps:$4 sm:$0xff]   ;;  %v6466_v45 = vld [vmem:[%s6734_s4 + $0x88] ss:$16 sps:$4 sm:$0xff]  }
 0xd79   :  { %3051 = vmatprep.subr.bf16.mxu0 %v6448_v4  ;;  %3092 = vmatprep.subr.bf16.mxu1 %v6454_v21  ;;  %7557 = vst [vmem:[#allocation79_spill] sm:$0xff] %v6460_v11  ;;  %7558 = vst [vmem:[#allocation81_spill] sm:$0xff] %v6466_v45  ;;  %v6472_v4 = vld [vmem:[%s6734_s4 + $0xa4] ss:$16 sps:$4 sm:$0xff]   ;;  %v6478_v21 = vld [vmem:[%s6734_s4 + $0xac] ss:$16 sps:$4 sm:$0xff]  }
 0xd7a   :  { %7559 = vst [vmem:[#allocation80_spill] sm:$0xff] %v6472_v4  ;;  %7560 = vst [vmem:[#allocation82_spill] sm:$0xff] %v6478_v21 }
 0xd7c   :  { %3052 = vmatpush1.bf16.msra.mxu0 %v6460_v11  ;;  %3093 = vmatpush1.bf16.msra.mxu1 %v6466_v45  ;;  %v6484_v11 = vld [vmem:[%s6734_s4 + $0xa0] ss:$16 sps:$4 sm:$0xff]   ;;  %v6490_v45 = vld [vmem:[%s6734_s4 + $0xa8] ss:$16 sps:$4 sm:$0xff]  }
 0xd7d   :  { %3053 = vmatprep.subr.bf16.mxu0 %v6472_v4  ;;  %3094 = vmatprep.subr.bf16.mxu1 %v6478_v21  ;;  %7561 = vst [vmem:[#allocation16_spill] sm:$0xff] %v6484_v11  ;;  %7562 = vst [vmem:[#allocation17_spill] sm:$0xff] %v6490_v45  ;;  %v6496_v4 = vld [vmem:[%s6734_s4 + $0xc4] ss:$16 sps:$4 sm:$0xff]   ;;  %v6502_v21 = vld [vmem:[%s6734_s4 + $0xcc] ss:$16 sps:$4 sm:$0xff]  }
 0xd7e   :  { %7563 = vst [vmem:[#allocation18_spill] sm:$0xff] %v6496_v4  ;;  %7564 = vst [vmem:[#allocation19_spill] sm:$0xff] %v6502_v21 }
 0xd80   :  { %3054 = vmatpush1.bf16.msra.mxu0 %v6484_v11  ;;  %3095 = vmatpush1.bf16.msra.mxu1 %v6490_v45  ;;  %v6508_v11 = vld [vmem:[%s6734_s4 + $0xc0] ss:$16 sps:$4 sm:$0xff]   ;;  %v6514_v45 = vld [vmem:[%s6734_s4 + $0xc8] ss:$16 sps:$4 sm:$0xff]  }
 0xd81   :  { %3055 = vmatprep.subr.bf16.mxu0 %v6496_v4  ;;  %3096 = vmatprep.subr.bf16.mxu1 %v6502_v21  ;;  %7565 = vst [vmem:[#allocation20_spill] sm:$0xff] %v6508_v11  ;;  %7566 = vst [vmem:[#allocation21_spill] sm:$0xff] %v6514_v45  ;;  %v6520_v4 = vld [vmem:[%s6734_s4 + $0xe4] ss:$16 sps:$4 sm:$0xff]   ;;  %v6526_v21 = vld [vmem:[%s6734_s4 + $0xec] ss:$16 sps:$4 sm:$0xff]  }
 0xd82   :  { %7567 = vst [vmem:[#allocation22_spill] sm:$0xff] %v6520_v4  ;;  %7568 = vst [vmem:[#allocation23_spill] sm:$0xff] %v6526_v21 }
 0xd84   :  { %3056 = vmatpush1.bf16.msra.mxu0 %v6508_v11  ;;  %3097 = vmatpush1.bf16.msra.mxu1 %v6514_v45  ;;  %v6532_v11 = vld [vmem:[%s6734_s4 + $0xe0] ss:$16 sps:$4 sm:$0xff]   ;;  %v6538_v45 = vld [vmem:[%s6734_s4 + $0xe8] ss:$16 sps:$4 sm:$0xff]  }
 0xd85   :  { %3057 = vmatprep.subr.bf16.mxu0 %v6520_v4  ;;  %3098 = vmatprep.subr.bf16.mxu1 %v6526_v21  ;;  %7569 = vst [vmem:[#allocation83_spill] sm:$0xff] %v6532_v11  ;;  %7570 = vst [vmem:[#allocation85_spill] sm:$0xff] %v6538_v45 }
 0xd88   :  { %3058 = vmatpush1.bf16.msra.mxu0 %v6532_v11  ;;  %3099 = vmatpush1.bf16.msra.mxu1 %v6538_v45  ;;  %v7573_v11 = vld [vmem:[#allocation88_spill] sm:$0xff] }
 0xd89   :  { %3158 = vmatprep.subr.bf16.mxu0 %v7491_v47  ;;  %3199 = vmatprep.subr.bf16.mxu1 %v7492_v62 }
 0xe3e   :  { %v2966_v4 = vpop.f32.mrb[68].mxu0  ;;  %v3007_v21 = vpop.f32.mrb[68].mxu1 }
 0xe3f   :  { %v3014_v44 = vadd.f32 %v2966_v4, %v7571_v15  ;;  %v3016_v50 = vadd.f32 %v3007_v21, %v7572_v23  ;;  %v2968_v22 = vpop.f32.mrb[69].mxu0  ;;  %v3009_v29 = vpop.f32.mrb[69].mxu1 }
 0xe40   :  { %v3015_v28 = vadd.f32 %v2968_v22, %v7573_v11  ;;  %v3017_v7 = vadd.f32 %v3009_v29, %v7574_v25  ;;  %v2970_v40 = vpop.f32.mrb[70].mxu0  ;;  %v3011_v58 = vpop.f32.mrb[70].mxu1 }
 0xe41   :  { %v3714_v35 = vmul.f32 -1.442695, %v3014_v44  ;;  %v2971_v45 = vpop.f32.mrb[71].mxu0  ;;  %v3012_v54 = vpop.f32.mrb[71].mxu1 }
 0xe42   :  { %v3715_v47 = vmul.f32 -1.442695, %v3015_v28  ;;  %v3716_v62 = vmul.f32 -1.442695, %v3017_v7 }
 0xe43   :  { %4246 = vpow2.f32 %v3714_v35 }
 0xe44   :  { %4248 = vpow2.f32 %v3715_v47 }
 0xe45   :  { %4250 = vpow2.f32 %v3716_v62 }
 0xe46   :  { %4252 = vtanh.f32 %v3016_v50 }
 0xe4d   :  { %v4247_v10 = vpop.eup %4246 }
 0xe4e   :  { %v4249_v57 = vpop.eup %4248  ;;  %v3024_v15 = vadd.f32 1.0, %v4247_v10 }
 0xe4f   :  { %v3025_v23 = vadd.f32 1.0, %v4249_v57  ;;  %v4251_v22 = vpop.eup %4250  ;;  %v7578_v57 = vld [vmem:[#allocation37_spill] sm:$0xff] }
 0xe50   :  { %4254 = vrcp.f32 %v3024_v15  ;;  %v4253_v21 = vpop.eup %4252  ;;  %v3034_v29 = vadd.f32 1.0, %v4251_v22 }
 0xe51   :  { %4256 = vrcp.f32 %v3025_v23 }
 0xe52   :  { %4258 = vrcp.f32 %v3034_v29 }
 0xe5a   :  { %v4255_v25 = vpop.eup %4254 }
 0xe5b   :  { %v4257_v40 = vpop.eup %4256  ;;  %v3038_v58 = vmul.f32 %v4255_v25, %v4253_v21 }
 0xe5c   :  { %v3037_v54 = vmul.f32 %v4257_v40, %v6244_v63  ;;  %v4259_v35 = vpop.eup %4258  ;;  %v7579_v63 = vld [vmem:[#allocation38_spill] sm:$0xff] }
 0xe5e   :  { %v6548_v28 = vadd.f32 %v3038_v58, %v3037_v54 }
 0xe60   :  { %4260 = vtanh.f32 %v6548_v28 }
 0xe6a   :  { %v4261_v10 = vpop.eup %4260 }
 0xe6b   :  { %v3041_v7 = vmul.f32 %v4261_v10, %v4259_v35 }
 0xe6d   :  { %v6551_v50 = vpack.c.bf16 %v3041_v7, %v3041_v7 }
 0xe6f   :  { %3076 = vmatmul.mubr.bf16.vlgmr.msra.gmra.mrb[64].mxu0 %v6551_v50  ;;  %3117 = vmatmul.mubr.bf16.vlgmr.msra.gmra.mrb[64].mxu1 %v6551_v50 }
 0xe70   :  { %3159 = vmatpush1.bf16.msra.mxu0 %v6023_v8  ;;  %3200 = vmatpush1.bf16.msra.mxu1 %v6026_v2  ;;  %v7575_v8 = vld [vmem:[#allocation34_spill] sm:$0xff]  ;;  %v7576_v2 = vld [vmem:[#allocation35_spill] sm:$0xff] }
 0xe71   :  { %3160 = vmatprep.subr.bf16.mxu0 %v6029_v42  ;;  %3201 = vmatprep.subr.bf16.mxu1 %v7497_v38  ;;  %v7577_v42 = vld [vmem:[#allocation36_spill] sm:$0xff]  ;;  %v7580_v38 = vld [vmem:[#allocation39_spill] sm:$0xff] }
 0xe72   :  { %3190 = vmatprep.mubr.bf16.mxu0 %v7136_v20  ;;  %3231 = vmatprep.mubr.bf16.mxu1 %v7136_v20 }
 0xe74   :  { %3161 = vmatpush1.bf16.msra.mxu0 %v7498_v1  ;;  %3202 = vmatpush1.bf16.msra.mxu1 %v7499_v48  ;;  %v7581_v1 = vld [vmem:[#allocation40_spill] sm:$0xff]  ;;  %v7582_v48 = vld [vmem:[#allocation43_spill] sm:$0xff] }
 0xe75   :  { %3162 = vmatprep.subr.bf16.mxu0 %v7500_v30  ;;  %3203 = vmatprep.subr.bf16.mxu1 %v7501_v6  ;;  %v7583_v30 = vld [vmem:[#allocation44_spill] sm:$0xff]  ;;  %v7584_v6 = vld [vmem:[#allocation45_spill] sm:$0xff] }
 0xe78   :  { %3163 = vmatpush1.bf16.msra.mxu0 %v7502_v26  ;;  %3204 = vmatpush1.bf16.msra.mxu1 %v7503_v60  ;;  %v7585_v26 = vld [vmem:[#allocation46_spill] sm:$0xff]  ;;  %v7586_v60 = vld [vmem:[#allocation47_spill] sm:$0xff] }
 0xe79   :  { %3164 = vmatprep.subr.bf16.mxu0 %v7504_v39  ;;  %3205 = vmatprep.subr.bf16.mxu1 %v7505_v49  ;;  %v7587_v39 = vld [vmem:[#allocation48_spill] sm:$0xff] }
 0xe7c   :  { %3165 = vmatpush1.bf16.msra.mxu0 %v7506_v32  ;;  %3206 = vmatpush1.bf16.msra.mxu1 %v7507_v12  ;;  %v7588_v12 = vld [vmem:[#allocation95_spill] sm:$0xff] }
 0xe7d   :  { %3166 = vmatprep.subr.bf16.mxu0 %v7508_v14  ;;  %3207 = vmatprep.subr.bf16.mxu1 %v7509_v16 }
 0xe80   :  { %3167 = vmatpush1.bf16.msra.mxu0 %v7510_v41  ;;  %3208 = vmatpush1.bf16.msra.mxu1 %v7511_v17 }
 0xe81   :  { %3168 = vmatprep.subr.bf16.mxu0 %v7512_v18  ;;  %3209 = vmatprep.subr.bf16.mxu1 %v7575_v8 }
 0xe84   :  { %3169 = vmatpush1.bf16.msra.mxu0 %v7576_v2  ;;  %3210 = vmatpush1.bf16.msra.mxu1 %v7577_v42 }
 0xe85   :  { %3170 = vmatprep.subr.bf16.mxu0 %v7578_v57  ;;  %3211 = vmatprep.subr.bf16.mxu1 %v7579_v63 }
 0xe88   :  { %3171 = vmatpush1.bf16.msra.mxu0 %v7580_v38  ;;  %3212 = vmatpush1.bf16.msra.mxu1 %v7581_v1  ;;  %v7608_v1 = vld [vmem:[#allocation66_spill] sm:$0xff] }
 0xe89   :  { %3172 = vmatprep.subr.bf16.mxu0 %v7582_v48  ;;  %3213 = vmatprep.subr.bf16.mxu1 %v7583_v30  ;;  %v7609_v48 = vld [vmem:[#allocation10_spill] sm:$0xff]  ;;  %v7610_v30 = vld [vmem:[#allocation11_spill] sm:$0xff] }
 0xe8c   :  { %3173 = vmatpush1.bf16.msra.mxu0 %v7584_v6  ;;  %3214 = vmatpush1.bf16.msra.mxu1 %v7585_v26  ;;  %v7612_v6 = vld [vmem:[#allocation73_spill] sm:$0xff]  ;;  %v7613_v26 = vld [vmem:[#allocation72_spill] sm:$0xff] }
 0xe8d   :  { %3240 = vmatprep.subr.bf16.mxu0 %v7586_v60  ;;  %3281 = vmatprep.subr.bf16.mxu1 %v7587_v39  ;;  %v7614_v60 = vld [vmem:[#allocation74_spill] sm:$0xff]  ;;  %v7615_v39 = vld [vmem:[#allocation12_spill] sm:$0xff] }
 0xf42   :  { %v3077_v49 = vpop.f32.mrb[64].mxu0  ;;  %v3118_v32 = vpop.f32.mrb[64].mxu1 }
 0xf43   :  { %v3827_v14 = vadd.f32 %v3077_v49, %v7588_v12  ;;  %v3079_v16 = vpop.f32.mrb[65].mxu0  ;;  %v3120_v41 = vpop.f32.mrb[65].mxu1  ;;  %v3829_v23 = vadd.f32 %v3118_v32, %v5271_v34  ;;  %v7616_v49 = vld [vmem:[#allocation13_spill] sm:$0xff]  ;;  %v7618_v32 = vld [vmem:[#allocation15_spill] sm:$0xff] }
 0xf44   :  { %v3828_v17 = vadd.f32 %v3079_v16, %v5260_v13  ;;  %v3081_v18 = vpop.f32.mrb[66].mxu0  ;;  %v3122_v44 = vpop.f32.mrb[66].mxu1  ;;  %v3830_v62 = vadd.f32 %v3120_v41, %v5266_v31  ;;  %v7620_v16 = vld [vmem:[#allocation81_spill] sm:$0xff]  ;;  %v7621_v41 = vld [vmem:[#allocation80_spill] sm:$0xff] }
 0xf45   :  { %v3717_v45 = vmul.f32 -1.442695, %v3827_v14  ;;  %v3082_v4 = vpop.f32.mrb[67].mxu0  ;;  %v3123_v11 = vpop.f32.mrb[67].mxu1  ;;  %v7619_v14 = vld [vmem:[#allocation79_spill] sm:$0xff]  ;;  %v7623_v18 = vld [vmem:[#allocation16_spill] sm:$0xff] }
 0xf46   :  { %v3718_v47 = vmul.f32 -1.442695, %v3828_v17  ;;  %v3719_v15 = vmul.f32 -1.442695, %v3830_v62  ;;  %v7622_v17 = vld [vmem:[#allocation82_spill] sm:$0xff]  ;;  %v7624_v44 = vld [vmem:[#allocation17_spill] sm:$0xff] }
 0xf47   :  { %4262 = vpow2.f32 %v3717_v45  ;;  %v7625_v45 = vld [vmem:[#allocation18_spill] sm:$0xff]  ;;  %v7626_v4 = vld [vmem:[#allocation19_spill] sm:$0xff]  ;;  %v7627_v11 = vld [vmem:[#allocation20_spill] sm:$0xff] }
 0xf48   :  { %4264 = vpow2.f32 %v3718_v47  ;;  %v7628_v47 = vld [vmem:[#allocation21_spill] sm:$0xff]  ;;  %v7629_v62 = vld [vmem:[#allocation22_spill] sm:$0xff] }
 0xf49   :  { %4266 = vpow2.f32 %v3719_v15  ;;  %v7630_v15 = vld [vmem:[#allocation23_spill] sm:$0xff] }
 0xf4a   :  { %4268 = vtanh.f32 %v3829_v23  ;;  %v7631_v23 = vld [vmem:[#allocation83_spill] sm:$0xff] }
 0xf51   :  { %v4263_v22 = vpop.eup %4262 }
 0xf52   :  { %v4265_v21 = vpop.eup %4264  ;;  %v3135_v25 = vadd.f32 1.0, %v4263_v22  ;;  %v7632_v22 = vld [vmem:[#allocation85_spill] sm:$0xff] }
 0xf53   :  { %v3136_v40 = vadd.f32 1.0, %v4265_v21  ;;  %v4267_v58 = vpop.eup %4266 }
 0xf54   :  { %4270 = vrcp.f32 %v3135_v25  ;;  %v4269_v29 = vpop.eup %4268  ;;  %v3145_v7 = vadd.f32 1.0, %v4267_v58 }
 0xf55   :  { %4272 = vrcp.f32 %v3136_v40  ;;  %v7633_v40 = vld [vmem:[#allocation91_spill] sm:$0xff] }
 0xf56   :  { %4274 = vrcp.f32 %v3145_v7  ;;  %v7635_v7 = vld [vmem:[#allocation92_spill] sm:$0xff] }
 0xf5e   :  { %v4271_v54 = vpop.eup %4270 }
 0xf5f   :  { %v4273_v35 = vpop.eup %4272  ;;  %v3149_v10 = vmul.f32 %v4271_v54, %v4269_v29  ;;  %v7634_v29 = vld [vmem:[#allocation93_spill] sm:$0xff] }
 0xf60   :  { %v3148_v8 = vmul.f32 %v4273_v35, %v6290_v27  ;;  %v4275_v42 = vpop.eup %4274  ;;  %v7605_v27 = vld [vmem:[#allocation63_spill] sm:$0xff] }
 0xf62   :  { %v6594_v2 = vadd.f32 %v3149_v10, %v3148_v8 }
 0xf64   :  { %4276 = vtanh.f32 %v6594_v2 }
 0xf6e   :  { %v4277_v57 = vpop.eup %4276 }
 0xf6f   :  { %v3152_v63 = vmul.f32 %v4277_v57, %v4275_v42  ;;  %v7636_v42 = vld [vmem:[#allocation94_spill] sm:$0xff] }
 0xf71   :  { %v3157_v38 = vpack.c.bf16 %v3152_v63, %v3152_v63 }
 0xf73   :  { %3191 = vmatmul.mubr.bf16.vlgmr.msra.gmra.mrb[72].mxu0 %v3157_v38  ;;  %3232 = vmatmul.mubr.bf16.vlgmr.msra.gmra.mrb[72].mxu1 %v3157_v38 }
 0xf74   :  { %3241 = vmatpush1.bf16.msra.mxu0 %v6129_v24  ;;  %3282 = vmatpush1.bf16.msra.mxu1 %v6132_v0  ;;  %v7589_v24 = vld [vmem:[#allocation51_spill] sm:$0xff]  ;;  %v7590_v0 = vld [vmem:[#allocation52_spill] sm:$0xff] }
 0xf75   :  { %3242 = vmatprep.subr.bf16.mxu0 %v6135_v51  ;;  %3283 = vmatprep.subr.bf16.mxu1 %v6138_v46  ;;  %v7591_v51 = vld [vmem:[#allocation53_spill] sm:$0xff]  ;;  %v7592_v46 = vld [vmem:[#allocation54_spill] sm:$0xff] }
 0xf76   :  { %3272 = vmatprep.mubr.bf16.mxu0 %v7136_v20  ;;  %3313 = vmatprep.mubr.bf16.mxu1 %v7136_v20 }
 0xf78   :  { %3243 = vmatpush1.bf16.msra.mxu0 %v6143_v9  ;;  %3284 = vmatpush1.bf16.msra.mxu1 %v6146_v36  ;;  %v7593_v9 = vld [vmem:[#allocation55_spill] sm:$0xff]  ;;  %v7594_v36 = vld [vmem:[#allocation56_spill] sm:$0xff] }
 0xf79   :  { %3244 = vmatprep.subr.bf16.mxu0 %v6149_v33  ;;  %3285 = vmatprep.subr.bf16.mxu1 %v6152_v43  ;;  %v7595_v33 = vld [vmem:[#allocation57_spill] sm:$0xff]  ;;  %v7596_v43 = vld [vmem:[#allocation58_spill] sm:$0xff] }
 0xf7c   :  { %3245 = vmatpush1.bf16.msra.mxu0 %v6155_v59  ;;  %3286 = vmatpush1.bf16.msra.mxu1 %v6158_v3  ;;  %v7597_v59 = vld [vmem:[#allocation59_spill] sm:$0xff]  ;;  %v7598_v3 = vld [vmem:[#allocation60_spill] sm:$0xff] }
 0xf7d   :  { %3246 = vmatprep.subr.bf16.mxu0 %v6161_v52  ;;  %3287 = vmatprep.subr.bf16.mxu1 %v6164_v55  ;;  %v7599_v52 = vld [vmem:[#allocation67_spill] sm:$0xff]  ;;  %v7600_v55 = vld [vmem:[#allocation69_spill] sm:$0xff] }
 0xf80   :  { %3247 = vmatpush1.bf16.msra.mxu0 %v7527_v56  ;;  %3288 = vmatpush1.bf16.msra.mxu1 %v7528_v19  ;;  %v7606_v56 = vld [vmem:[#allocation64_spill] sm:$0xff]  ;;  %v7607_v19 = vld [vmem:[#allocation65_spill] sm:$0xff] }
 0xf81   :  { %3248 = vmatprep.subr.bf16.mxu0 %v6173_v53  ;;  %3289 = vmatprep.subr.bf16.mxu1 %v6176_v61  ;;  %v7601_v53 = vld [vmem:[#allocation68_spill] sm:$0xff]  ;;  %v7602_v61 = vld [vmem:[#allocation70_spill] sm:$0xff] }
 0xf84   :  { %3249 = vmatpush1.bf16.msra.mxu0 %v6179_v5  ;;  %3290 = vmatpush1.bf16.msra.mxu1 %v6182_v37  ;;  %v7603_v5 = vld [vmem:[#allocation61_spill] sm:$0xff]  ;;  %v7604_v37 = vld [vmem:[#allocation62_spill] sm:$0xff] }
 0xf85   :  { %3250 = vmatprep.subr.bf16.mxu0 %v7589_v24  ;;  %3291 = vmatprep.subr.bf16.mxu1 %v7590_v0 }
 0xf88   :  { %3251 = vmatpush1.bf16.msra.mxu0 %v7591_v51  ;;  %3292 = vmatpush1.bf16.msra.mxu1 %v7592_v46 }
 0xf89   :  { %3252 = vmatprep.subr.bf16.mxu0 %v7593_v9  ;;  %3293 = vmatprep.subr.bf16.mxu1 %v7594_v36 }
 0xf8c   :  { %3253 = vmatpush1.bf16.msra.mxu0 %v7595_v33  ;;  %3294 = vmatpush1.bf16.msra.mxu1 %v7596_v43 }
 0xf8d   :  { %3254 = vmatprep.subr.bf16.mxu0 %v7597_v59  ;;  %3295 = vmatprep.subr.bf16.mxu1 %v7598_v3 }
 0xf90   :  { %3255 = vmatpush1.bf16.msra.mxu0 %v7599_v52  ;;  %3296 = vmatpush1.bf16.msra.mxu1 %v7600_v55 }
 0xf91   :  { %3351 = vmatprep.subr.bf16.mxu0 %v7601_v53  ;;  %3392 = vmatprep.subr.bf16.mxu1 %v7602_v61 }
 0xf93   :  { %3273 = vmatmul.mubr.bf16.vlgmr.msra.gmra.mrb[76].mxu0 %v6551_v50  ;;  %3314 = vmatmul.mubr.bf16.vlgmr.msra.gmra.mrb[76].mxu1 %v6551_v50  ;;  %v7611_v50 = vld [vmem:[#allocation71_spill] sm:$0xff] }
 0xf94   :  { %3352 = vmatpush1.bf16.msra.mxu0 %v7603_v5  ;;  %3393 = vmatpush1.bf16.msra.mxu1 %v7604_v37 }
 0xf95   :  { %3353 = vmatprep.subr.bf16.mxu0 %v7605_v27  ;;  %3394 = vmatprep.subr.bf16.mxu1 %v7606_v56 }
 0xf96   :  { %3383 = vmatprep.mubr.bf16.mxu0 %v7136_v20  ;;  %3424 = vmatprep.mubr.bf16.mxu1 %v7136_v20  ;;  %v7617_v20 = vld [vmem:[#allocation14_spill] sm:$0xff] }
 0xf98   :  { %3354 = vmatpush1.bf16.msra.mxu0 %v7607_v19  ;;  %3395 = vmatpush1.bf16.msra.mxu1 %v7608_v1 }
 0xf99   :  { %3355 = vmatprep.subr.bf16.mxu0 %v7609_v48  ;;  %3396 = vmatprep.subr.bf16.mxu1 %v7610_v30  ;;  %v3461_v30 = vld [vmem:[%s6737_s7] sm:$0xff] }
 0xf9c   :  { %3356 = vmatpush1.bf16.msra.mxu0 %v7611_v50  ;;  %3397 = vmatpush1.bf16.msra.mxu1 %v7612_v6  ;;  %v3462_v50 = vld [vmem:[%s6737_s7 + $0x8] sm:$0xff] }
 0xf9d   :  { %3357 = vmatprep.subr.bf16.mxu0 %v7613_v26  ;;  %3398 = vmatprep.subr.bf16.mxu1 %v7614_v60  ;;  %v3780_v6 = vpack.c.bf16 %v3462_v50, %v3461_v30  ;;  %v4579_v26 = vmov 0.0|0.0   ;;  %v3464_v60 = vld [vmem:[%s6737_s7 + $0x18] sm:$0xff] }
 0xfa0   :  { %3358 = vmatpush1.bf16.msra.mxu0 %v7615_v39  ;;  %3399 = vmatpush1.bf16.msra.mxu1 %v7616_v49  ;;  %v3465_v49 = vld [vmem:[%s6737_s7 + $0x20] sm:$0xff] }
 0xfa1   :  { %3359 = vmatprep.subr.bf16.mxu0 %v7617_v20  ;;  %3400 = vmatprep.subr.bf16.mxu1 %v7618_v32  ;;  %v3466_v20 = vld [vmem:[%s6737_s7 + $0x28] sm:$0xff] }
 0xfa2   :  { %v3786_v32 = vpack.c.bf16 %v3466_v20, %v3465_v49 }
 0xfa4   :  { %3360 = vmatpush1.bf16.msra.mxu0 %v7619_v14  ;;  %3401 = vmatpush1.bf16.msra.mxu1 %v7620_v16  ;;  %v3467_v14 = vld [vmem:[%s6737_s7 + $0x30] sm:$0xff]  ;;  %v3468_v16 = vld [vmem:[%s6737_s7 + $0x38] sm:$0xff] }
 0xfa5   :  { %3361 = vmatprep.subr.bf16.mxu0 %v7621_v41  ;;  %3402 = vmatprep.subr.bf16.mxu1 %v7622_v17  ;;  %v3789_v41 = vpack.c.bf16 %v3468_v16, %v3467_v14  ;;  %v3469_v17 = vld [vmem:[%s6737_s7 + $0x40] sm:$0xff] }
 0xfa8   :  { %3362 = vmatpush1.bf16.msra.mxu0 %v7623_v18  ;;  %3403 = vmatpush1.bf16.msra.mxu1 %v7624_v44  ;;  %v3470_v18 = vld [vmem:[%s6737_s7 + $0x48] sm:$0xff] }
 0xfa9   :  { %3363 = vmatprep.subr.bf16.mxu0 %v7625_v45  ;;  %3404 = vmatprep.subr.bf16.mxu1 %v7626_v4  ;;  %v3792_v44 = vpack.c.bf16 %v3470_v18, %v3469_v17  ;;  %v3471_v45 = vld [vmem:[%s6737_s7 + $0x50] sm:$0xff]  ;;  %v3472_v4 = vld [vmem:[%s6737_s7 + $0x58] sm:$0xff] }
 0xfac   :  { %3364 = vmatpush1.bf16.msra.mxu0 %v7627_v11  ;;  %3405 = vmatpush1.bf16.msra.mxu1 %v7628_v47  ;;  %v3473_v11 = vld [vmem:[%s6737_s7 + $0x60] sm:$0xff]  ;;  %v3795_v47 = vpack.c.bf16 %v3472_v4, %v3471_v45 }
 0xfad   :  { %3365 = vmatprep.subr.bf16.mxu0 %v7629_v62  ;;  %3406 = vmatprep.subr.bf16.mxu1 %v7630_v15  ;;  %v3474_v62 = vld [vmem:[%s6737_s7 + $0x68] sm:$0xff]  ;;  %v7637_v15 = vmov 0.0  }
 0xfb0   :  { %3366 = vmatpush1.bf16.msra.mxu0 %v7631_v23  ;;  %3407 = vmatpush1.bf16.msra.mxu1 %v7632_v22  ;;  %v3798_v23 = vpack.c.bf16 %v3474_v62, %v3473_v11  ;;  %v3475_v22 = vld [vmem:[%s6737_s7 + $0x70] sm:$0xff] }
 0xfb1   :  { %3779 = vmatprep.subr.bf16.mxu0 %v4579_v26 }
0x1066   :  { %v3274_v21 = vpop.f32.mrb[76].mxu0  ;;  %v3315_v25 = vpop.f32.mrb[76].mxu1 }
0x1067   :  { %v3322_v58 = vadd.f32 %v3274_v21, %v7633_v40  ;;  %v3324_v54 = vadd.f32 %v3315_v25, %v7634_v29  ;;  %v3276_v35 = vpop.f32.mrb[77].mxu0  ;;  %v3317_v10 = vpop.f32.mrb[77].mxu1  ;;  %v3476_v21 = vld [vmem:[%s6737_s7 + $0x78] sm:$0xff] }
0x1068   :  { %v3323_v8 = vadd.f32 %v3276_v35, %v7635_v7  ;;  %v3325_v57 = vadd.f32 %v3317_v10, %v7636_v42  ;;  %v3278_v63 = vpop.f32.mrb[78].mxu0  ;;  %v3319_v38 = vpop.f32.mrb[78].mxu1  ;;  %v3801_v25 = vpack.c.bf16 %v3476_v21, %v3475_v22 }
0x1069   :  { %v3720_v24 = vmul.f32 -1.442695, %v3322_v58  ;;  %v3279_v0 = vpop.f32.mrb[79].mxu0  ;;  %v3320_v51 = vpop.f32.mrb[79].mxu1 }
0x106a   :  { %v3721_v46 = vmul.f32 -1.442695, %v3323_v8  ;;  %v3722_v9 = vmul.f32 -1.442695, %v3325_v57 }
0x106b   :  { %4278 = vpow2.f32 %v3720_v24 }
0x106c   :  { %4280 = vpow2.f32 %v3721_v46 }
0x106d   :  { %4282 = vpow2.f32 %v3722_v9 }
0x106e   :  { %4284 = vtanh.f32 %v3324_v54 }
0x1075   :  { %v4279_v36 = vpop.eup %4278 }
0x1076   :  { %v4281_v33 = vpop.eup %4280  ;;  %v3332_v43 = vadd.f32 1.0, %v4279_v36 }
0x1077   :  { %v3333_v59 = vadd.f32 1.0, %v4281_v33  ;;  %v4283_v3 = vpop.eup %4282 }
0x1078   :  { %4286 = vrcp.f32 %v3332_v43  ;;  %v4285_v52 = vpop.eup %4284  ;;  %v3342_v5 = vadd.f32 1.0, %v4283_v3 }
0x1079   :  { %4288 = vrcp.f32 %v3333_v59 }
0x107a   :  { %4290 = vrcp.f32 %v3342_v5  ;;  %v3726_v5 = vld [vmem:[%s6738_s8] ss:$0 sm:$0xff] }
0x1082   :  { %v4287_v55 = vpop.eup %4286 }
0x1083   :  { %v4289_v53 = vpop.eup %4288  ;;  %v3346_v61 = vmul.f32 %v4287_v55, %v4285_v52 }
0x1084   :  { %v3345_v37 = vmul.f32 %v4289_v53, %v6548_v28  ;;  %v4291_v56 = vpop.eup %4290  ;;  %v3463_v28 = vld [vmem:[%s6737_s7 + $0x10] sm:$0xff] }
0x1085   :  { %v3783_v39 = vpack.c.bf16 %v3464_v60, %v3463_v28 }
0x1086   :  { %v3347_v27 = vadd.f32 %v3346_v61, %v3345_v37 }
0x1088   :  { %4292 = vtanh.f32 %v3347_v27 }
0x1092   :  { %v4293_v19 = vpop.eup %4292 }
0x1093   :  { %v3349_v1 = vmul.f32 %v4293_v19, %v4291_v56 }
0x1095   :  { %v3350_v48 = vpack.c.bf16 %v3349_v1, %v3349_v1 }
0x1097   :  { %3384 = vmatmul.mubr.bf16.vlgmr.msra.gmra.mrb[72].mxu0 %v3350_v48  ;;  %3425 = vmatmul.mubr.bf16.vlgmr.msra.gmra.mrb[72].mxu1 %v3350_v48 }
0x1098   :  { %3781 = vmatpush3.bf16.msra.mxu0 %v3780_v6  ;;  %3776 = vmatprep.mubr.msk.f32.mxu0 %vm4580_vm2, %v7637_v15 }
0x1099   :  { %3782 = vmatprep.subr.bf16.mxu0 %v4579_v26 }
0x109c   :  { %3784 = vmatpush3.bf16.msra.mxu0 %v3783_v39 }
0x109d   :  { %3785 = vmatprep.subr.bf16.mxu0 %v4579_v26 }
0x10a0   :  { %3787 = vmatpush3.bf16.msra.mxu0 %v3786_v32 }
0x10a1   :  { %3788 = vmatprep.subr.bf16.mxu0 %v4579_v26 }
0x10a4   :  { %3790 = vmatpush3.bf16.msra.mxu0 %v3789_v41 }
0x10a5   :  { %3791 = vmatprep.subr.bf16.mxu0 %v4579_v26 }
0x10a8   :  { %3793 = vmatpush3.bf16.msra.mxu0 %v3792_v44 }
0x10a9   :  { %3794 = vmatprep.subr.bf16.mxu0 %v4579_v26 }
0x10ac   :  { %3796 = vmatpush3.bf16.msra.mxu0 %v3795_v47 }
0x10ad   :  { %3797 = vmatprep.subr.bf16.mxu0 %v4579_v26 }
0x10b0   :  { %3799 = vmatpush3.bf16.msra.mxu0 %v3798_v23 }
0x10b1   :  { %3800 = vmatprep.subr.bf16.mxu0 %v4579_v26 }
0x10b4   :  { %3802 = vmatpush3.bf16.msra.mxu0 %v3801_v25 }
0x116a   :  { %v3385_v40 = vpop.f32.mrb[72].mxu0  ;;  %v3426_v58 = vpop.f32.mrb[72].mxu1 }
0x116b   :  { %v3831_v29 = vadd.f32 %v3385_v40, %v7588_v12  ;;  %v3387_v54 = vpop.f32.mrb[73].mxu0  ;;  %v3428_v35 = vpop.f32.mrb[73].mxu1  ;;  %v3833_v51 = vadd.f32 %v3426_v58, %v5271_v34 }
0x116c   :  { %v3832_v10 = vadd.f32 %v3387_v54, %v5260_v13  ;;  %v3389_v7 = vpop.f32.mrb[74].mxu0  ;;  %v3430_v8 = vpop.f32.mrb[74].mxu1  ;;  %v3834_v24 = vadd.f32 %v3428_v35, %v5266_v31 }
0x116d   :  { %v3723_v42 = vmul.f32 -1.442695, %v3831_v29  ;;  %v3390_v57 = vpop.f32.mrb[75].mxu0  ;;  %v3431_v63 = vpop.f32.mrb[75].mxu1 }
0x116e   :  { %v3724_v38 = vmul.f32 -1.442695, %v3832_v10  ;;  %v3725_v0 = vmul.f32 -1.442695, %v3834_v24 }
0x116f   :  { %4294 = vpow2.f32 %v3723_v42 }
0x1170   :  { %4296 = vpow2.f32 %v3724_v38 }
0x1171   :  { %4298 = vpow2.f32 %v3725_v0 }
0x1172   :  { %4300 = vtanh.f32 %v3833_v51 }
0x1179   :  { %v4295_v46 = vpop.eup %4294 }
0x117a   :  { %v4297_v9 = vpop.eup %4296  ;;  %v3443_v12 = vadd.f32 1.0, %v4295_v46 }
0x117b   :  { %v3444_v36 = vadd.f32 1.0, %v4297_v9  ;;  %v4299_v13 = vpop.eup %4298 }
0x117c   :  { %4302 = vrcp.f32 %v3443_v12  ;;  %v4301_v33 = vpop.eup %4300  ;;  %v3453_v52 = vadd.f32 1.0, %v4299_v13 }
0x117d   :  { %4304 = vrcp.f32 %v3444_v36 }
0x117e   :  { %4306 = vrcp.f32 %v3453_v52 }
0x1186   :  { %v4303_v43 = vpop.eup %4302 }
0x1187   :  { %v4305_v59 = vpop.eup %4304  ;;  %v3457_v3 = vmul.f32 %v4303_v43, %v4301_v33 }
0x1188   :  { %v3456_v55 = vmul.f32 %v4305_v59, %v6594_v2  ;;  %v4307_v34 = vpop.eup %4306 }
0x118a   :  { %v3458_v31 = vadd.f32 %v3457_v3, %v3456_v55 }
0x118c   :  { %4308 = vtanh.f32 %v3458_v31 }
0x1196   :  { %v4309_v53 = vpop.eup %4308 }
0x1197   :  { %v3460_v61 = vmul.f32 %v4309_v53, %v4307_v34 }
0x1199   :  { %3777 = vmatmul.mubr.f32.vlgmr.msra.gmra.mrb[80].mxu0 %v3460_v61 }
0x126c   :  { %v3550_v37 = vpop.f32.mrb[80].mxu0 }
0x126d   :  { %v3551_v27 = vadd.f32 %v3726_v5, %v3550_v37  ;;  %v3778_v56 = vpop.f32.mrb[81].mxu0 }
0x126f   :  { %3555 = vst.msk [vmem:[%s6739_s9] sm:$0xff] %vm3554_vm3, %v3551_v27 }
0x1270   :  { %3560 = vsyncpa [#allocation4], 1 }
0x1271   :  { %3561 = vsyncpa [#allocation6], 1 }

</bundles_post_ra>
